<compile_context>
chip_gen: v5e
topology: v5e:2x2
jax: 0.10.0
libtpu: 0.0.40
codegen_flags: <defaults>
</compile_context>

<pallas_src>
import math
import functools

import numpy as np
import jax
import jax.numpy as jnp
from jax.experimental import pallas as pl
from jax.experimental.pallas import tpu as pltpu

# ----------------------------- configuration --------------------------------
B, L = 2, 16                 # batch, sequence length
HIDDEN = 64                  # hidden_size
N_HEADS = 4
HEAD_DIM = HIDDEN // N_HEADS
COND = 64                    # cond_dim
N_BLOCKS = 2
TOKENS = 31
ABSORB = True                # graph_type == 'absorb'
VOCAB = TOKENS + (1 if ABSORB else 0)
VPAD = 128                   # vocab padded to one full lane tile
MLP_RATIO = 4
FREQ = 256                   # frequency_embedding_size
SCALE_BY_SIGMA = True
LN_EPS = 1e-5
GELU_C = 0.7978845608028654  # sqrt(2/pi)

BL = B * L                   # batch folded into rows (32)
NK = N_HEADS * BL            # head-expanded row axis for attention (128)
N_CHUNKS = N_BLOCKS * 5 + 2  # adaLN chunks actually used by the fwd pass
CHUNK_PAD = 128              # each 64-wide adaLN chunk padded to a lane tile


# ------------------------------ helpers --------------------------------------
def _layer_norm(v, w):
    """F.layer_norm(x.float(), [dim]) * weight  (weight-only LayerNorm)."""
    mu = jnp.mean(v, axis=-1, keepdims=True)
    var = jnp.mean((v - mu) ** 2, axis=-1, keepdims=True)
    return (v - mu) * jax.lax.rsqrt(var + LN_EPS) * w


def _rows(v, seq_len, batch):
    """Broadcast a per-batch (B, C) array to per-row (B*L, C); sublane-cheap."""
    return jnp.concatenate(
        [jnp.broadcast_to(v[b:b + 1, :], (seq_len, v.shape[-1]))
         for b in range(batch)], axis=0)


# ------------------------------ fused kernel ---------------------------------
def fused_sedd_kernel(tf_ref, x_ref, idx_ref, biasb_ref,
                      cos_ref, sin_ref, rot_ref, qmask_ref, bmrow_ref,
                      sw1_ref, sb1_ref, sw2_ref, sb2_ref,
                      ln1_ref, wq_ref, wk_ref, wv_ref, ln2_ref,
                      wm1_ref, bm1_ref, wm2_ref, bm2_ref,
                      wada_ref, bada_ref,
                      lnf_ref, wlin_ref,
                      o_ref,
                      *, n_blocks, n_heads, head_dim, batch, seq_len, vpad):
    H = n_heads * head_dim
    bl = batch * seq_len
    inv_scale = 1.0 / math.sqrt(head_dim)

    # ---- conditioning: c = silu(sigma_map(sigma))  (f32, outside autocast) ----
    tf = tf_ref[...]                                                  # (B, FREQ)
    h = jnp.dot(tf, sw1_ref[...], preferred_element_type=jnp.float32) + sb1_ref[...]
    h = h * jax.nn.sigmoid(h)                                         # SiLU
    c = jnp.dot(h, sw2_ref[...], preferred_element_type=jnp.float32) + sb2_ref[...]
    c = c * jax.nn.sigmoid(c)                                         # outer F.silu
    c_bf = c.astype(jnp.bfloat16)                                     # (B, COND)

    # ---- all adaLN projections fused into one matmul (chunks 128-padded) ----
    ada = (jnp.dot(c_bf, wada_ref[...], preferred_element_type=jnp.float32)
           + bada_ref[...])                                           # (B, NC*128)
    ada_rows = _rows(ada, seq_len, batch)                             # (BL, NC*128)

    def chunk(j):                                                     # (BL, H)
        return ada_rows[:, j * CHUNK_PAD: j * CHUNK_PAD + H]

    cos = cos_ref[...]                                                # (2*BL, H)
    sin = sin_ref[...]
    rot = rot_ref[...]                                                # (H, H) bf16
    qmask = qmask_ref[...]                                            # (NK, H) f32
    bmrow = bmrow_ref[...]                                            # (NK, BL) f32

    xf = x_ref[...]                                                   # (BL, H) f32

    for i in range(n_blocks):
        base = 5 * i
        shift_msa, scale_msa = chunk(base + 0), chunk(base + 1)
        shift_mlp, scale_mlp = chunk(base + 2), chunk(base + 3)
        gate_mlp = chunk(base + 4)                                    # gate_msa unused

        # norm1 + modulate, three N=64 projections (tile-friendly q/k/v).
        hmod = _layer_norm(xf, ln1_ref[i]) * (1.0 + scale_msa) + shift_msa
        hmod_bf = hmod.astype(jnp.bfloat16)
        q = jnp.dot(hmod_bf, wq_ref[i], preferred_element_type=jnp.float32)
        k = jnp.dot(hmod_bf, wk_ref[i], preferred_element_type=jnp.float32)
        v = jnp.dot(hmod_bf, wv_ref[i], preferred_element_type=jnp.float32)

        # RoPE: one rotate-half matmul on stacked [q; k]  (2*BL, H).
        qk = jnp.concatenate([q, k], axis=0)
        qk = qk * cos + jnp.dot(qk.astype(jnp.bfloat16), rot,
                                preferred_element_type=jnp.float32) * sin
        qf = qk[:bl]
        kb = qk[bl:].astype(jnp.bfloat16)
        vb = v.astype(jnp.bfloat16)

        # TODO(synk): reference calls F.scaled_dot_product_attention on
        # (b, s, h, d) tensors and then `rearrange(x[0], 'b s h d -> b s (h d)')`
        # (inconsistent in PyTorch); we implement the intended standard
        # per-head attention (eval mode, dropout off, scale = 1/sqrt(head_dim)).
        # Heads are expanded along sublanes: row R = head*BL + row.
        qe = (jnp.concatenate([qf] * n_heads, axis=0) * qmask).astype(jnp.bfloat16)
        s = jnp.einsum('rj,kj->rk', qe, kb,
                       preferred_element_type=jnp.float32) * inv_scale   # (NK, BL)
        s = s * bmrow                                     # zero other-batch cols
        s_max = jnp.max(s, axis=-1, keepdims=True)
        e = jnp.exp(s - s_max) * bmrow
        denom = jnp.sum(e, axis=-1, keepdims=True)
        p = e * pl.reciprocal(denom + 1e-30, approx=True)
        o_big = jnp.dot(p.astype(jnp.bfloat16), vb,
                        preferred_element_type=jnp.float32)              # (NK, H)
        o_big = o_big * qmask                             # keep each head's lanes
        attn = o_big[0:bl]
        for hh in range(1, n_heads):
            attn = attn + o_big[hh * bl:(hh + 1) * bl]                   # (BL, H)

        # norm2 + modulate + MLP, then bias_dropout_add_scale (inference):
        # out = attn + gate_mlp * mlp(...)  (residual is the attn output,
        # exactly as in the reference forward; attn_out / x_skip are dead code).
        h2 = _layer_norm(attn, ln2_ref[i]) * (1.0 + scale_mlp) + shift_mlp
        m = (jnp.dot(h2.astype(jnp.bfloat16), wm1_ref[i],
                     preferred_element_type=jnp.float32) + bm1_ref[i])
        m = 0.5 * m * (1.0 + jnp.tanh(GELU_C * (m + 0.044715 * m * m * m)))
        m = (jnp.dot(m.astype(jnp.bfloat16), wm2_ref[i],
                     preferred_element_type=jnp.float32) + bm2_ref[i])
        xf = attn + gate_mlp * m

    # ---- final layer + scale_by_sigma + scatter-zero (128-lane dense) ----
    shift_f = chunk(5 * n_blocks + 0)
    scale_f = chunk(5 * n_blocks + 1)
    hf = _layer_norm(xf, lnf_ref[...]) * (1.0 + scale_f) + shift_f
    bias_rows = _rows(biasb_ref[...], seq_len, batch)                 # (BL, VPAD)
    raw = (jnp.dot(hf.astype(jnp.bfloat16), wlin_ref[...],
                   preferred_element_type=jnp.float32) + bias_rows)
    # torch.scatter(x, -1, indices[...,None], zeros) == multiply by keep mask,
    # built in-kernel from indices (no one_hot DMA).
    col = jax.lax.broadcasted_iota(jnp.int32, (bl, vpad), 1)
    keep = (col != idx_ref[...]).astype(jnp.float32)
    o_ref[...] = (raw * keep).astype(o_ref.dtype)


# ------------------------------ constant tables -------------------------------
def timestep_embedding(t, dim=FREQ, max_period=10000.0):
    half = dim // 2
    freqs = jnp.exp(-math.log(max_period) *
                    jnp.arange(half, dtype=jnp.float32) / half)
    args = t[:, None].astype(jnp.float32) * freqs[None]
    return jnp.concatenate([jnp.cos(args), jnp.sin(args)], axis=-1)


def full_rotary_tables(seq_len, n_heads, head_dim, base=10000.0):
    """cos/sin tables tiled across heads and across the stacked [q;k] rows."""
    inv_freq = 1.0 / (base ** (np.arange(0, head_dim, 2, dtype=np.float32) / head_dim))
    t = np.arange(seq_len, dtype=np.float32)
    freqs = np.outer(t, inv_freq)                        # (L, d/2)
    emb = np.concatenate([freqs, freqs], axis=-1)        # (L, d)
    cos = np.tile(np.cos(emb), (1, n_heads))             # (L, H)
    sin = np.tile(np.sin(emb), (1, n_heads))
    cos2 = np.tile(cos, (2 * B, 1))                      # (2*B*L, H), pos = row % L
    sin2 = np.tile(sin, (2 * B, 1))
    return jnp.asarray(cos2), jnp.asarray(sin2)


def rotate_half_matrix(n_heads, head_dim):
    """(H, H) block-diagonal matrix M with (v @ M) == rotate_half(v) per head."""
    Hh = n_heads * head_dim
    half = head_dim // 2
    R = np.zeros((Hh, Hh), np.float32)
    for h in range(n_heads):
        base = h * head_dim
        for j in range(half):
            R[base + j + half, base + j] = -1.0          # out[j]      = -v[j+half]
            R[base + j, base + j + half] = 1.0           # out[j+half] =  v[j]
    return jnp.asarray(R, dtype=jnp.bfloat16)


def attention_masks():
    """qmask: per-head lane mask for head-expanded rows; bmrow: same-batch mask."""
    rhead = np.arange(NK) // BL                          # head id of expanded row
    rbatch = (np.arange(NK) % BL) // L                   # batch id of expanded row
    jhead = np.arange(HIDDEN) // HEAD_DIM                # head id of hidden lane
    kbatch = np.arange(BL) // L                          # batch id of key row
    qmask = (rhead[:, None] == jhead[None, :]).astype(np.float32)    # (NK, H)
    bmrow = (rbatch[:, None] == kbatch[None, :]).astype(np.float32)  # (NK, BL)
    return jnp.asarray(qmask), jnp.asarray(bmrow)


# ------------------------------ glue / wrapper --------------------------------
@jax.jit
def sedd_forward(params, indices, cond, sigma):
    # `cond` is accepted but unused, exactly as in the reference forward.
    del cond
    bsz, seq = indices.shape

    x2d = params["embedding"][indices].reshape(bsz * seq, HIDDEN)     # (BL,H) f32
    tf = timestep_embedding(sigma, FREQ)                              # (B, FREQ)

    if SCALE_BY_SIGMA:
        esig = jnp.log(jnp.where(sigma < 0.5, jnp.expm1(sigma),
                                 jnp.exp(sigma) - 1.0))
        shift = esig + math.log(VOCAB - 1)                            # (B,)
    else:
        shift = jnp.zeros((bsz,), jnp.float32)
    biasb = params["b_lin_pad"] - shift[:, None]                      # (B, VPAD)
    idx2d = indices.reshape(bsz * seq, 1).astype(jnp.int32)           # (BL, 1)

    operands = (tf, x2d, idx2d, biasb,
                params["rope_cos"], params["rope_sin"], params["rot_mat"],
                params["qmask"], params["bmrow"],
                params["sig_w1"], params["sig_b1"],
                params["sig_w2"], params["sig_b2"],
                params["ln1"], params["w_q"], params["w_k"], params["w_v"],
                params["ln2"],
                params["w_m1"], params["b_m1"], params["w_m2"], params["b_m2"],
                params["w_ada_all"], params["b_ada_all"],
                params["ln_f"], params["w_lin_pad"])

    kern = functools.partial(fused_sedd_kernel, n_blocks=N_BLOCKS,
                             n_heads=N_HEADS, head_dim=HEAD_DIM,
                             batch=bsz, seq_len=seq, vpad=VPAD)
    vmem = pl.BlockSpec(memory_space=pltpu.MemorySpace.VMEM)
    out = pl.pallas_call(
        kern,
        out_shape=jax.ShapeDtypeStruct((bsz * seq, VPAD), jnp.bfloat16),
        in_specs=[vmem] * len(operands),
        out_specs=vmem,
    )(*operands)
    return out.reshape(bsz, seq, VPAD)[:, :, :VOCAB]


# ------------------------------ parameters -----------------------------------
def init_params(key):
    keys = iter(jax.random.split(key, 40))

    def w(shape, scale, dtype=jnp.float32):
        return (jax.random.normal(next(keys), shape, jnp.float32) * scale).astype(dtype)

    def pad_lanes(a, width):
        pads = ((0, 0),) * (a.ndim - 1) + ((0, width - a.shape[-1]),)
        return jnp.pad(a, pads)

    p = {
        # embedding kept f32 (reference gathers f32; norm1 runs in f32)
        "embedding": w((VOCAB, HIDDEN), 0.02),
        # TimestepEmbedder (outside autocast -> f32)
        "sig_w1": w((FREQ, COND), 1.0 / math.sqrt(FREQ)),
        "sig_b1": w((1, COND), 0.02),
        "sig_w2": w((COND, COND), 1.0 / math.sqrt(COND)),
        "sig_b2": w((1, COND), 0.02),
        # DDiT blocks, stacked along leading N_BLOCKS axis, matmul weights bf16.
        "ln1": jnp.ones((N_BLOCKS, 1, HIDDEN), jnp.float32),
        "w_q": w((N_BLOCKS, HIDDEN, HIDDEN), 1.0 / math.sqrt(HIDDEN), jnp.bfloat16),
        "w_k": w((N_BLOCKS, HIDDEN, HIDDEN), 1.0 / math.sqrt(HIDDEN), jnp.bfloat16),
        "w_v": w((N_BLOCKS, HIDDEN, HIDDEN), 1.0 / math.sqrt(HIDDEN), jnp.bfloat16),
        "ln2": jnp.ones((N_BLOCKS, 1, HIDDEN), jnp.float32),
        "w_m1": w((N_BLOCKS, HIDDEN, MLP_RATIO * HIDDEN),
                  1.0 / math.sqrt(HIDDEN), jnp.bfloat16),
        "b_m1": w((N_BLOCKS, 1, MLP_RATIO * HIDDEN), 0.02),
        "w_m2": w((N_BLOCKS, MLP_RATIO * HIDDEN, HIDDEN),
                  1.0 / math.sqrt(MLP_RATIO * HIDDEN), jnp.bfloat16),
        "b_m2": w((N_BLOCKS, 1, HIDDEN), 0.02),
        "ln_f": jnp.ones((1, HIDDEN), jnp.float32),
    }
    # adaLN projections (5 used chunks per block + 2 final chunks; gate_msa is
    # dead code in the reference forward), fused along N, each 64-wide chunk
    # padded to a 128-lane tile.  Module zero-inits these; random here so the
    # kernel compute is non-trivial.
    wada = w((COND, N_CHUNKS, HIDDEN), 0.02)
    bada = w((1, N_CHUNKS, HIDDEN), 0.02)
    p["w_ada_all"] = (pad_lanes(wada, CHUNK_PAD)
                      .reshape(COND, N_CHUNKS * CHUNK_PAD).astype(jnp.bfloat16))
    p["b_ada_all"] = pad_lanes(bada, CHUNK_PAD).reshape(1, N_CHUNKS * CHUNK_PAD)
    # final linear padded to 128 vocab lanes (lane-dense MXU N and stores)
    p["w_lin_pad"] = pad_lanes(w((HIDDEN, VOCAB), 0.02), VPAD).astype(jnp.bfloat16)
    p["b_lin_pad"] = pad_lanes(w((1, VOCAB), 0.02), VPAD)
    # hoisted constant rotary tables / rotate-half matrix / attention masks
    p["rope_cos"], p["rope_sin"] = full_rotary_tables(L, N_HEADS, HEAD_DIM)
    p["rot_mat"] = rotate_half_matrix(N_HEADS, HEAD_DIM)
    p["qmask"], p["bmrow"] = attention_masks()
    # NOTE: attn_out (H, H) exists in the module but is unused by the given
    # forward, so it is not instantiated here.
    return p


# --------------------------------- main ---------------------------------------
if __name__ == "__main__":
    key = jax.random.PRNGKey(0)
    kp, ki, kc, ks = jax.random.split(key, 4)
    params = init_params(kp)

    indices = jax.random.randint(ki, (B, L), 0, VOCAB, dtype=jnp.int32)
    cond = jax.random.randint(kc, (B, L), 0, VOCAB, dtype=jnp.int32)  # unused
    sigma = jax.random.uniform(ks, (B,), jnp.float32, minval=0.05, maxval=1.0)

    out = sedd_forward(params, indices, cond, sigma)
    out = jax.block_until_ready(out)
    assert out.shape == (B, L, VOCAB) and out.dtype == jnp.bfloat16
    print("KERNEL_OK")
</pallas_src>

<mosaic_0001>
module attributes {stable_mosaic.version = 11 : i64} {
  func.func @fused_sedd_kernel(%arg0: memref<2x256xf32, #tpu.memory_space<vmem>>, %arg1: memref<32x64xf32, #tpu.memory_space<vmem>>, %arg2: memref<32x1xi32, #tpu.memory_space<vmem>>, %arg3: memref<2x128xf32, #tpu.memory_space<vmem>>, %arg4: memref<64x64xf32, #tpu.memory_space<vmem>>, %arg5: memref<64x64xf32, #tpu.memory_space<vmem>>, %arg6: memref<64x64xbf16, #tpu.memory_space<vmem>>, %arg7: memref<128x64xf32, #tpu.memory_space<vmem>>, %arg8: memref<128x32xf32, #tpu.memory_space<vmem>>, %arg9: memref<256x64xf32, #tpu.memory_space<vmem>>, %arg10: memref<1x64xf32, #tpu.memory_space<vmem>>, %arg11: memref<64x64xf32, #tpu.memory_space<vmem>>, %arg12: memref<1x64xf32, #tpu.memory_space<vmem>>, %arg13: memref<2x1x64xf32, #tpu.memory_space<vmem>>, %arg14: memref<2x64x64xbf16, #tpu.memory_space<vmem>>, %arg15: memref<2x64x64xbf16, #tpu.memory_space<vmem>>, %arg16: memref<2x64x64xbf16, #tpu.memory_space<vmem>>, %arg17: memref<2x1x64xf32, #tpu.memory_space<vmem>>, %arg18: memref<2x64x256xbf16, #tpu.memory_space<vmem>>, %arg19: memref<2x1x256xf32, #tpu.memory_space<vmem>>, %arg20: memref<2x256x64xbf16, #tpu.memory_space<vmem>>, %arg21: memref<2x1x64xf32, #tpu.memory_space<vmem>>, %arg22: memref<64x1536xbf16, #tpu.memory_space<vmem>>, %arg23: memref<1x1536xf32, #tpu.memory_space<vmem>>, %arg24: memref<1x64xf32, #tpu.memory_space<vmem>>, %arg25: memref<64x128xbf16, #tpu.memory_space<vmem>>, %arg26: memref<32x128xbf16, #tpu.memory_space<vmem>>) attributes {dimension_semantics = [], scalar_prefetch = 0 : i64, scratch_operands = 0 : i64, tpu.core_type = #tpu.core_type<tc>} {
    %c0 = arith.constant 0 : index
    %c0_0 = arith.constant 0 : index
    %0 = vector.load %arg0[%c0, %c0_0] : memref<2x256xf32, #tpu.memory_space<vmem>>, vector<2x256xf32>
    %c0_1 = arith.constant 0 : index
    %c0_2 = arith.constant 0 : index
    %1 = vector.load %arg9[%c0_1, %c0_2] : memref<256x64xf32, #tpu.memory_space<vmem>>, vector<256x64xf32>
    %cst = arith.constant dense<0.000000e+00> : vector<2x64xf32>
    %2 = tpu.matmul %0, %1, %cst {dimension_numbers = #tpu.dot_dimension_numbers<[1], [0], [0], [1], [0, 0, 1, 1], [], []>} : vector<2x256xf32>, vector<256x64xf32>, vector<2x64xf32> -> vector<2x64xf32>
    %c0_3 = arith.constant 0 : index
    %c0_4 = arith.constant 0 : index
    %3 = vector.load %arg10[%c0_3, %c0_4] : memref<1x64xf32, #tpu.memory_space<vmem>>, vector<1x64xf32>
    %4 = vector.broadcast %3 : vector<1x64xf32> to vector<2x64xf32>
    %5 = arith.addf %2, %4 : vector<2x64xf32>
    %6 = arith.negf %5 : vector<2x64xf32>
    %7 = math.exp %6 : vector<2x64xf32>
    %cst_5 = arith.constant 1.000000e+00 : f32
    %8 = vector.broadcast %cst_5 : f32 to vector<2x64xf32>
    %9 = arith.addf %8, %7 : vector<2x64xf32>
    %10 = arith.divf %8, %9 : vector<2x64xf32>
    %11 = arith.mulf %5, %10 : vector<2x64xf32>
    %c0_6 = arith.constant 0 : index
    %c0_7 = arith.constant 0 : index
    %12 = vector.load %arg11[%c0_6, %c0_7] : memref<64x64xf32, #tpu.memory_space<vmem>>, vector<64x64xf32>
    %cst_8 = arith.constant dense<0.000000e+00> : vector<2x64xf32>
    %13 = tpu.matmul %11, %12, %cst_8 {dimension_numbers = #tpu.dot_dimension_numbers<[1], [0], [0], [1], [0, 0, 1, 1], [], []>} : vector<2x64xf32>, vector<64x64xf32>, vector<2x64xf32> -> vector<2x64xf32>
    %c0_9 = arith.constant 0 : index
    %c0_10 = arith.constant 0 : index
    %14 = vector.load %arg12[%c0_9, %c0_10] : memref<1x64xf32, #tpu.memory_space<vmem>>, vector<1x64xf32>
    %15 = vector.broadcast %14 : vector<1x64xf32> to vector<2x64xf32>
    %16 = arith.addf %13, %15 : vector<2x64xf32>
    %17 = arith.negf %16 : vector<2x64xf32>
    %18 = math.exp %17 : vector<2x64xf32>
    %cst_11 = arith.constant 1.000000e+00 : f32
    %19 = vector.broadcast %cst_11 : f32 to vector<2x64xf32>
    %20 = arith.addf %19, %18 : vector<2x64xf32>
    %21 = arith.divf %19, %20 : vector<2x64xf32>
    %22 = arith.mulf %16, %21 : vector<2x64xf32>
    %23 = arith.truncf %22 : vector<2x64xf32> to vector<2x64xbf16>
    %c0_12 = arith.constant 0 : index
    %c0_13 = arith.constant 0 : index
    %24 = vector.load %arg22[%c0_12, %c0_13] : memref<64x1536xbf16, #tpu.memory_space<vmem>>, vector<64x1536xbf16>
    %cst_14 = arith.constant dense<0.000000e+00> : vector<2x1536xf32>
    %25 = tpu.matmul %23, %24, %cst_14 {dimension_numbers = #tpu.dot_dimension_numbers<[1], [0], [0], [1], [0, 0, 1, 1], [], []>} : vector<2x64xbf16>, vector<64x1536xbf16>, vector<2x1536xf32> -> vector<2x1536xf32>
    %c0_15 = arith.constant 0 : index
    %c0_16 = arith.constant 0 : index
    %26 = vector.load %arg23[%c0_15, %c0_16] : memref<1x1536xf32, #tpu.memory_space<vmem>>, vector<1x1536xf32>
    %27 = vector.broadcast %26 : vector<1x1536xf32> to vector<2x1536xf32>
    %28 = arith.addf %25, %27 : vector<2x1536xf32>
    %29 = vector.extract_strided_slice %28 {offsets = [0, 0], sizes = [1, 1536], strides = [1, 1]} : vector<2x1536xf32> to vector<1x1536xf32>
    %30 = vector.shape_cast %29 : vector<1x1536xf32> to vector<1x1536xf32>
    %31 = vector.broadcast %30 : vector<1x1536xf32> to vector<16x1536xf32>
    %32 = vector.extract_strided_slice %28 {offsets = [1, 0], sizes = [1, 1536], strides = [1, 1]} : vector<2x1536xf32> to vector<1x1536xf32>
    %33 = vector.shape_cast %32 : vector<1x1536xf32> to vector<1x1536xf32>
    %34 = vector.broadcast %33 : vector<1x1536xf32> to vector<16x1536xf32>
    %35 = tpu.concatenate %31, %34 in 0 : vector<16x1536xf32>, vector<16x1536xf32> -> vector<32x1536xf32>
    %c0_17 = arith.constant 0 : index
    %c0_18 = arith.constant 0 : index
    %36 = vector.load %arg4[%c0_17, %c0_18] : memref<64x64xf32, #tpu.memory_space<vmem>>, vector<64x64xf32>
    %c0_19 = arith.constant 0 : index
    %c0_20 = arith.constant 0 : index
    %37 = vector.load %arg5[%c0_19, %c0_20] : memref<64x64xf32, #tpu.memory_space<vmem>>, vector<64x64xf32>
    %c0_21 = arith.constant 0 : index
    %c0_22 = arith.constant 0 : index
    %38 = vector.load %arg6[%c0_21, %c0_22] : memref<64x64xbf16, #tpu.memory_space<vmem>>, vector<64x64xbf16>
    %c0_23 = arith.constant 0 : index
    %c0_24 = arith.constant 0 : index
    %39 = vector.load %arg7[%c0_23, %c0_24] : memref<128x64xf32, #tpu.memory_space<vmem>>, vector<128x64xf32>
    %c0_25 = arith.constant 0 : index
    %c0_26 = arith.constant 0 : index
    %40 = vector.load %arg8[%c0_25, %c0_26] : memref<128x32xf32, #tpu.memory_space<vmem>>, vector<128x32xf32>
    %c0_27 = arith.constant 0 : index
    %c0_28 = arith.constant 0 : index
    %41 = vector.load %arg1[%c0_27, %c0_28] : memref<32x64xf32, #tpu.memory_space<vmem>>, vector<32x64xf32>
    %42 = vector.extract_strided_slice %35 {offsets = [0, 0], sizes = [32, 64], strides = [1, 1]} : vector<32x1536xf32> to vector<32x64xf32>
    %43 = vector.extract_strided_slice %35 {offsets = [0, 128], sizes = [32, 64], strides = [1, 1]} : vector<32x1536xf32> to vector<32x64xf32>
    %44 = vector.extract_strided_slice %35 {offsets = [0, 256], sizes = [32, 64], strides = [1, 1]} : vector<32x1536xf32> to vector<32x64xf32>
    %45 = vector.extract_strided_slice %35 {offsets = [0, 384], sizes = [32, 64], strides = [1, 1]} : vector<32x1536xf32> to vector<32x64xf32>
    %46 = vector.extract_strided_slice %35 {offsets = [0, 512], sizes = [32, 64], strides = [1, 1]} : vector<32x1536xf32> to vector<32x64xf32>
    %c0_29 = arith.constant 0 : index
    %c0_30 = arith.constant 0 : index
    %c0_31 = arith.constant 0 : index
    %47 = vector.load %arg13[%c0_29, %c0_30, %c0_31] : memref<2x1x64xf32, #tpu.memory_space<vmem>>, vector<1x1x64xf32>
    %48 = vector.shape_cast %47 : vector<1x1x64xf32> to vector<1x64xf32>
    %cst_32 = arith.constant dense<0.000000e+00> : vector<32xf32>
    %49 = vector.multi_reduction <add>, %41, %cst_32 [1] : vector<32x64xf32> to vector<32xf32>
    %50 = vector.shape_cast %49 : vector<32xf32> to vector<32x1xf32>
    %cst_33 = arith.constant 6.400000e+01 : f32
    %51 = vector.broadcast %cst_33 : f32 to vector<32x1xf32>
    %52 = arith.divf %50, %51 : vector<32x1xf32>
    %53 = vector.broadcast %52 : vector<32x1xf32> to vector<32x64xf32>
    %54 = arith.subf %41, %53 : vector<32x64xf32>
    %55 = arith.mulf %54, %54 : vector<32x64xf32>
    %cst_34 = arith.constant dense<0.000000e+00> : vector<32xf32>
    %56 = vector.multi_reduction <add>, %55, %cst_34 [1] : vector<32x64xf32> to vector<32xf32>
    %57 = vector.shape_cast %56 : vector<32xf32> to vector<32x1xf32>
    %cst_35 = arith.constant 6.400000e+01 : f32
    %58 = vector.broadcast %cst_35 : f32 to vector<32x1xf32>
    %59 = arith.divf %57, %58 : vector<32x1xf32>
    %60 = vector.broadcast %52 : vector<32x1xf32> to vector<32x64xf32>
    %61 = arith.subf %41, %60 : vector<32x64xf32>
    %cst_36 = arith.constant 9.99999974E-6 : f32
    %62 = vector.broadcast %cst_36 : f32 to vector<32x1xf32>
    %63 = arith.addf %59, %62 : vector<32x1xf32>
    %64 = math.rsqrt %63 : vector<32x1xf32>
    %65 = vector.broadcast %64 : vector<32x1xf32> to vector<32x64xf32>
    %66 = arith.mulf %61, %65 : vector<32x64xf32>
    %67 = vector.broadcast %48 : vector<1x64xf32> to vector<32x64xf32>
    %68 = arith.mulf %66, %67 : vector<32x64xf32>
    %cst_37 = arith.constant 1.000000e+00 : f32
    %69 = vector.broadcast %cst_37 : f32 to vector<32x64xf32>
    %70 = arith.addf %69, %43 : vector<32x64xf32>
    %71 = arith.mulf %68, %70 : vector<32x64xf32>
    %72 = arith.addf %71, %42 : vector<32x64xf32>
    %73 = arith.truncf %72 : vector<32x64xf32> to vector<32x64xbf16>
    %c0_38 = arith.constant 0 : index
    %c0_39 = arith.constant 0 : index
    %c0_40 = arith.constant 0 : index
    %74 = vector.load %arg14[%c0_38, %c0_39, %c0_40] : memref<2x64x64xbf16, #tpu.memory_space<vmem>>, vector<1x64x64xbf16>
    %75 = vector.shape_cast %74 : vector<1x64x64xbf16> to vector<64x64xbf16>
    %cst_41 = arith.constant dense<0.000000e+00> : vector<32x64xf32>
    %76 = tpu.matmul %73, %75, %cst_41 {dimension_numbers = #tpu.dot_dimension_numbers<[1], [0], [0], [1], [0, 0, 1, 1], [], []>} : vector<32x64xbf16>, vector<64x64xbf16>, vector<32x64xf32> -> vector<32x64xf32>
    %c0_42 = arith.constant 0 : index
    %c0_43 = arith.constant 0 : index
    %c0_44 = arith.constant 0 : index
    %77 = vector.load %arg15[%c0_42, %c0_43, %c0_44] : memref<2x64x64xbf16, #tpu.memory_space<vmem>>, vector<1x64x64xbf16>
    %78 = vector.shape_cast %77 : vector<1x64x64xbf16> to vector<64x64xbf16>
    %cst_45 = arith.constant dense<0.000000e+00> : vector<32x64xf32>
    %79 = tpu.matmul %73, %78, %cst_45 {dimension_numbers = #tpu.dot_dimension_numbers<[1], [0], [0], [1], [0, 0, 1, 1], [], []>} : vector<32x64xbf16>, vector<64x64xbf16>, vector<32x64xf32> -> vector<32x64xf32>
    %c0_46 = arith.constant 0 : index
    %c0_47 = arith.constant 0 : index
    %c0_48 = arith.constant 0 : index
    %80 = vector.load %arg16[%c0_46, %c0_47, %c0_48] : memref<2x64x64xbf16, #tpu.memory_space<vmem>>, vector<1x64x64xbf16>
    %81 = vector.shape_cast %80 : vector<1x64x64xbf16> to vector<64x64xbf16>
    %cst_49 = arith.constant dense<0.000000e+00> : vector<32x64xf32>
    %82 = tpu.matmul %73, %81, %cst_49 {dimension_numbers = #tpu.dot_dimension_numbers<[1], [0], [0], [1], [0, 0, 1, 1], [], []>} : vector<32x64xbf16>, vector<64x64xbf16>, vector<32x64xf32> -> vector<32x64xf32>
    %83 = tpu.concatenate %76, %79 in 0 : vector<32x64xf32>, vector<32x64xf32> -> vector<64x64xf32>
    %84 = arith.mulf %83, %36 : vector<64x64xf32>
    %85 = arith.truncf %83 : vector<64x64xf32> to vector<64x64xbf16>
    %cst_50 = arith.constant dense<0.000000e+00> : vector<64x64xf32>
    %86 = tpu.matmul %85, %38, %cst_50 {dimension_numbers = #tpu.dot_dimension_numbers<[1], [0], [0], [1], [0, 0, 1, 1], [], []>} : vector<64x64xbf16>, vector<64x64xbf16>, vector<64x64xf32> -> vector<64x64xf32>
    %87 = arith.mulf %86, %37 : vector<64x64xf32>
    %88 = arith.addf %84, %87 : vector<64x64xf32>
    %89 = vector.extract_strided_slice %88 {offsets = [0, 0], sizes = [32, 64], strides = [1, 1]} : vector<64x64xf32> to vector<32x64xf32>
    %90 = vector.extract_strided_slice %88 {offsets = [32, 0], sizes = [32, 64], strides = [1, 1]} : vector<64x64xf32> to vector<32x64xf32>
    %91 = arith.truncf %90 : vector<32x64xf32> to vector<32x64xbf16>
    %92 = arith.truncf %82 : vector<32x64xf32> to vector<32x64xbf16>
    %93 = tpu.concatenate %89, %89, %89, %89 in 0 : vector<32x64xf32>, vector<32x64xf32>, vector<32x64xf32>, vector<32x64xf32> -> vector<128x64xf32>
    %94 = arith.mulf %93, %39 : vector<128x64xf32>
    %95 = arith.truncf %94 : vector<128x64xf32> to vector<128x64xbf16>
    "tpu.trace_start"() <{level = 10 : i32, message = "rj,kj->rk"}> : () -> ()
    %cst_51 = arith.constant dense<0.000000e+00> : vector<128x32xf32>
    %96 = tpu.matmul %95, %91, %cst_51 {dimension_numbers = #tpu.dot_dimension_numbers<[1], [1], [0], [0], [0, 0, 1, 0], [], []>} : vector<128x64xbf16>, vector<32x64xbf16>, vector<128x32xf32> -> vector<128x32xf32>
    "tpu.trace_stop"() : () -> ()
    %cst_52 = arith.constant 2.500000e-01 : f32
    %97 = vector.broadcast %cst_52 : f32 to vector<128x32xf32>
    %98 = arith.mulf %96, %97 : vector<128x32xf32>
    %99 = arith.mulf %98, %40 : vector<128x32xf32>
    %cst_53 = arith.constant dense<0xFF800000> : vector<128xf32>
    %100 = vector.multi_reduction <maximumf>, %99, %cst_53 [1] : vector<128x32xf32> to vector<128xf32>
    %101 = vector.shape_cast %100 : vector<128xf32> to vector<128x1xf32>
    %102 = vector.broadcast %101 : vector<128x1xf32> to vector<128x32xf32>
    %103 = arith.subf %99, %102 : vector<128x32xf32>
    %104 = math.exp %103 : vector<128x32xf32>
    %105 = arith.mulf %104, %40 : vector<128x32xf32>
    %cst_54 = arith.constant dense<0.000000e+00> : vector<128xf32>
    %106 = vector.multi_reduction <add>, %105, %cst_54 [1] : vector<128x32xf32> to vector<128xf32>
    %107 = vector.shape_cast %106 : vector<128xf32> to vector<128x1xf32>
    %cst_55 = arith.constant 1.000000e-30 : f32
    %108 = vector.broadcast %cst_55 : f32 to vector<128x1xf32>
    %109 = arith.addf %107, %108 : vector<128x1xf32>
    %110 = tpu.reciprocal %109 {approx = true} : vector<128x1xf32> -> vector<128x1xf32>
    %111 = vector.broadcast %110 : vector<128x1xf32> to vector<128x32xf32>
    %112 = arith.mulf %105, %111 : vector<128x32xf32>
    %113 = arith.truncf %112 : vector<128x32xf32> to vector<128x32xbf16>
    %cst_56 = arith.constant dense<0.000000e+00> : vector<128x64xf32>
    %114 = tpu.matmul %113, %92, %cst_56 {dimension_numbers = #tpu.dot_dimension_numbers<[1], [0], [0], [1], [0, 0, 1, 1], [], []>} : vector<128x32xbf16>, vector<32x64xbf16>, vector<128x64xf32> -> vector<128x64xf32>
    %115 = arith.mulf %114, %39 : vector<128x64xf32>
    %116 = vector.extract_strided_slice %115 {offsets = [0, 0], sizes = [32, 64], strides = [1, 1]} : vector<128x64xf32> to vector<32x64xf32>
    %117 = vector.extract_strided_slice %115 {offsets = [32, 0], sizes = [32, 64], strides = [1, 1]} : vector<128x64xf32> to vector<32x64xf32>
    %118 = arith.addf %116, %117 : vector<32x64xf32>
    %119 = vector.extract_strided_slice %115 {offsets = [64, 0], sizes = [32, 64], strides = [1, 1]} : vector<128x64xf32> to vector<32x64xf32>
    %120 = arith.addf %118, %119 : vector<32x64xf32>
    %121 = vector.extract_strided_slice %115 {offsets = [96, 0], sizes = [32, 64], strides = [1, 1]} : vector<128x64xf32> to vector<32x64xf32>
    %122 = arith.addf %120, %121 : vector<32x64xf32>
    %c0_57 = arith.constant 0 : index
    %c0_58 = arith.constant 0 : index
    %c0_59 = arith.constant 0 : index
    %123 = vector.load %arg17[%c0_57, %c0_58, %c0_59] : memref<2x1x64xf32, #tpu.memory_space<vmem>>, vector<1x1x64xf32>
    %124 = vector.shape_cast %123 : vector<1x1x64xf32> to vector<1x64xf32>
    %cst_60 = arith.constant dense<0.000000e+00> : vector<32xf32>
    %125 = vector.multi_reduction <add>, %122, %cst_60 [1] : vector<32x64xf32> to vector<32xf32>
    %126 = vector.shape_cast %125 : vector<32xf32> to vector<32x1xf32>
    %cst_61 = arith.constant 6.400000e+01 : f32
    %127 = vector.broadcast %cst_61 : f32 to vector<32x1xf32>
    %128 = arith.divf %126, %127 : vector<32x1xf32>
    %129 = vector.broadcast %128 : vector<32x1xf32> to vector<32x64xf32>
    %130 = arith.subf %122, %129 : vector<32x64xf32>
    %131 = arith.mulf %130, %130 : vector<32x64xf32>
    %cst_62 = arith.constant dense<0.000000e+00> : vector<32xf32>
    %132 = vector.multi_reduction <add>, %131, %cst_62 [1] : vector<32x64xf32> to vector<32xf32>
    %133 = vector.shape_cast %132 : vector<32xf32> to vector<32x1xf32>
    %cst_63 = arith.constant 6.400000e+01 : f32
    %134 = vector.broadcast %cst_63 : f32 to vector<32x1xf32>
    %135 = arith.divf %133, %134 : vector<32x1xf32>
    %136 = vector.broadcast %128 : vector<32x1xf32> to vector<32x64xf32>
    %137 = arith.subf %122, %136 : vector<32x64xf32>
    %cst_64 = arith.constant 9.99999974E-6 : f32
    %138 = vector.broadcast %cst_64 : f32 to vector<32x1xf32>
    %139 = arith.addf %135, %138 : vector<32x1xf32>
    %140 = math.rsqrt %139 : vector<32x1xf32>
    %141 = vector.broadcast %140 : vector<32x1xf32> to vector<32x64xf32>
    %142 = arith.mulf %137, %141 : vector<32x64xf32>
    %143 = vector.broadcast %124 : vector<1x64xf32> to vector<32x64xf32>
    %144 = arith.mulf %142, %143 : vector<32x64xf32>
    %cst_65 = arith.constant 1.000000e+00 : f32
    %145 = vector.broadcast %cst_65 : f32 to vector<32x64xf32>
    %146 = arith.addf %145, %45 : vector<32x64xf32>
    %147 = arith.mulf %144, %146 : vector<32x64xf32>
    %148 = arith.addf %147, %44 : vector<32x64xf32>
    %149 = arith.truncf %148 : vector<32x64xf32> to vector<32x64xbf16>
    %c0_66 = arith.constant 0 : index
    %c0_67 = arith.constant 0 : index
    %c0_68 = arith.constant 0 : index
    %150 = vector.load %arg18[%c0_66, %c0_67, %c0_68] : memref<2x64x256xbf16, #tpu.memory_space<vmem>>, vector<1x64x256xbf16>
    %151 = vector.shape_cast %150 : vector<1x64x256xbf16> to vector<64x256xbf16>
    %cst_69 = arith.constant dense<0.000000e+00> : vector<32x256xf32>
    %152 = tpu.matmul %149, %151, %cst_69 {dimension_numbers = #tpu.dot_dimension_numbers<[1], [0], [0], [1], [0, 0, 1, 1], [], []>} : vector<32x64xbf16>, vector<64x256xbf16>, vector<32x256xf32> -> vector<32x256xf32>
    %c0_70 = arith.constant 0 : index
    %c0_71 = arith.constant 0 : index
    %c0_72 = arith.constant 0 : index
    %153 = vector.load %arg19[%c0_70, %c0_71, %c0_72] : memref<2x1x256xf32, #tpu.memory_space<vmem>>, vector<1x1x256xf32>
    %154 = vector.shape_cast %153 : vector<1x1x256xf32> to vector<1x256xf32>
    %155 = vector.broadcast %154 : vector<1x256xf32> to vector<32x256xf32>
    %156 = arith.addf %152, %155 : vector<32x256xf32>
    %cst_73 = arith.constant 5.000000e-01 : f32
    %157 = vector.broadcast %cst_73 : f32 to vector<32x256xf32>
    %158 = arith.mulf %157, %156 : vector<32x256xf32>
    %cst_74 = arith.constant 4.471500e-02 : f32
    %159 = vector.broadcast %cst_74 : f32 to vector<32x256xf32>
    %160 = arith.mulf %159, %156 : vector<32x256xf32>
    %161 = arith.mulf %160, %156 : vector<32x256xf32>
    %162 = arith.mulf %161, %156 : vector<32x256xf32>
    %163 = arith.addf %156, %162 : vector<32x256xf32>
    %cst_75 = arith.constant 0.797884583 : f32
    %164 = vector.broadcast %cst_75 : f32 to vector<32x256xf32>
    %165 = arith.mulf %164, %163 : vector<32x256xf32>
    %166 = math.tanh %165 : vector<32x256xf32>
    %cst_76 = arith.constant 1.000000e+00 : f32
    %167 = vector.broadcast %cst_76 : f32 to vector<32x256xf32>
    %168 = arith.addf %167, %166 : vector<32x256xf32>
    %169 = arith.mulf %158, %168 : vector<32x256xf32>
    %170 = arith.truncf %169 : vector<32x256xf32> to vector<32x256xbf16>
    %c0_77 = arith.constant 0 : index
    %c0_78 = arith.constant 0 : index
    %c0_79 = arith.constant 0 : index
    %171 = vector.load %arg20[%c0_77, %c0_78, %c0_79] : memref<2x256x64xbf16, #tpu.memory_space<vmem>>, vector<1x256x64xbf16>
    %172 = vector.shape_cast %171 : vector<1x256x64xbf16> to vector<256x64xbf16>
    %cst_80 = arith.constant dense<0.000000e+00> : vector<32x64xf32>
    %173 = tpu.matmul %170, %172, %cst_80 {dimension_numbers = #tpu.dot_dimension_numbers<[1], [0], [0], [1], [0, 0, 1, 1], [], []>} : vector<32x256xbf16>, vector<256x64xbf16>, vector<32x64xf32> -> vector<32x64xf32>
    %c0_81 = arith.constant 0 : index
    %c0_82 = arith.constant 0 : index
    %c0_83 = arith.constant 0 : index
    %174 = vector.load %arg21[%c0_81, %c0_82, %c0_83] : memref<2x1x64xf32, #tpu.memory_space<vmem>>, vector<1x1x64xf32>
    %175 = vector.shape_cast %174 : vector<1x1x64xf32> to vector<1x64xf32>
    %176 = vector.broadcast %175 : vector<1x64xf32> to vector<32x64xf32>
    %177 = arith.addf %173, %176 : vector<32x64xf32>
    %178 = arith.mulf %46, %177 : vector<32x64xf32>
    %179 = arith.addf %122, %178 : vector<32x64xf32>
    %180 = vector.extract_strided_slice %35 {offsets = [0, 640], sizes = [32, 64], strides = [1, 1]} : vector<32x1536xf32> to vector<32x64xf32>
    %181 = vector.extract_strided_slice %35 {offsets = [0, 768], sizes = [32, 64], strides = [1, 1]} : vector<32x1536xf32> to vector<32x64xf32>
    %182 = vector.extract_strided_slice %35 {offsets = [0, 896], sizes = [32, 64], strides = [1, 1]} : vector<32x1536xf32> to vector<32x64xf32>
    %183 = vector.extract_strided_slice %35 {offsets = [0, 1024], sizes = [32, 64], strides = [1, 1]} : vector<32x1536xf32> to vector<32x64xf32>
    %184 = vector.extract_strided_slice %35 {offsets = [0, 1152], sizes = [32, 64], strides = [1, 1]} : vector<32x1536xf32> to vector<32x64xf32>
    %c1 = arith.constant 1 : index
    %c0_84 = arith.constant 0 : index
    %c0_85 = arith.constant 0 : index
    %185 = vector.load %arg13[%c1, %c0_84, %c0_85] : memref<2x1x64xf32, #tpu.memory_space<vmem>>, vector<1x1x64xf32>
    %186 = vector.shape_cast %185 : vector<1x1x64xf32> to vector<1x64xf32>
    %cst_86 = arith.constant dense<0.000000e+00> : vector<32xf32>
    %187 = vector.multi_reduction <add>, %179, %cst_86 [1] : vector<32x64xf32> to vector<32xf32>
    %188 = vector.shape_cast %187 : vector<32xf32> to vector<32x1xf32>
    %cst_87 = arith.constant 6.400000e+01 : f32
    %189 = vector.broadcast %cst_87 : f32 to vector<32x1xf32>
    %190 = arith.divf %188, %189 : vector<32x1xf32>
    %191 = vector.broadcast %190 : vector<32x1xf32> to vector<32x64xf32>
    %192 = arith.subf %179, %191 : vector<32x64xf32>
    %193 = arith.mulf %192, %192 : vector<32x64xf32>
    %cst_88 = arith.constant dense<0.000000e+00> : vector<32xf32>
    %194 = vector.multi_reduction <add>, %193, %cst_88 [1] : vector<32x64xf32> to vector<32xf32>
    %195 = vector.shape_cast %194 : vector<32xf32> to vector<32x1xf32>
    %cst_89 = arith.constant 6.400000e+01 : f32
    %196 = vector.broadcast %cst_89 : f32 to vector<32x1xf32>
    %197 = arith.divf %195, %196 : vector<32x1xf32>
    %198 = vector.broadcast %190 : vector<32x1xf32> to vector<32x64xf32>
    %199 = arith.subf %179, %198 : vector<32x64xf32>
    %cst_90 = arith.constant 9.99999974E-6 : f32
    %200 = vector.broadcast %cst_90 : f32 to vector<32x1xf32>
    %201 = arith.addf %197, %200 : vector<32x1xf32>
    %202 = math.rsqrt %201 : vector<32x1xf32>
    %203 = vector.broadcast %202 : vector<32x1xf32> to vector<32x64xf32>
    %204 = arith.mulf %199, %203 : vector<32x64xf32>
    %205 = vector.broadcast %186 : vector<1x64xf32> to vector<32x64xf32>
    %206 = arith.mulf %204, %205 : vector<32x64xf32>
    %cst_91 = arith.constant 1.000000e+00 : f32
    %207 = vector.broadcast %cst_91 : f32 to vector<32x64xf32>
    %208 = arith.addf %207, %181 : vector<32x64xf32>
    %209 = arith.mulf %206, %208 : vector<32x64xf32>
    %210 = arith.addf %209, %180 : vector<32x64xf32>
    %211 = arith.truncf %210 : vector<32x64xf32> to vector<32x64xbf16>
    %c1_92 = arith.constant 1 : index
    %c0_93 = arith.constant 0 : index
    %c0_94 = arith.constant 0 : index
    %212 = vector.load %arg14[%c1_92, %c0_93, %c0_94] : memref<2x64x64xbf16, #tpu.memory_space<vmem>>, vector<1x64x64xbf16>
    %213 = vector.shape_cast %212 : vector<1x64x64xbf16> to vector<64x64xbf16>
    %cst_95 = arith.constant dense<0.000000e+00> : vector<32x64xf32>
    %214 = tpu.matmul %211, %213, %cst_95 {dimension_numbers = #tpu.dot_dimension_numbers<[1], [0], [0], [1], [0, 0, 1, 1], [], []>} : vector<32x64xbf16>, vector<64x64xbf16>, vector<32x64xf32> -> vector<32x64xf32>
    %c1_96 = arith.constant 1 : index
    %c0_97 = arith.constant 0 : index
    %c0_98 = arith.constant 0 : index
    %215 = vector.load %arg15[%c1_96, %c0_97, %c0_98] : memref<2x64x64xbf16, #tpu.memory_space<vmem>>, vector<1x64x64xbf16>
    %216 = vector.shape_cast %215 : vector<1x64x64xbf16> to vector<64x64xbf16>
    %cst_99 = arith.constant dense<0.000000e+00> : vector<32x64xf32>
    %217 = tpu.matmul %211, %216, %cst_99 {dimension_numbers = #tpu.dot_dimension_numbers<[1], [0], [0], [1], [0, 0, 1, 1], [], []>} : vector<32x64xbf16>, vector<64x64xbf16>, vector<32x64xf32> -> vector<32x64xf32>
    %c1_100 = arith.constant 1 : index
    %c0_101 = arith.constant 0 : index
    %c0_102 = arith.constant 0 : index
    %218 = vector.load %arg16[%c1_100, %c0_101, %c0_102] : memref<2x64x64xbf16, #tpu.memory_space<vmem>>, vector<1x64x64xbf16>
    %219 = vector.shape_cast %218 : vector<1x64x64xbf16> to vector<64x64xbf16>
    %cst_103 = arith.constant dense<0.000000e+00> : vector<32x64xf32>
    %220 = tpu.matmul %211, %219, %cst_103 {dimension_numbers = #tpu.dot_dimension_numbers<[1], [0], [0], [1], [0, 0, 1, 1], [], []>} : vector<32x64xbf16>, vector<64x64xbf16>, vector<32x64xf32> -> vector<32x64xf32>
    %221 = tpu.concatenate %214, %217 in 0 : vector<32x64xf32>, vector<32x64xf32> -> vector<64x64xf32>
    %222 = arith.mulf %221, %36 : vector<64x64xf32>
    %223 = arith.truncf %221 : vector<64x64xf32> to vector<64x64xbf16>
    %cst_104 = arith.constant dense<0.000000e+00> : vector<64x64xf32>
    %224 = tpu.matmul %223, %38, %cst_104 {dimension_numbers = #tpu.dot_dimension_numbers<[1], [0], [0], [1], [0, 0, 1, 1], [], []>} : vector<64x64xbf16>, vector<64x64xbf16>, vector<64x64xf32> -> vector<64x64xf32>
    %225 = arith.mulf %224, %37 : vector<64x64xf32>
    %226 = arith.addf %222, %225 : vector<64x64xf32>
    %227 = vector.extract_strided_slice %226 {offsets = [0, 0], sizes = [32, 64], strides = [1, 1]} : vector<64x64xf32> to vector<32x64xf32>
    %228 = vector.extract_strided_slice %226 {offsets = [32, 0], sizes = [32, 64], strides = [1, 1]} : vector<64x64xf32> to vector<32x64xf32>
    %229 = arith.truncf %228 : vector<32x64xf32> to vector<32x64xbf16>
    %230 = arith.truncf %220 : vector<32x64xf32> to vector<32x64xbf16>
    %231 = tpu.concatenate %227, %227, %227, %227 in 0 : vector<32x64xf32>, vector<32x64xf32>, vector<32x64xf32>, vector<32x64xf32> -> vector<128x64xf32>
    %232 = arith.mulf %231, %39 : vector<128x64xf32>
    %233 = arith.truncf %232 : vector<128x64xf32> to vector<128x64xbf16>
    "tpu.trace_start"() <{level = 10 : i32, message = "rj,kj->rk"}> : () -> ()
    %cst_105 = arith.constant dense<0.000000e+00> : vector<128x32xf32>
    %234 = tpu.matmul %233, %229, %cst_105 {dimension_numbers = #tpu.dot_dimension_numbers<[1], [1], [0], [0], [0, 0, 1, 0], [], []>} : vector<128x64xbf16>, vector<32x64xbf16>, vector<128x32xf32> -> vector<128x32xf32>
    "tpu.trace_stop"() : () -> ()
    %cst_106 = arith.constant 2.500000e-01 : f32
    %235 = vector.broadcast %cst_106 : f32 to vector<128x32xf32>
    %236 = arith.mulf %234, %235 : vector<128x32xf32>
    %237 = arith.mulf %236, %40 : vector<128x32xf32>
    %cst_107 = arith.constant dense<0xFF800000> : vector<128xf32>
    %238 = vector.multi_reduction <maximumf>, %237, %cst_107 [1] : vector<128x32xf32> to vector<128xf32>
    %239 = vector.shape_cast %238 : vector<128xf32> to vector<128x1xf32>
    %240 = vector.broadcast %239 : vector<128x1xf32> to vector<128x32xf32>
    %241 = arith.subf %237, %240 : vector<128x32xf32>
    %242 = math.exp %241 : vector<128x32xf32>
    %243 = arith.mulf %242, %40 : vector<128x32xf32>
    %cst_108 = arith.constant dense<0.000000e+00> : vector<128xf32>
    %244 = vector.multi_reduction <add>, %243, %cst_108 [1] : vector<128x32xf32> to vector<128xf32>
    %245 = vector.shape_cast %244 : vector<128xf32> to vector<128x1xf32>
    %cst_109 = arith.constant 1.000000e-30 : f32
    %246 = vector.broadcast %cst_109 : f32 to vector<128x1xf32>
    %247 = arith.addf %245, %246 : vector<128x1xf32>
    %248 = tpu.reciprocal %247 {approx = true} : vector<128x1xf32> -> vector<128x1xf32>
    %249 = vector.broadcast %248 : vector<128x1xf32> to vector<128x32xf32>
    %250 = arith.mulf %243, %249 : vector<128x32xf32>
    %251 = arith.truncf %250 : vector<128x32xf32> to vector<128x32xbf16>
    %cst_110 = arith.constant dense<0.000000e+00> : vector<128x64xf32>
    %252 = tpu.matmul %251, %230, %cst_110 {dimension_numbers = #tpu.dot_dimension_numbers<[1], [0], [0], [1], [0, 0, 1, 1], [], []>} : vector<128x32xbf16>, vector<32x64xbf16>, vector<128x64xf32> -> vector<128x64xf32>
    %253 = arith.mulf %252, %39 : vector<128x64xf32>
    %254 = vector.extract_strided_slice %253 {offsets = [0, 0], sizes = [32, 64], strides = [1, 1]} : vector<128x64xf32> to vector<32x64xf32>
    %255 = vector.extract_strided_slice %253 {offsets = [32, 0], sizes = [32, 64], strides = [1, 1]} : vector<128x64xf32> to vector<32x64xf32>
    %256 = arith.addf %254, %255 : vector<32x64xf32>
    %257 = vector.extract_strided_slice %253 {offsets = [64, 0], sizes = [32, 64], strides = [1, 1]} : vector<128x64xf32> to vector<32x64xf32>
    %258 = arith.addf %256, %257 : vector<32x64xf32>
    %259 = vector.extract_strided_slice %253 {offsets = [96, 0], sizes = [32, 64], strides = [1, 1]} : vector<128x64xf32> to vector<32x64xf32>
    %260 = arith.addf %258, %259 : vector<32x64xf32>
    %c1_111 = arith.constant 1 : index
    %c0_112 = arith.constant 0 : index
    %c0_113 = arith.constant 0 : index
    %261 = vector.load %arg17[%c1_111, %c0_112, %c0_113] : memref<2x1x64xf32, #tpu.memory_space<vmem>>, vector<1x1x64xf32>
    %262 = vector.shape_cast %261 : vector<1x1x64xf32> to vector<1x64xf32>
    %cst_114 = arith.constant dense<0.000000e+00> : vector<32xf32>
    %263 = vector.multi_reduction <add>, %260, %cst_114 [1] : vector<32x64xf32> to vector<32xf32>
    %264 = vector.shape_cast %263 : vector<32xf32> to vector<32x1xf32>
    %cst_115 = arith.constant 6.400000e+01 : f32
    %265 = vector.broadcast %cst_115 : f32 to vector<32x1xf32>
    %266 = arith.divf %264, %265 : vector<32x1xf32>
    %267 = vector.broadcast %266 : vector<32x1xf32> to vector<32x64xf32>
    %268 = arith.subf %260, %267 : vector<32x64xf32>
    %269 = arith.mulf %268, %268 : vector<32x64xf32>
    %cst_116 = arith.constant dense<0.000000e+00> : vector<32xf32>
    %270 = vector.multi_reduction <add>, %269, %cst_116 [1] : vector<32x64xf32> to vector<32xf32>
    %271 = vector.shape_cast %270 : vector<32xf32> to vector<32x1xf32>
    %cst_117 = arith.constant 6.400000e+01 : f32
    %272 = vector.broadcast %cst_117 : f32 to vector<32x1xf32>
    %273 = arith.divf %271, %272 : vector<32x1xf32>
    %274 = vector.broadcast %266 : vector<32x1xf32> to vector<32x64xf32>
    %275 = arith.subf %260, %274 : vector<32x64xf32>
    %cst_118 = arith.constant 9.99999974E-6 : f32
    %276 = vector.broadcast %cst_118 : f32 to vector<32x1xf32>
    %277 = arith.addf %273, %276 : vector<32x1xf32>
    %278 = math.rsqrt %277 : vector<32x1xf32>
    %279 = vector.broadcast %278 : vector<32x1xf32> to vector<32x64xf32>
    %280 = arith.mulf %275, %279 : vector<32x64xf32>
    %281 = vector.broadcast %262 : vector<1x64xf32> to vector<32x64xf32>
    %282 = arith.mulf %280, %281 : vector<32x64xf32>
    %cst_119 = arith.constant 1.000000e+00 : f32
    %283 = vector.broadcast %cst_119 : f32 to vector<32x64xf32>
    %284 = arith.addf %283, %183 : vector<32x64xf32>
    %285 = arith.mulf %282, %284 : vector<32x64xf32>
    %286 = arith.addf %285, %182 : vector<32x64xf32>
    %287 = arith.truncf %286 : vector<32x64xf32> to vector<32x64xbf16>
    %c1_120 = arith.constant 1 : index
    %c0_121 = arith.constant 0 : index
    %c0_122 = arith.constant 0 : index
    %288 = vector.load %arg18[%c1_120, %c0_121, %c0_122] : memref<2x64x256xbf16, #tpu.memory_space<vmem>>, vector<1x64x256xbf16>
    %289 = vector.shape_cast %288 : vector<1x64x256xbf16> to vector<64x256xbf16>
    %cst_123 = arith.constant dense<0.000000e+00> : vector<32x256xf32>
    %290 = tpu.matmul %287, %289, %cst_123 {dimension_numbers = #tpu.dot_dimension_numbers<[1], [0], [0], [1], [0, 0, 1, 1], [], []>} : vector<32x64xbf16>, vector<64x256xbf16>, vector<32x256xf32> -> vector<32x256xf32>
    %c1_124 = arith.constant 1 : index
    %c0_125 = arith.constant 0 : index
    %c0_126 = arith.constant 0 : index
    %291 = vector.load %arg19[%c1_124, %c0_125, %c0_126] : memref<2x1x256xf32, #tpu.memory_space<vmem>>, vector<1x1x256xf32>
    %292 = vector.shape_cast %291 : vector<1x1x256xf32> to vector<1x256xf32>
    %293 = vector.broadcast %292 : vector<1x256xf32> to vector<32x256xf32>
    %294 = arith.addf %290, %293 : vector<32x256xf32>
    %cst_127 = arith.constant 5.000000e-01 : f32
    %295 = vector.broadcast %cst_127 : f32 to vector<32x256xf32>
    %296 = arith.mulf %295, %294 : vector<32x256xf32>
    %cst_128 = arith.constant 4.471500e-02 : f32
    %297 = vector.broadcast %cst_128 : f32 to vector<32x256xf32>
    %298 = arith.mulf %297, %294 : vector<32x256xf32>
    %299 = arith.mulf %298, %294 : vector<32x256xf32>
    %300 = arith.mulf %299, %294 : vector<32x256xf32>
    %301 = arith.addf %294, %300 : vector<32x256xf32>
    %cst_129 = arith.constant 0.797884583 : f32
    %302 = vector.broadcast %cst_129 : f32 to vector<32x256xf32>
    %303 = arith.mulf %302, %301 : vector<32x256xf32>
    %304 = math.tanh %303 : vector<32x256xf32>
    %cst_130 = arith.constant 1.000000e+00 : f32
    %305 = vector.broadcast %cst_130 : f32 to vector<32x256xf32>
    %306 = arith.addf %305, %304 : vector<32x256xf32>
    %307 = arith.mulf %296, %306 : vector<32x256xf32>
    %308 = arith.truncf %307 : vector<32x256xf32> to vector<32x256xbf16>
    %c1_131 = arith.constant 1 : index
    %c0_132 = arith.constant 0 : index
    %c0_133 = arith.constant 0 : index
    %309 = vector.load %arg20[%c1_131, %c0_132, %c0_133] : memref<2x256x64xbf16, #tpu.memory_space<vmem>>, vector<1x256x64xbf16>
    %310 = vector.shape_cast %309 : vector<1x256x64xbf16> to vector<256x64xbf16>
    %cst_134 = arith.constant dense<0.000000e+00> : vector<32x64xf32>
    %311 = tpu.matmul %308, %310, %cst_134 {dimension_numbers = #tpu.dot_dimension_numbers<[1], [0], [0], [1], [0, 0, 1, 1], [], []>} : vector<32x256xbf16>, vector<256x64xbf16>, vector<32x64xf32> -> vector<32x64xf32>
    %c1_135 = arith.constant 1 : index
    %c0_136 = arith.constant 0 : index
    %c0_137 = arith.constant 0 : index
    %312 = vector.load %arg21[%c1_135, %c0_136, %c0_137] : memref<2x1x64xf32, #tpu.memory_space<vmem>>, vector<1x1x64xf32>
    %313 = vector.shape_cast %312 : vector<1x1x64xf32> to vector<1x64xf32>
    %314 = vector.broadcast %313 : vector<1x64xf32> to vector<32x64xf32>
    %315 = arith.addf %311, %314 : vector<32x64xf32>
    %316 = arith.mulf %184, %315 : vector<32x64xf32>
    %317 = arith.addf %260, %316 : vector<32x64xf32>
    %318 = vector.extract_strided_slice %35 {offsets = [0, 1280], sizes = [32, 64], strides = [1, 1]} : vector<32x1536xf32> to vector<32x64xf32>
    %319 = vector.extract_strided_slice %35 {offsets = [0, 1408], sizes = [32, 64], strides = [1, 1]} : vector<32x1536xf32> to vector<32x64xf32>
    %c0_138 = arith.constant 0 : index
    %c0_139 = arith.constant 0 : index
    %320 = vector.load %arg24[%c0_138, %c0_139] : memref<1x64xf32, #tpu.memory_space<vmem>>, vector<1x64xf32>
    %cst_140 = arith.constant dense<0.000000e+00> : vector<32xf32>
    %321 = vector.multi_reduction <add>, %317, %cst_140 [1] : vector<32x64xf32> to vector<32xf32>
    %322 = vector.shape_cast %321 : vector<32xf32> to vector<32x1xf32>
    %cst_141 = arith.constant 6.400000e+01 : f32
    %323 = vector.broadcast %cst_141 : f32 to vector<32x1xf32>
    %324 = arith.divf %322, %323 : vector<32x1xf32>
    %325 = vector.broadcast %324 : vector<32x1xf32> to vector<32x64xf32>
    %326 = arith.subf %317, %325 : vector<32x64xf32>
    %327 = arith.mulf %326, %326 : vector<32x64xf32>
    %cst_142 = arith.constant dense<0.000000e+00> : vector<32xf32>
    %328 = vector.multi_reduction <add>, %327, %cst_142 [1] : vector<32x64xf32> to vector<32xf32>
    %329 = vector.shape_cast %328 : vector<32xf32> to vector<32x1xf32>
    %cst_143 = arith.constant 6.400000e+01 : f32
    %330 = vector.broadcast %cst_143 : f32 to vector<32x1xf32>
    %331 = arith.divf %329, %330 : vector<32x1xf32>
    %332 = vector.broadcast %324 : vector<32x1xf32> to vector<32x64xf32>
    %333 = arith.subf %317, %332 : vector<32x64xf32>
    %cst_144 = arith.constant 9.99999974E-6 : f32
    %334 = vector.broadcast %cst_144 : f32 to vector<32x1xf32>
    %335 = arith.addf %331, %334 : vector<32x1xf32>
    %336 = math.rsqrt %335 : vector<32x1xf32>
    %337 = vector.broadcast %336 : vector<32x1xf32> to vector<32x64xf32>
    %338 = arith.mulf %333, %337 : vector<32x64xf32>
    %339 = vector.broadcast %320 : vector<1x64xf32> to vector<32x64xf32>
    %340 = arith.mulf %338, %339 : vector<32x64xf32>
    %cst_145 = arith.constant 1.000000e+00 : f32
    %341 = vector.broadcast %cst_145 : f32 to vector<32x64xf32>
    %342 = arith.addf %341, %319 : vector<32x64xf32>
    %343 = arith.mulf %340, %342 : vector<32x64xf32>
    %344 = arith.addf %343, %318 : vector<32x64xf32>
    %c0_146 = arith.constant 0 : index
    %c0_147 = arith.constant 0 : index
    %345 = vector.load %arg3[%c0_146, %c0_147] : memref<2x128xf32, #tpu.memory_space<vmem>>, vector<2x128xf32>
    %346 = vector.extract_strided_slice %345 {offsets = [0, 0], sizes = [1, 128], strides = [1, 1]} : vector<2x128xf32> to vector<1x128xf32>
    %347 = vector.shape_cast %346 : vector<1x128xf32> to vector<1x128xf32>
    %348 = vector.broadcast %347 : vector<1x128xf32> to vector<16x128xf32>
    %349 = vector.extract_strided_slice %345 {offsets = [1, 0], sizes = [1, 128], strides = [1, 1]} : vector<2x128xf32> to vector<1x128xf32>
    %350 = vector.shape_cast %349 : vector<1x128xf32> to vector<1x128xf32>
    %351 = vector.broadcast %350 : vector<1x128xf32> to vector<16x128xf32>
    %352 = tpu.concatenate %348, %351 in 0 : vector<16x128xf32>, vector<16x128xf32> -> vector<32x128xf32>
    %353 = arith.truncf %344 : vector<32x64xf32> to vector<32x64xbf16>
    %c0_148 = arith.constant 0 : index
    %c0_149 = arith.constant 0 : index
    %354 = vector.load %arg25[%c0_148, %c0_149] : memref<64x128xbf16, #tpu.memory_space<vmem>>, vector<64x128xbf16>
    %cst_150 = arith.constant dense<0.000000e+00> : vector<32x128xf32>
    %355 = tpu.matmul %353, %354, %cst_150 {dimension_numbers = #tpu.dot_dimension_numbers<[1], [0], [0], [1], [0, 0, 1, 1], [], []>} : vector<32x64xbf16>, vector<64x128xbf16>, vector<32x128xf32> -> vector<32x128xf32>
    %356 = arith.addf %355, %352 : vector<32x128xf32>
    %357 = tpu.iota {dimensions = array<i32: 1>} : vector<32x128xi32>
    %c0_151 = arith.constant 0 : index
    %c0_152 = arith.constant 0 : index
    %358 = vector.load %arg2[%c0_151, %c0_152] : memref<32x1xi32, #tpu.memory_space<vmem>>, vector<32x1xi32>
    %359 = vector.broadcast %358 : vector<32x1xi32> to vector<32x128xi32>
    %360 = arith.cmpi ne, %357, %359 : vector<32x128xi32>
    %361 = arith.extui %360 : vector<32x128xi1> to vector<32x128xi32>
    %362 = arith.sitofp %361 : vector<32x128xi32> to vector<32x128xf32>
    %363 = arith.mulf %356, %362 : vector<32x128xf32>
    %364 = arith.truncf %363 : vector<32x128xf32> to vector<32x128xbf16>
    %c0_153 = arith.constant 0 : index
    %c0_154 = arith.constant 0 : index
    %365 = vector.load %arg26[%c0_153, %c0_154] : memref<32x128xbf16, #tpu.memory_space<vmem>>, vector<32x128xbf16>
    tpu.vector_store %arg26[%c0_153, %c0_154], %364 {strides = array<i32>} : memref<32x128xbf16, #tpu.memory_space<vmem>>, vector<32x128xbf16>,
    return
  }
}

</mosaic_0001>

<bundles_post_ra>
// kernel: sedd_forward.1
= control target key start
LH: loop header
LB: loop body
LE: loop exit
PB: predicated region body
PF: predicated region fallthrough
CT: control target
= control target key end

     0   :  { %s6974_s0 = inlined_call_operand.vmem [shape: f32[2,256], index: 0, kind: input, shape index: {}]   ;;  %s6975_s1 = inlined_call_operand.vmem [shape: f32[32,64], index: 1, kind: input, shape index: {}]   ;;  %s6976_s2 = inlined_call_operand.vmem [shape: s32[32,1], index: 2, kind: input, shape index: {}]   ;;  %s6977_s3 = inlined_call_operand.vmem [shape: f32[2,128], index: 3, kind: input, shape index: {}]   ;;  %s6978_s4 = inlined_call_operand.vmem [shape: f32[64,64], index: 4, kind: input, shape index: {}]   ;;  %s6979_s5 = inlined_call_operand.vmem [shape: f32[64,64], index: 5, kind: input, shape index: {}]   ;;  %s6980_s6 = inlined_call_operand.vmem [shape: bf16[64,64], index: 6, kind: input, shape index: {}]   ;;  %s6981_s7 = inlined_call_operand.vmem [shape: f32[128,64], index: 7, kind: input, shape index: {}]   ;;  %s6982_s8 = inlined_call_operand.vmem [shape: f32[128,32], index: 8, kind: input, shape index: {}]   ;;  %s6983_s9 = inlined_call_operand.vmem [shape: f32[256,64], index: 9, kind: input, shape index: {}]   ;;  %s6984_s10 = inlined_call_operand.vmem [shape: f32[1,64], index: 10, kind: input, shape index: {}]   ;;  %s6985_s11 = inlined_call_operand.vmem [shape: f32[64,64], index: 11, kind: input, shape index: {}]   ;;  %s6986_s12 = inlined_call_operand.vmem [shape: f32[1,64], index: 12, kind: input, shape index: {}]   ;;  %s6987_s13 = inlined_call_operand.vmem [shape: f32[2,1,64], index: 13, kind: input, shape index: {}]   ;;  %s6988_s14 = inlined_call_operand.vmem [shape: bf16[2,64,64], index: 14, kind: input, shape index: {}]   ;;  %s6989_s15 = inlined_call_operand.vmem [shape: bf16[2,64,64], index: 15, kind: input, shape index: {}]   ;;  %s6990_s16 = inlined_call_operand.vmem [shape: bf16[2,64,64], index: 16, kind: input, shape index: {}]   ;;  %s6991_s17 = inlined_call_operand.vmem [shape: f32[2,1,64], index: 17, kind: input, shape index: {}]   ;;  %s6992_s18 = inlined_call_operand.vmem [shape: bf16[2,64,256], index: 18, kind: input, shape index: {}]   ;;  %s6993_s19 = inlined_call_operand.vmem [shape: f32[2,1,256], index: 19, kind: input, shape index: {}]   ;;  %s6994_s20 = inlined_call_operand.vmem [shape: bf16[2,256,64], index: 20, kind: input, shape index: {}]   ;;  %s6995_s21 = inlined_call_operand.vmem [shape: f32[2,1,64], index: 21, kind: input, shape index: {}]   ;;  %s6996_s22 = inlined_call_operand.vmem [shape: bf16[64,1536], index: 22, kind: input, shape index: {}]   ;;  %s6997_s23 = inlined_call_operand.vmem [shape: f32[1,1536], index: 23, kind: input, shape index: {}]   ;;  %s6998_s24 = inlined_call_operand.vmem [shape: f32[1,64], index: 24, kind: input, shape index: {}]   ;;  %s6999_s25 = inlined_call_operand.vmem [shape: bf16[64,128], index: 25, kind: input, shape index: {}]   ;;  %s7000_s26 = inlined_call_operand.hbm [shape: bf16[32,128], index: 26, kind: output, shape index: {}]  }
   0x1   :  { %7011 = sst [smem:[#allocation7_spill]] %s6974_s0 }
   0x2   :  { %7012 = sst [smem:[#allocation8_spill]] %s6975_s1 }
   0x3   :  { %7013 = sst [smem:[#allocation9_spill]] %s6976_s2 }
   0x4   :  { %7014 = sst [smem:[#allocation10_spill]] %s6977_s3 }
   0x5   :  { %7015 = sst [smem:[#allocation11_spill]] %s6978_s4 }
   0x6   :  { %7016 = sst [smem:[#allocation12_spill]] %s6979_s5 }
   0x7   :  { %7017 = sst [smem:[#allocation13_spill]] %s6980_s6 }
   0x8   :  { %7018 = sst [smem:[#allocation14_spill]] %s6981_s7 }
   0x9   :  { %7019 = sst [smem:[#allocation15_spill]] %s6982_s8 }
   0xa   :  { %7020 = sst [smem:[#allocation16_spill]] %s6983_s9 }
   0xb   :  { %7021 = sst [smem:[#allocation17_spill]] %s6984_s10 }
   0xc   :  { %s7022_s7 = sld [smem:[#allocation16_spill]]  ;;  %vm200_vm0 = vcmask 523264  }
   0xd   :  { %s7023_s28 = sld [smem:[#allocation7_spill]] }
   0xe   :  { %s7024_s29 = sld [smem:[#allocation8_spill]] }
  0x12   :  { %v101_v0 = vld [vmem:[%s7022_s7 + $0x78] sm:$0xff]  ;;  %v100_v1 = vld [vmem:[%s7022_s7 + $0x70] sm:$0xff]  ;;  %v99_v4 = vld [vmem:[%s7022_s7 + $0x68] sm:$0xff] }
  0x13   :  { %v117_v2 = vld [vmem:[%s7022_s7 + $0xf8] sm:$0xff]  ;;  %128 = vmatpush.msra.mxu0 %v101_v0  ;;  %v116_v3 = vld [vmem:[%s7022_s7 + $0xf0] sm:$0xff]  ;;  %v115_v5 = vld [vmem:[%s7022_s7 + $0xe8] sm:$0xff] }
  0x14   :  { %148 = vmatpush.msra.mxu1 %v117_v2  ;;  %v98_v6 = vld [vmem:[%s7022_s7 + $0x60] sm:$0xff]  ;;  %v97_v8 = vld [vmem:[%s7022_s7 + $0x58] sm:$0xff]  ;;  %v96_v10 = vld [vmem:[%s7022_s7 + $0x50] sm:$0xff] }
  0x15   :  { %129 = vmatpush.msra.mxu0 %v100_v1  ;;  %v114_v7 = vld [vmem:[%s7022_s7 + $0xe0] sm:$0xff]  ;;  %v113_v9 = vld [vmem:[%s7022_s7 + $0xd8] sm:$0xff]  ;;  %v112_v11 = vld [vmem:[%s7022_s7 + $0xd0] sm:$0xff] }
  0x16   :  { %149 = vmatpush.msra.mxu1 %v116_v3  ;;  %v95_v12 = vld [vmem:[%s7022_s7 + $0x48] sm:$0xff]  ;;  %v85_v14 = vld [vmem:[%s7023_s28] sm:$0xf]  ;;  %v4876_v16 = vld [vmem:[%s7024_s29 + $0x10] sm:$0xff] }
  0x17   :  { %130 = vmatpush.msra.mxu0 %v99_v4  ;;  %v111_v13 = vld [vmem:[%s7022_s7 + $0xc8] sm:$0xff]  ;;  %123 = vst [vmem:[#allocation1] ss:$4 sm:$0xff] %v85_v14  ;;  %v4871_v15 = vld [vmem:[%s7024_s29] sm:$0xff]  ;;  %v811_v20 = vsel %vm200_vm0, %v4876_v16, 0.0  ;;  %v93_v21 = vld [vmem:[%s7022_s7 + $0x38] sm:$0xff] }
  0x18   :  { %150 = vmatpush.msra.mxu1 %v115_v5  ;;  %v94_v17 = vld [vmem:[%s7022_s7 + $0x40] sm:$0xff]  ;;  %v805_v19 = vsel %vm200_vm0, %v4871_v15, 0.0  ;;  %v109_v22 = vld [vmem:[%s7022_s7 + $0xb8] sm:$0xff]  ;;  %v92_v23 = vld [vmem:[%s7022_s7 + $0x30] sm:$0xff]  ;;  %812 = vadd.xlane.f32.xlu1 %v811_v20 }
  0x19   :  { %131 = vmatpush.msra.mxu0 %v98_v6  ;;  %v110_v18 = vld [vmem:[%s7022_s7 + $0xc0] sm:$0xff]  ;;  %v108_v24 = vld [vmem:[%s7022_s7 + $0xb0] sm:$0xff]  ;;  %806 = vadd.xlane.f32.xlu0 %v805_v19  ;;  %v4903_v25 = vld [vmem:[%s7024_s29 + $0x8] sm:$0xff] }
  0x1a   :  { %151 = vmatpush.msra.mxu1 %v114_v7  ;;  %v4908_v26 = vld [vmem:[%s7024_s29 + $0x18] sm:$0xff] }
  0x1b   :  { %132 = vmatpush.msra.mxu0 %v97_v8 }
  0x1c   :  { %152 = vmatpush.msra.mxu1 %v113_v9 }
  0x1d   :  { %133 = vmatpush.msra.mxu0 %v96_v10 }
  0x1e   :  { %153 = vmatpush.msra.mxu1 %v112_v11 }
  0x1f   :  { %134 = vmatpush.msra.mxu0 %v95_v12 }
  0x20   :  { %154 = vmatpush.msra.mxu1 %v111_v13 }
  0x21   :  { %135 = vmatpush.msra.mxu0 %v94_v17 }
  0x22   :  { %155 = vmatpush.msra.mxu1 %v110_v18 }
  0x23   :  { %31 = vsyncpa [#allocation3], 0  ;;  %136 = vmatpush.msra.mxu0 %v93_v21  ;;  %v91_v27 = vld [vmem:[%s7022_s7 + $0x28] sm:$0xff]  ;;  %v808_v29 = vsel %vm200_vm0, %v4903_v25, 0.0  ;;  %v814_v30 = vsel %vm200_vm0, %v4908_v26, 0.0  ;;  %v90_v31 = vld [vmem:[%s7022_s7 + $0x20] sm:$0xff] }
  0x24   :  { %156 = vmatpush.msra.mxu1 %v109_v22  ;;  %v107_v28 = vld [vmem:[%s7022_s7 + $0xa8] sm:$0xff]  ;;  %v106_v32 = vld [vmem:[%s7022_s7 + $0xa0] sm:$0xff]  ;;  %v89_v33 = vld [vmem:[%s7022_s7 + $0x18] sm:$0xff]  ;;  %809 = vadd.xlane.f32.xlu0 %v808_v29  ;;  %v4682_v47 = vmov 64.0   ;;  %s7025_s8 = sld [smem:[#allocation17_spill]]  ;;  %s4685_s4 = smov [#allocation2]  }
  0x25   :  { %137 = vmatpush.msra.mxu0 %v92_v23  ;;  %v105_v34 = vld [vmem:[%s7022_s7 + $0x98] sm:$0xff]  ;;  %815 = vadd.xlane.f32.xlu1 %v814_v30  ;;  %v88_v35 = vld [vmem:[%s7022_s7 + $0x10] sm:$0xff]  ;;  %v87_v37 = vld [vmem:[%s7022_s7 + $0x8] sm:$0xff]  ;;  %4395 = vrcp.f32 %v4682_v47  ;;  %s7030_s29 = sld [smem:[#allocation13_spill]]  ;;  %s3565_s2 = sshll.u32 %s7000_s26, 4  ;;  %s3566_s2 = int_to_ptr.hbm [resolvable:$true] %s3565_s2 }
  0x26   :  { %157 = vmatpush.msra.mxu1 %v108_v24  ;;  %v104_v36 = vld [vmem:[%s7022_s7 + $0x90] sm:$0xff]  ;;  %v103_v38 = vld [vmem:[%s7022_s7 + $0x88] sm:$0xff]  ;;  %v86_v39 = vld [vmem:[%s7022_s7] sm:$0xff]  ;;  %s7033_s30 = sld [smem:[#allocation11_spill]] }
  0x27   :  { %138 = vmatpush.msra.mxu0 %v91_v27  ;;  %v102_v40 = vld [vmem:[%s7022_s7 + $0x80] sm:$0xff]  ;;  %v125_v42 = vld.sshfl [vmem:[#allocation1 + $0x8] sm:$0xff pattern:$0x73625140]  ;;  %v195_v43 = vld [vmem:[%s6985_s11 + $0x38] sm:$0xff]  ;;  %s7035_s3 = sld [smem:[#allocation14_spill]] }
  0x28   :  { %158 = vmatpush.msra.mxu1 %v107_v28  ;;  %v124_v41 = vld.sshfl [vmem:[#allocation1] sm:$0xff pattern:$0x73625140]  ;;  %212 = vmatpush.msra.mxu2 %v195_v43  ;;  %v194_v44 = vld [vmem:[%s6985_s11 + $0x30] sm:$0xff]  ;;  %v193_v45 = vld [vmem:[%s6985_s11 + $0x28] sm:$0xff]  ;;  %s7036_s6 = sld [smem:[#allocation15_spill]] }
  0x29   :  { %139 = vmatpush.msra.mxu0 %v90_v31  ;;  %v192_v46 = vld [vmem:[%s6985_s11 + $0x20] sm:$0xff]  ;;  %v191_v48 = vld [vmem:[%s6985_s11 + $0x18] sm:$0xff]  ;;  %v190_v50 = vld [vmem:[%s6985_s11 + $0x10] sm:$0xff] }
  0x2a   :  { %159 = vmatpush.msra.mxu1 %v106_v32  ;;  %213 = vmatpush.msra.mxu2 %v194_v44  ;;  %v4386_v49 = vld [vmem:[%s7025_s8] ss:$0 sm:$0xff]  ;;  %v189_v52 = vld [vmem:[%s6985_s11 + $0x8] sm:$0xff]  ;;  %s7038_s8 = sld [smem:[#allocation9_spill]] }
  0x2b   :  { %140 = vmatpush.msra.mxu0 %v89_v33  ;;  %v4396_v51 = vpop.eup %4395  ;;  %v188_v57 = vld [vmem:[%s6985_s11] sm:$0xff]  ;;  %s7034_s11 = sld [smem:[#allocation12_spill]] }
  0x2c   :  { %160 = vmatpush.msra.mxu1 %v105_v34  ;;  %214 = vmatpush.msra.mxu2 %v193_v45  ;;  %v818_v55 = vmul.f32 64.0, %v4396_v51  ;;  %vm822_vm1 = vweird.f32 %v4396_v51  ;;  %v3726_v33 = vld [vmem:[%s6996_s22 + $0x120] sm:$0xf]  ;;  %v4280_v34 = vld [vmem:[%s6996_s22 + $0x14c] sm:$0xf0] }
  0x2d   :  { %141 = vmatpush.msra.mxu0 %v88_v35  ;;  %v4274_v35 = vld [vmem:[%s6996_s22 + $0x124] sm:$0xf]  ;;  %v4282_v43 = vld [vmem:[%s6996_s22 + $0x15c] sm:$0xf0] }
  0x2e   :  { %161 = vmatpush.msra.mxu1 %v104_v36  ;;  %215 = vmatpush.msra.mxu2 %v192_v46  ;;  %v819_v58 = vsub.f32 1.0, %v818_v55  ;;  %v3727_v36 = vor.u32 %v4280_v34, %v3726_v33  ;;  %v3678_v45 = vld [vmem:[%s6996_s22 + $0xc0] sm:$0xf]  ;;  %v4268_v46 = vld [vmem:[%s6996_s22 + $0xec] sm:$0xf0] }
  0x2f   :  { %142 = vmatpush.msra.mxu0 %v87_v37  ;;  %v3728_v37 = vld [vmem:[%s6996_s22 + $0x150] sm:$0xf0]  ;;  %v3679_v47 = vor.u32 %v4268_v46, %v3678_v45  ;;  %v4270_v55 = vld [vmem:[%s6996_s22 + $0xfc] sm:$0xf0]  ;;  %v3752_v33 = vld [vmem:[%s6996_s22 + $0x168] sm:$0xf0] }
  0x30   :  { %162 = vmatpush.msra.mxu1 %v103_v38  ;;  %216 = vmatpush.msra.mxu2 %v191_v48  ;;  %v820_v62 = vmul.f32 %v4396_v51, %v819_v58  ;;  %v4275_v38 = vld [vmem:[%s6996_s22 + $0x12c] sm:$0xf]  ;;  %v4262_v48 = vld [vmem:[%s6996_s22 + $0xc4] sm:$0xf]  ;;  %v3758_v34 = vld [vmem:[%s6996_s22 + $0x140] sm:$0xf] }
  0x31   :  { %143 = vmatpush.msra.mxu0 %v86_v39  ;;  %v3736_v39 = vld [vmem:[%s6996_s22 + $0x158] sm:$0xf0]  ;;  %568 = vmatpush.bf16.msra.mxu3 %v3727_v36  ;;  %v4250_v58 = vld [vmem:[%s6996_s22 + $0x64] sm:$0xf]  ;;  %v4284_v36 = vld [vmem:[%s6996_s22 + $0x16c] sm:$0xf0] }
  0x32   :  { %163 = vmatpush.msra.mxu1 %v102_v40  ;;  %144 = vmatmul.f32.vlgmr.msra.gmra.mxu0 %v124_v41  ;;  %v821_v0 = vadd.f32 %v4396_v51, %v820_v62  ;;  %v3731_v40 = vor.u32 %v4274_v35, %v3728_v37  ;;  %v3739_v41 = vor.u32 %v4275_v38, %v3736_v39  ;;  %v4251_v62 = vld [vmem:[%s6996_s22 + $0x6c] sm:$0xf]  ;;  %v3686_v37 = vld [vmem:[%s6996_s22 + $0xc8] sm:$0xf]  ;;  %v4269_v38 = vld [vmem:[%s6996_s22 + $0xf4] sm:$0xf0] }
  0x33   :  { %164 = vmatmul.f32.vlgmr.msra.gmra.mxu1 %v125_v42  ;;  %217 = vmatpush.msra.mxu2 %v190_v50  ;;  %v3742_v42 = vld [vmem:[%s6996_s22 + $0x130] sm:$0xf]  ;;  %v4263_v50 = vld [vmem:[%s6996_s22 + $0xcc] sm:$0xf]  ;;  %v3759_v39 = vor.u32 %v4284_v36, %v3758_v34  ;;  %v3710_v46 = vld [vmem:[%s6996_s22 + $0xe0] sm:$0xf] }
  0x34   :  { %v4977_v1 = vsel %vm822_vm1, %v4396_v51, %v821_v0  ;;  %v3743_v44 = vor.u32 %v4282_v43, %v3742_v42  ;;  %607 = vmatpush.bf16.msrb.mxu0 %v3739_v41  ;;  %v3640_v0 = vld [vmem:[%s6996_s22 + $0x98] sm:$0xf0]  ;;  %v4264_v41 = vld [vmem:[%s6996_s22 + $0xd4] sm:$0xf]  ;;  %v3696_v42 = vld [vmem:[%s6996_s22 + $0x100] sm:$0xf0] }
  0x35   :  { %218 = vmatpush.msra.mxu2 %v189_v52  ;;  %v3688_v52 = vld [vmem:[%s6996_s22 + $0xf8] sm:$0xf0]  ;;  %569 = vmatpush.bf16.msra.mxu3 %v3679_v47  ;;  %v3699_v43 = vor.u32 %v4264_v41, %v3696_v42  ;;  %v3704_v45 = vld [vmem:[%s6996_s22 + $0x108] sm:$0xf0]  ;;  %v3712_v41 = vld [vmem:[%s6996_s22 + $0x110] sm:$0xf0] }
  0x36   :  { %620 = vmatpush.bf16.msrb.mxu1 %v3743_v44  ;;  %v4265_v44 = vld [vmem:[%s6996_s22 + $0xdc] sm:$0xf]  ;;  %v4267_v42 = vld [vmem:[%s6996_s22 + $0xec] sm:$0xf] }
  0x37   :  { %219 = vmatpush.msra.mxu2 %v188_v57  ;;  %v4256_v57 = vld [vmem:[%s6996_s22 + $0x8c] sm:$0xf0]  ;;  %v3707_v47 = vor.u32 %v4265_v44, %v3704_v45  ;;  %v3768_v34 = vld [vmem:[%s6996_s22 + $0x178] sm:$0xf0] }
  0x39   :  { %581 = vmatpush.bf16.msrb.mxu2 %v3731_v40  ;;  %v3687_v40 = vor.u32 %v4269_v38, %v3686_v37  ;;  %v3702_v38 = vld [vmem:[%s6996_s22 + $0xd8] sm:$0xf] }
  0x8b   :  { %v813_v61 = vpop.xlane.xlu1 %812 }
  0x8c   :  { %v807_v60 = vpop.xlane.xlu0 %806  ;;  %v826_v3 = vmul.f32 %v4977_v1, %v813_v61  ;;  %v3632_v61 = vld [vmem:[%s6996_s22 + $0x90] sm:$0xf0] }
  0x8d   :  { %v824_v2 = vmul.f32 %v4977_v1, %v807_v60 }
  0x8e   :  { %v4985_v6 = vsub.f32 %v4876_v16, %v826_v3  ;;  %v4258_v3 = vld [vmem:[%s6996_s22 + $0x9c] sm:$0xf0] }
  0x8f   :  { %v4982_v4 = vsub.f32 %v4871_v15, %v824_v2  ;;  %v3646_v2 = vld [vmem:[%s6996_s22 + $0x70] sm:$0xf] }
  0x90   :  { %v834_v12 = vmul.f32 %v4985_v6, %v4985_v6 }
  0x91   :  { %v832_v11 = vmul.f32 %v4982_v4, %v4982_v4 }
  0x92   :  { %v842_v17 = vsel %vm200_vm0, %v834_v12, 0.0  ;;  %v4238_v12 = vld [vmem:[%s6996_s22 + $0x4] sm:$0xf] }
  0x93   :  { %v836_v16 = vsel %vm200_vm0, %v832_v11, 0.0  ;;  %843 = vadd.xlane.f32.xlu0 %v842_v17 }
  0x94   :  { %837 = vadd.xlane.f32.xlu2 %v836_v16  ;;  %v4239_v16 = vld [vmem:[%s6996_s22 + $0xc] sm:$0xf] }
  0x97   :  { %v810_v5 = vpop.xlane.xlu0 %809 }
  0x98   :  { %v816_v7 = vpop.xlane.xlu1 %815  ;;  %v825_v8 = vmul.f32 %v4977_v1, %v810_v5  ;;  %v3643_v5 = vor.u32 %v4251_v62, %v3640_v0  ;;  %v3590_v62 = vld [vmem:[%s6996_s22 + $0x8] sm:$0xf] }
  0x99   :  { %v827_v9 = vmul.f32 %v4977_v1, %v816_v7  ;;  %v3647_v7 = vor.u32 %v4258_v3, %v3646_v2  ;;  %v4240_v3 = vld [vmem:[%s6996_s22 + $0x14] sm:$0xf] }
  0x9a   :  { %v4994_v14 = vsub.f32 %v4903_v25, %v825_v8  ;;  %v4387_v8 = vld [vmem:[%s6986_s12] ss:$0 sm:$0xff]  ;;  %s7040_s12 = sld [smem:[#allocation10_spill]] }
  0x9b   :  { %v4997_v15 = vsub.f32 %v4908_v26, %v827_v9  ;;  %v3582_v9 = vld [vmem:[%s6996_s22] sm:$0xf] }
  0x9c   :  { %v833_v18 = vmul.f32 %v4994_v14, %v4994_v14 }
  0x9d   :  { %v835_v19 = vmul.f32 %v4997_v15, %v4997_v15 }
  0x9e   :  { %v839_v21 = vsel %vm200_vm0, %v833_v18, 0.0  ;;  %v3592_v18 = vld [vmem:[%s6996_s22 + $0x38] sm:$0xf0] }
  0x9f   :  { %v845_v20 = vsel %vm200_vm0, %v835_v19, 0.0  ;;  %840 = vadd.xlane.f32.xlu2 %v839_v21  ;;  %v3598_v19 = vld [vmem:[%s6996_s22 + $0x10] sm:$0xf]  ;;  %v3595_v21 = vor.u32 %v4239_v16, %v3592_v18 }
  0xa0   :  { %846 = vadd.xlane.f32.xlu1 %v845_v20 }
  0xaf   :  { %v145_v53 = vpop.f32.mrf.mxu0 }
  0xb0   :  { %v165_v54 = vpop.f32.mrf.mxu1  ;;  %v146_v56 = vadd.f32 %v4386_v49, %v145_v53  ;;  %v3680_v49 = vld [vmem:[%s6996_s22 + $0xf0] sm:$0xf0]  ;;  %v3694_v53 = vld [vmem:[%s6996_s22 + $0xd0] sm:$0xf] }
  0xb1   :  { %v3683_v51 = vor.u32 %v4262_v48, %v3680_v49  ;;  %v4272_v48 = vld [vmem:[%s6996_s22 + $0x10c] sm:$0xf0]  ;;  %v3638_v49 = vld [vmem:[%s6996_s22 + $0x68] sm:$0xf] }
  0xb2   :  { %v166_v59 = vadd.f32 %v165_v54, %v146_v56  ;;  %v3691_v54 = vor.u32 %v4263_v50, %v3688_v52  ;;  %v3630_v56 = vld [vmem:[%s6996_s22 + $0x60] sm:$0xf]  ;;  %v3711_v50 = vor.u32 %v4272_v48, %v3710_v46  ;;  %v4252_v52 = vld [vmem:[%s6996_s22 + $0x74] sm:$0xf]  ;;  %v3654_v46 = vld [vmem:[%s6996_s22 + $0x78] sm:$0xf] }
  0xb3   :  { %582 = vmatpush.bf16.msrb.mxu2 %v3683_v51  ;;  %v3631_v60 = vor.u32 %v4256_v57, %v3630_v56  ;;  %v4257_v51 = vld [vmem:[%s6996_s22 + $0x94] sm:$0xf0]  ;;  %v4253_v56 = vld [vmem:[%s6996_s22 + $0x7c] sm:$0xf]  ;;  %v3656_v57 = vld [vmem:[%s6996_s22 + $0xa8] sm:$0xf0] }
  0xb4   :  { %v3577_v63 = vmul.f32 -1.442695, %v166_v59  ;;  %608 = vmatpush.bf16.msrb.mxu0 %v3691_v54  ;;  %v3639_v54 = vor.u32 %v4257_v51, %v3638_v49  ;;  %v4259_v48 = vld [vmem:[%s6996_s22 + $0xa4] sm:$0xf0]  ;;  %v4254_v49 = vld [vmem:[%s6996_s22 + $0x84] sm:$0xf] }
  0xb5   :  { %570 = vmatpush.bf16.msra.mxu3 %v3631_v60  ;;  %v3659_v60 = vor.u32 %v4253_v56, %v3656_v57  ;;  %v4255_v51 = vld [vmem:[%s6996_s22 + $0x8c] sm:$0xf]  ;;  %v4247_v57 = vld [vmem:[%s6996_s22 + $0x44] sm:$0xf0] }
  0xb6   :  { %4397 = vpow2.f32 %v3577_v63  ;;  %v3635_v63 = vor.u32 %v4250_v58, %v3632_v61  ;;  %v3662_v58 = vld [vmem:[%s6996_s22 + $0x80] sm:$0xf]  ;;  %v4260_v61 = vld [vmem:[%s6996_s22 + $0xac] sm:$0xf0] }
  0xb7   :  { %v3663_v2 = vor.u32 %v4260_v61, %v3662_v58  ;;  %v4242_v58 = vld [vmem:[%s6996_s22 + $0x24] sm:$0xf]  ;;  %v3624_v61 = vld [vmem:[%s6996_s22 + $0x58] sm:$0xf0] }
  0xb8   :  { %583 = vmatpush.bf16.msrb.mxu2 %v3635_v63  ;;  %609 = vmatpush.bf16.msrb.mxu0 %v3643_v5  ;;  %v4245_v63 = vld [vmem:[%s6996_s22 + $0x34] sm:$0xf0]  ;;  %v3600_v5 = vld [vmem:[%s6996_s22 + $0x40] sm:$0xf0] }
  0xbc   :  { %v4398_v10 = vpop.eup %4397  ;;  %610 = vmatpush.bf16.msrb.mxu0 %v3595_v21 }
  0xbd   :  { %v171_v13 = vadd.f32 1.0, %v4398_v10  ;;  %v4244_v10 = vld [vmem:[%s6996_s22 + $0x2c] sm:$0xf0] }
  0xbe   :  { %v3583_v11 = vor.u32 %v4244_v10, %v3582_v9  ;;  %v3608_v9 = vld [vmem:[%s6996_s22 + $0x48] sm:$0xf0]  ;;  %v3614_v10 = vld [vmem:[%s6996_s22 + $0x20] sm:$0xf] }
  0xbf   :  { %4399 = vrcp.f32 %v171_v13  ;;  %v183_v25 = vand.u32 2147483648, %v171_v13  ;;  %v181_v27 = vand.u32 2147483647, %v171_v13  ;;  %vm177_vm3 = vweird.f32 %v171_v13 }
  0xc0   :  { %571 = vmatpush.bf16.msra.mxu3 %v3583_v11  ;;  %v3603_v11 = vor.u32 %v4240_v3, %v3600_v5  ;;  %v4285_v3 = vld [vmem:[%s6996_s22 + $0x174] sm:$0xf0] }
  0xc1   :  { %v184_v29 = vor.u32 1.1754944e-38, %v183_v25  ;;  %vm182_vm5 = vcmp.eq.f32.partialorder %v181_v27, 8.507059e+37  ;;  %v3734_v25 = vld [vmem:[%s6996_s22 + $0x128] sm:$0xf] }
  0xc5   :  { %v4400_v22 = vpop.eup %4399 }
  0xc6   :  { %v173_v23 = vmul.f32 %v4400_v22, %v171_v13  ;;  %vm178_vm2 = vweird.f32 %v4400_v22  ;;  %v3584_v13 = vld [vmem:[%s6996_s22 + $0x30] sm:$0xf0] }
  0xc7   :  { %vm179_vm4 = vmor %vm177_vm3, %vm178_vm2  ;;  %v3587_v17 = vor.u32 %v4238_v12, %v3584_v13  ;;  %v4248_v12 = vld [vmem:[%s6996_s22 + $0x4c] sm:$0xf0] }
  0xc8   :  { %v174_v24 = vsub.f32 1.0, %v173_v23  ;;  %v3615_v16 = vor.u32 %v4248_v12, %v3614_v10  ;;  %v3670_v10 = vld [vmem:[%s6996_s22 + $0x88] sm:$0xf] }
  0xc9   :  { %584 = vmatpush.bf16.msrb.mxu2 %v3587_v17 }
  0xca   :  { %v175_v26 = vmul.f32 %v4400_v22, %v174_v24 }
  0xcc   :  { %v176_v28 = vadd.f32 %v4400_v22, %v175_v26  ;;  %v4281_v26 = vld [vmem:[%s6996_s22 + $0x154] sm:$0xf0] }
  0xce   :  { %v180_v30 = vsel %vm179_vm4, %v4400_v22, %v176_v28  ;;  %v4246_v22 = vld [vmem:[%s6996_s22 + $0x3c] sm:$0xf0]  ;;  %v3735_v28 = vor.u32 %v4281_v26, %v3734_v25 }
  0xcf   :  { %v185_v31 = vsel %vm182_vm5, %v184_v29, %v180_v30  ;;  %v3599_v24 = vor.u32 %v4246_v22, %v3598_v19  ;;  %v4276_v29 = vld [vmem:[%s6996_s22 + $0x134] sm:$0xf]  ;;  %v3744_v30 = vld [vmem:[%s6996_s22 + $0x160] sm:$0xf0] }
  0xd0   :  { %v187_v32 = vmul.f32 %v185_v31, %v166_v59  ;;  %v3695_v59 = vor.u32 %v4270_v55, %v3694_v53  ;;  %v3747_v31 = vor.u32 %v4276_v29, %v3744_v30  ;;  %594 = vmatpush.bf16.msrb.mxu3 %v3735_v28  ;;  %v3648_v53 = vld [vmem:[%s6996_s22 + $0xa0] sm:$0xf0]  ;;  %v4283_v29 = vld [vmem:[%s6996_s22 + $0x164] sm:$0xf0] }
  0xd1   :  { %v3651_v55 = vor.u32 %v4252_v52, %v3648_v53  ;;  %v4278_v30 = vld [vmem:[%s6996_s22 + $0x144] sm:$0xf]  ;;  %v3672_v52 = vld [vmem:[%s6996_s22 + $0xb8] sm:$0xf0]  ;;  %v3655_v53 = vor.u32 %v4259_v48, %v3654_v46 }
  0xd2   :  { %3578 = vmatmul.msk.f32.vlgmr.msra.gmra.mxu2 %vm200_vm0, %v187_v32  ;;  %621 = vmatpush.bf16.msrb.mxu1 %v3695_v59  ;;  %v4277_v32 = vld [vmem:[%s6996_s22 + $0x13c] sm:$0xf]  ;;  %v3675_v56 = vor.u32 %v4255_v51, %v3672_v52 }
  0xd3   :  { %v3755_v35 = vor.u32 %v4277_v32, %v3752_v33  ;;  %633 = vmatpush.bf16.msra.mxu2 %v3747_v31  ;;  %v3760_v31 = vld [vmem:[%s6996_s22 + $0x170] sm:$0xf0]  ;;  %v4279_v33 = vld [vmem:[%s6996_s22 + $0x14c] sm:$0xf] }
  0xd4   :  { %595 = vmatpush.bf16.msrb.mxu3 %v3687_v40  ;;  %v3763_v37 = vor.u32 %v4278_v30, %v3760_v31  ;;  %v4266_v40 = vld [vmem:[%s6996_s22 + $0xe4] sm:$0xf]  ;;  %v4296_v30 = vld [vmem:[%s6989_s15 + $0x10] sm:$0xff] }
  0xd5   :  { %659 = vmatpush.bf16.msra.mxu0 %v3755_v35  ;;  %v3715_v45 = vor.u32 %v4266_v40, %v3712_v41  ;;  %v4300_v31 = vld [vmem:[%s6990_s16 + $0x10] sm:$0xff]  ;;  %v4290_v41 = vld [vmem:[%s6988_s14] sm:$0xff] }
  0xd6   :  { %622 = vmatpush.bf16.msrb.mxu1 %v3647_v7  ;;  %v3591_v7 = vor.u32 %v4245_v63, %v3590_v62 }
  0xd7   :  { %634 = vmatpush.bf16.msra.mxu2 %v3699_v43  ;;  %v3720_v43 = vld [vmem:[%s6996_s22 + $0x118] sm:$0xf0] }
  0xd8   :  { %596 = vmatpush.bf16.msrb.mxu3 %v3639_v54 }
  0xd9   :  { %660 = vmatpush.bf16.msra.mxu0 %v3707_v47  ;;  %v3723_v47 = vor.u32 %v4267_v42, %v3720_v43  ;;  %v4294_v42 = vld [vmem:[%s6989_s15] sm:$0xff] }
  0xda   :  { %623 = vmatpush.bf16.msrb.mxu1 %v3599_v24 }
  0xdb   :  { %635 = vmatpush.bf16.msra.mxu2 %v3651_v55  ;;  %v3606_v55 = vld [vmem:[%s6996_s22 + $0x18] sm:$0xf] }
  0xdc   :  { %597 = vmatpush.bf16.msrb.mxu3 %v3591_v7  ;;  %v3607_v62 = vor.u32 %v4247_v57, %v3606_v55  ;;  %v3718_v7 = vld [vmem:[%s6996_s22 + $0xe8] sm:$0xf] }
  0xdd   :  { %661 = vmatpush.bf16.msra.mxu0 %v3659_v60  ;;  %v4243_v60 = vld [vmem:[%s6996_s22 + $0x2c] sm:$0xf] }
  0xde   :  { %672 = vmatpush.bf16.msra.mxu1 %v3759_v39  ;;  %v3771_v39 = vor.u32 %v4279_v33, %v3768_v34 }
  0xdf   :  { %636 = vmatpush.bf16.msra.mxu2 %v3603_v11  ;;  %v4261_v11 = vld [vmem:[%s6996_s22 + $0xb4] sm:$0xf0] }
  0xe0   :  { %v3671_v12 = vor.u32 %v4261_v11, %v3670_v10 }
  0xe2   :  { %673 = vmatpush.bf16.msra.mxu1 %v3711_v50  ;;  %v3664_v50 = vld [vmem:[%s6996_s22 + $0xb0] sm:$0xf0] }
  0xe3   :  { %v3667_v54 = vor.u32 %v4254_v49, %v3664_v50 }
  0xe6   :  { %674 = vmatpush.bf16.msra.mxu1 %v3663_v2  ;;  %v3766_v2 = vld [vmem:[%s6996_s22 + $0x148] sm:$0xf] }
  0xe7   :  { %v3767_v5 = vor.u32 %v4285_v3, %v3766_v2 }
  0xea   :  { %675 = vmatpush.bf16.msra.mxu1 %v3615_v16  ;;  %v4249_v16 = vld [vmem:[%s6996_s22 + $0x54] sm:$0xf0] }
 0x155   :  { %v221_v20 = vpop.f32.mrf.mxu2 }
 0x156   :  { %v5107_v23 = vadd.f32 %v4387_v8, %v221_v20  ;;  %v4241_v8 = vld [vmem:[%s6996_s22 + $0x1c] sm:$0xf] }
 0x157   :  { %v3611_v13 = vor.u32 %v4241_v8, %v3608_v9  ;;  %v4273_v8 = vld [vmem:[%s6996_s22 + $0x114] sm:$0xf0] }
 0x158   :  { %v3579_v27 = vmul.f32 -1.442695, %v5107_v23  ;;  %v3719_v9 = vor.u32 %v4273_v8, %v3718_v7 }
 0x159   :  { %662 = vmatpush.bf16.msra.mxu0 %v3611_v13  ;;  %v3622_v13 = vld [vmem:[%s6996_s22 + $0x28] sm:$0xf] }
 0x15a   :  { %4401 = vpow2.f32 %v3579_v27  ;;  %v3750_v27 = vld [vmem:[%s6996_s22 + $0x138] sm:$0xf] }
 0x15b   :  { %v3751_v36 = vor.u32 %v4283_v29, %v3750_v27  ;;  %v4301_v27 = vld [vmem:[%s6990_s16 + $0x18] sm:$0xff]  ;;  %v4292_v29 = vld [vmem:[%s6988_s14 + $0x10] sm:$0xff] }
 0x160   :  { %v4402_v59 = vpop.eup %4401 }
 0x161   :  { %v227_v0 = vadd.f32 1.0, %v4402_v59  ;;  %v3616_v59 = vld [vmem:[%s6996_s22 + $0x50] sm:$0xf0] }
 0x162   :  { %v3619_v63 = vor.u32 %v4242_v58, %v3616_v59 }
 0x163   :  { %4403 = vrcp.f32 %v227_v0  ;;  %v239_v20 = vand.u32 2147483648, %v227_v0  ;;  %v237_v22 = vand.u32 2147483647, %v227_v0  ;;  %vm233_vm7 = vweird.f32 %v227_v0 }
 0x165   :  { %v240_v25 = vor.u32 1.1754944e-38, %v239_v20  ;;  %vm238_vm9 = vcmp.eq.f32.partialorder %v237_v22, 8.507059e+37 }
 0x169   :  { %v4404_v17 = vpop.eup %4403 }
 0x16a   :  { %v229_v18 = vmul.f32 %v4404_v17, %v227_v0  ;;  %vm234_vm6 = vweird.f32 %v4404_v17  ;;  %v3627_v0 = vor.u32 %v4243_v60, %v3624_v61 }
 0x16b   :  { %vm235_vm8 = vmor %vm233_vm7, %vm234_vm6  ;;  %vm1310_vm7 = vcmask 261120  }
 0x16c   :  { %v230_v19 = vsub.f32 1.0, %v229_v18  ;;  %v838_v18 = vpop.xlane.xlu2 %837 }
 0x16d   :  { %v848_v20 = vmul.f32 %v838_v18, %v4977_v1 }
 0x16e   :  { %v231_v21 = vmul.f32 %v4404_v17, %v230_v19 }
 0x16f   :  { %v852_v22 = vadd.f32 1e-05, %v848_v20 }
 0x170   :  { %v232_v24 = vadd.f32 %v4404_v17, %v231_v21 }
 0x171   :  { %4405 = vrsqrt.f32 %v852_v22  ;;  %vm862_vm10 = vweird.f32 %v852_v22 }
 0x172   :  { %v236_v26 = vsel %vm235_vm8, %v4404_v17, %v232_v24  ;;  %v3623_v17 = vor.u32 %v4249_v16, %v3622_v13  ;;  %v4388_v16 = vld [vmem:[%s6987_s13] ss:$0 sm:$0xff] }
 0x173   :  { %v241_v28 = vsel %vm238_vm9, %v240_v25, %v236_v26  ;;  %v4293_v25 = vld [vmem:[%s6988_s14 + $0x18] sm:$0xff] }
 0x174   :  { %v243_v32 = vmul.f32 %v241_v28, %v5107_v23  ;;  %v4271_v23 = vld [vmem:[%s6996_s22 + $0x104] sm:$0xf0]  ;;  %v841_v19 = vpop.xlane.xlu2 %840  ;;  %v4297_v26 = vld [vmem:[%s6989_s15 + $0x18] sm:$0xff]  ;;  %v844_v28 = vpop.xlane.xlu0 %843 }
 0x175   :  { %v3703_v44 = vor.u32 %v4271_v23, %v3702_v38  ;;  %v849_v21 = vmul.f32 %v841_v19, %v4977_v1  ;;  %v850_v33 = vmul.f32 %v844_v28, %v4977_v1 }
 0x176   :  { %v5225_v35 = vpack.c.bf16 %v243_v32, %v243_v32  ;;  %v847_v32 = vpop.xlane.xlu1 %846 }
 0x177   :  { %v853_v24 = vadd.f32 1e-05, %v849_v21  ;;  %v851_v34 = vmul.f32 %v847_v32, %v4977_v1  ;;  %v4406_v38 = vpop.eup %4405  ;;  %v854_v23 = vadd.f32 1e-05, %v850_v33 }
 0x178   :  { %3772 = vmatmul.msk.bf16.vlgmr.msra.gmra.mxu3 %vm200_vm0, %v5225_v35  ;;  %3773 = vmatmul.msk.bf16.vlgmr.msrb.gmra.mxu2 %vm200_vm0, %v5225_v35  ;;  %v857_v43 = vmul.f32 %v4406_v38, %v852_v22  ;;  %vm863_vm11 = vweird.f32 %v4406_v38 }
 0x179   :  { %3775 = vmatmul.msk.bf16.vlgmr.msrb.gmra.mxu0 %vm200_vm0, %v5225_v35  ;;  %3776 = vmatmul.msk.bf16.vlgmr.msrb.gmra.mxu1 %vm200_vm0, %v5225_v35  ;;  %4407 = vrsqrt.f32 %v853_v24  ;;  %v855_v40 = vadd.f32 1e-05, %v851_v34  ;;  %vm872_vm12 = vweird.f32 %v853_v24  ;;  %vm5372_vm14 = vmor %vm862_vm10, %vm863_vm11  ;;  %vm882_vm1 = vweird.f32 %v854_v23 }
 0x17a   :  { %646 = vmatpush.bf16.msra.mxu3 %v3751_v36  ;;  %685 = vmatpush.bf16.msrb.mxu2 %v3763_v37  ;;  %v4295_v36 = vld [vmem:[%s6989_s15 + $0x8] sm:$0xff]  ;;  %4409 = vrsqrt.f32 %v854_v23  ;;  %v858_v46 = vmul.f32 %v4406_v38, %v857_v43 }
 0x17b   :  { %711 = vmatpush.bf16.msrb.mxu0 %v3771_v39  ;;  %961 = vmatpush.bf16.msrb.mxu1 %v4293_v25  ;;  %v4299_v37 = vld [vmem:[%s6990_s16 + $0x8] sm:$0xff]  ;;  %4411 = vrsqrt.f32 %v855_v40  ;;  %vm892_vm3 = vweird.f32 %v855_v40 }
 0x17c   :  { %v859_v49 = vmul.f32 0.5, %v858_v46 }
 0x17e   :  { %647 = vmatpush.bf16.msra.mxu3 %v3703_v44  ;;  %686 = vmatpush.bf16.msrb.mxu2 %v3715_v45  ;;  %v4298_v45 = vld [vmem:[%s6990_s16] sm:$0xff]  ;;  %v860_v52 = vsub.f32 1.5, %v859_v49 }
 0x17f   :  { %712 = vmatpush.bf16.msrb.mxu0 %v3723_v47  ;;  %962 = vmatpush.bf16.msrb.mxu1 %v4292_v29  ;;  %v4408_v39 = vpop.eup %4407 }
 0x180   :  { %v867_v44 = vmul.f32 %v4408_v39, %v853_v24  ;;  %v5369_v48 = vpop.eup %4409  ;;  %vm873_vm13 = vweird.f32 %v4408_v39 }
 0x181   :  { %v4412_v51 = vpop.eup %4411  ;;  %vm874_vm15 = vmor %vm872_vm12, %vm873_vm13  ;;  %vm883_vm2 = vweird.f32 %v5369_v48 }
 0x182   :  { %648 = vmatpush.bf16.msra.mxu3 %v3655_v53  ;;  %687 = vmatpush.bf16.msrb.mxu2 %v3667_v54  ;;  %v868_v47 = vmul.f32 %v4408_v39, %v867_v44  ;;  %v877_v54 = vmul.f32 %v5369_v48, %v854_v23  ;;  %v887_v55 = vmul.f32 %v4412_v51, %v855_v40  ;;  %vm893_vm4 = vweird.f32 %v4412_v51  ;;  %vm5393_vm5 = vmor %vm882_vm1, %vm883_vm2 }
 0x183   :  { %713 = vmatpush.bf16.msrb.mxu0 %v3675_v56  ;;  %v861_v56 = vmul.f32 %v4406_v38, %v860_v52  ;;  %vm894_vm6 = vmor %vm892_vm3, %vm893_vm4 }
 0x184   :  { %v869_v50 = vmul.f32 0.5, %v868_v47  ;;  %v878_v59 = vmul.f32 %v5369_v48, %v877_v54  ;;  %v888_v60 = vmul.f32 %v4412_v51, %v887_v55 }
 0x185   :  { %v865_v2 = vsel %vm5372_vm14, %v4406_v38, %v861_v56  ;;  %v5419_v56 = vld [vmem:[%s7030_s29 + $0x18] sm:$0xff] }
 0x186   :  { %649 = vmatpush.bf16.msra.mxu3 %v3607_v62  ;;  %688 = vmatpush.bf16.msrb.mxu2 %v3619_v63  ;;  %v870_v53 = vsub.f32 1.5, %v869_v50  ;;  %v293_v63 = vld [vmem:[%s6997_s23] sm:$0xff]  ;;  %v889_v7 = vmul.f32 0.5, %v888_v60 }
 0x187   :  { %714 = vmatpush.bf16.msrb.mxu0 %v3627_v0  ;;  %v298_v0 = vperm.slane %v293_v63, 1  ;;  %v297_v8 = vperm.slane %v293_v63, 0 }
 0x188   :  { %3774 = vmatmul.msk.bf16.vlgmr.msrb.gmra.mxu3 %vm200_vm0, %v5225_v35  ;;  %3777 = vmatmul.msk.bf16.vlgmr.msra.gmra.mxu2 %vm200_vm0, %v5225_v35  ;;  %v871_v58 = vmul.f32 %v4408_v39, %v870_v53  ;;  %v890_v18 = vsub.f32 1.5, %v889_v7 }
 0x189   :  { %3779 = vmatmul.msk.bf16.vlgmr.msra.gmra.mxu0 %vm200_vm0, %v5225_v35  ;;  %3780 = vmatmul.msk.bf16.vlgmr.msra.gmra.mxu1 %vm200_vm0, %v5225_v35 }
 0x18a   :  { %698 = vmatpush.bf16.msrb.mxu3 %v3767_v5  ;;  %1012 = vmatpush.bf16.msra.mxu2 %v4297_v26  ;;  %v875_v3 = vsel %vm874_vm15, %v4408_v39, %v871_v58  ;;  %v879_v5 = vmul.f32 0.5, %v878_v59 }
 0x18b   :  { %v897_v13 = vmul.f32 %v875_v3, %v4994_v14  ;;  %1130 = vmatpush.bf16.msra.mxu0 %v5419_v56 }
 0x18d   :  { %v904_v25 = vmul.f32 %v4388_v16, %v897_v13  ;;  %v5442_v13 = vld [vmem:[%s7030_s29 + $0x8] sm:$0xff] }
 0x18e   :  { %699 = vmatpush.bf16.msrb.mxu3 %v3719_v9  ;;  %1013 = vmatpush.bf16.msra.mxu2 %v4296_v30 }
 0x192   :  { %700 = vmatpush.bf16.msrb.mxu3 %v3671_v12  ;;  %1014 = vmatpush.bf16.msra.mxu2 %v4295_v36  ;;  %v896_v12 = vmul.f32 %v865_v2, %v4982_v4 }
 0x194   :  { %v903_v24 = vmul.f32 %v4388_v16, %v896_v12  ;;  %v5436_v12 = vld [vmem:[%s7030_s29 + $0x10] sm:$0xff] }
 0x195   :  { %1131 = vmatpush.bf16.msra.mxu0 %v5436_v12 }
 0x196   :  { %701 = vmatpush.bf16.msrb.mxu3 %v3623_v17  ;;  %1015 = vmatpush.bf16.msra.mxu2 %v4294_v42  ;;  %v880_v17 = vsub.f32 1.5, %v879_v5 }
 0x198   :  { %3778 = vmatmul.msk.bf16.vlgmr.msra.gmra.mxu3 %vm200_vm0, %v5225_v35  ;;  %3781 = vmatmul.msk.bf16.vlgmr.msrb.gmra.mxu2 %vm200_vm0, %v5225_v35  ;;  %v881_v14 = vmul.f32 %v5369_v48, %v880_v17 }
 0x199   :  { %3783 = vmatmul.msk.bf16.vlgmr.msrb.gmra.mxu0 %vm200_vm0, %v5225_v35 }
 0x19a   :  { %1063 = vmatpush.bf16.msra.mxu3 %v4301_v27  ;;  %v891_v27 = vmul.f32 %v4412_v51, %v890_v18  ;;  %1132 = vmatpush.bf16.msra.mxu0 %v5442_v13 }
 0x19c   :  { %v895_v36 = vsel %vm894_vm6, %v4412_v51, %v891_v27 }
 0x19e   :  { %1064 = vmatpush.bf16.msra.mxu3 %v4300_v31 }
 0x1a2   :  { %1065 = vmatpush.bf16.msra.mxu3 %v4299_v37 }
 0x1a6   :  { %1066 = vmatpush.bf16.msra.mxu3 %v4298_v45 }
 0x1a8   :  { %3782 = vmatmul.msk.bf16.vlgmr.msrb.gmra.mxu3 %vm200_vm0, %v5225_v35  ;;  %v4291_v35 = vld [vmem:[%s6988_s14 + $0x8] sm:$0xff] }
 0x1a9   :  { %963 = vmatpush.bf16.msrb.mxu1 %v4291_v35  ;;  %v885_v35 = vsel %vm5393_vm5, %v5369_v48, %v881_v14 }
 0x1aa   :  { %v898_v40 = vmul.f32 %v885_v35, %v4985_v6  ;;  %v752_v35 = vld [vmem:[%s7034_s11] sm:$0xff] }
 0x1ac   :  { %v905_v45 = vmul.f32 %v4388_v16, %v898_v40 }
 0x1ad   :  { %964 = vmatpush.bf16.msrb.mxu1 %v4290_v41  ;;  %v899_v41 = vmul.f32 %v895_v36, %v4997_v15  ;;  %v294_v15 = vld [vmem:[%s6997_s23 + $0x8] sm:$0xf] }
 0x1ae   :  { %v308_v55 = vperm.slane %v294_v15, 3  ;;  %v306_v60 = vperm.slane %v294_v15, 1 }
 0x1af   :  { %v906_v46 = vmul.f32 %v4388_v16, %v899_v41  ;;  %v5448_v16 = vld [vmem:[%s7030_s29] sm:$0xff]  ;;  %v745_v41 = vld [vmem:[%s7033_s30 + $0x8] sm:$0xff] }
 0x1b0   :  { %1133 = vmatpush.bf16.msra.mxu0 %v5448_v16 }
 0x1f6   :  { %v5377_v61 = vpop.f32.mrf.mxu0  ;;  %v5379_v62 = vpop.f32.mrf.mxu1 }
 0x1fb   :  { %v573_v9 = vpop.f32.mrf.mxu3  ;;  %v586_v10 = vpop.f32.mrf.mxu2 }
 0x1fc   :  { %v587_v11 = vadd.f32 %v586_v10, %v298_v0  ;;  %v574_v19 = vadd.f32 %v573_v9, %v297_v8  ;;  %v307_v8 = vperm.slane %v294_v15, 2 }
 0x1fe   :  { %v721_v20 = vperm.slane %v587_v11, 0  ;;  %v614_v21 = vpop.f32.mrf.mxu0  ;;  %v627_v22 = vpop.f32.mrf.mxu1  ;;  %v720_v28 = vperm.slane %v574_v19, 0  ;;  %v733_v37 = vperm.slane %v587_v11, 1  ;;  %v732_v6 = vperm.slane %v574_v19, 1 }
 0x200   :  { %v907_v4 = vadd.f32 1.0, %v721_v20  ;;  %v908_v42 = vadd.f32 1.0, %v733_v37 }
 0x202   :  { %v909_v29 = vmul.f32 %v907_v4, %v903_v24  ;;  %v910_v30 = vmul.f32 %v907_v4, %v904_v25  ;;  %v911_v47 = vmul.f32 %v908_v42, %v905_v45  ;;  %v912_v48 = vmul.f32 %v908_v42, %v906_v46  ;;  %v753_v42 = vld [vmem:[%s7034_s11 + $0x8] sm:$0xff] }
 0x203   :  { %v575_v31 = vpop.f32.mrf.mxu3  ;;  %v588_v32 = vpop.f32.mrf.mxu2 }
 0x204   :  { %v913_v33 = vadd.f32 %v909_v29, %v720_v28  ;;  %v914_v34 = vadd.f32 %v910_v30, %v720_v28  ;;  %v915_v51 = vadd.f32 %v911_v47, %v732_v6  ;;  %v916_v52 = vadd.f32 %v912_v48, %v732_v6  ;;  %v5478_v48 = vld [vmem:[%s7035_s3 + $0x40] sm:$0xff]  ;;  %v5493_v6 = vld [vmem:[%s7035_s3 + $0x68] sm:$0xff] }
 0x206   :  { %v917_v38 = vpack.c.bf16 %v914_v34, %v913_v33  ;;  %v5400_v39 = vpop.f32.mrf.mxu0  ;;  %v5402_v23 = vpop.f32.mrf.mxu1  ;;  %v918_v58 = vpack.c.bf16 %v916_v52, %v915_v51  ;;  %v744_v34 = vld [vmem:[%s7033_s30] sm:$0xff] }
 0x208   :  { %3800 = vmatmul.msk.bf16.vlgmr.msrb.gmra.mxu1 %vm200_vm0, %v917_v38  ;;  %3818 = vmatmul.msk.bf16.vlgmr.msra.gmra.mxu2 %vm200_vm0, %v917_v38 }
 0x209   :  { %3836 = vmatmul.msk.bf16.vlgmr.msra.gmra.mxu3 %vm200_vm0, %v917_v38 }
 0x20b   :  { %v5409_v43 = vpop.f32.mrf.mxu3  ;;  %v5411_v44 = vpop.f32.mrf.mxu2 }
 0x20e   :  { %v666_v49 = vpop.f32.mrf.mxu0  ;;  %v679_v50 = vpop.f32.mrf.mxu1 }
 0x20f   :  { %v5483_v49 = vld [vmem:[%s7035_s3 + $0x48] sm:$0xff]  ;;  %v5488_v50 = vld [vmem:[%s7035_s3 + $0x60] sm:$0xff] }
 0x213   :  { %v601_v53 = vpop.f32.mrf.mxu3  ;;  %v640_v54 = vpop.f32.mrf.mxu2 }
 0x216   :  { %v716_v57 = vpop.f32.mrf.mxu0 }
 0x217   :  { %v5422_v59 = vadd.f32 %v716_v57, %v308_v55  ;;  %v746_v55 = vld [vmem:[%s7033_s30 + $0x10] sm:$0xff] }
 0x218   :  { %3801 = vmatmul.msk.bf16.gmra.mxu1 %vm200_vm0, %v918_v58  ;;  %3819 = vmatmul.msk.bf16.gmra.mxu2 %vm200_vm0, %v918_v58  ;;  %v754_v57 = vld [vmem:[%s7034_s11 + $0x10] sm:$0xff] }
 0x219   :  { %7031 = vst [vmem:[#allocation5_spill] sm:$0xff] %v5422_v59  ;;  %3837 = vmatmul.msk.bf16.gmra.mxu3 %vm200_vm0, %v918_v58 }
 0x21b   :  { %v5427_v63 = vpop.f32.mrf.mxu3  ;;  %v690_v0 = vpop.f32.mrf.mxu2 }
 0x21c   :  { %v5429_v2 = vadd.f32 %v690_v0, %v306_v60 }
 0x21e   :  { %v718_v3 = vpop.f32.mrf.mxu0 }
 0x223   :  { %v653_v5 = vpop.f32.mrf.mxu3  ;;  %v692_v7 = vpop.f32.mrf.mxu2 }
 0x22b   :  { %v703_v9 = vpop.f32.mrf.mxu3 }
 0x22c   :  { %v5431_v10 = vadd.f32 %v703_v9, %v307_v8  ;;  %v747_v8 = vld [vmem:[%s7033_s30 + $0x18] sm:$0xff] }
 0x22d   :  { %v755_v9 = vld [vmem:[%s7034_s11 + $0x18] sm:$0xff] }
 0x22e   :  { %7032 = vst [vmem:[#allocation6_spill] sm:$0xff] %v5431_v10 }
 0x233   :  { %v705_v11 = vpop.f32.mrf.mxu3 }
 0x285   :  { %v966_v17 = vpop.f32.mrf.mxu1 }
 0x286   :  { %v1078_v37 = vmul.f32 %v966_v17, %v744_v34 }
 0x28b   :  { %v5452_v25 = vpop.f32.mrf.mxu2 }
 0x28c   :  { %v1068_v18 = vpop.f32.mrf.mxu3 }
 0x28d   :  { %v968_v19 = vpop.f32.mrf.mxu1 }
 0x28e   :  { %v1086_v20 = vpack.c.bf16 %v968_v19, %v966_v17  ;;  %v1079_v46 = vmul.f32 %v968_v19, %v745_v41  ;;  %v5534_v19 = vld [vmem:[%s7035_s3 + $0x50] sm:$0xff]  ;;  %v759_v41 = vld [vmem:[%s7034_s11 + $0x38] sm:$0xff] }
 0x290   :  { %3854 = vmatmul.msk.bf16.vlgmr.msra.gmra.mxu0 %vm200_vm0, %v1086_v20  ;;  %v5539_v20 = vld [vmem:[%s7035_s3 + $0x58] sm:$0xff] }
 0x293   :  { %v5455_v28 = vpop.f32.mrf.mxu2 }
 0x294   :  { %v1070_v21 = vpop.f32.mrf.mxu3  ;;  %v1088_v30 = vpack.c.bf16 %v5455_v28, %v5452_v25 }
 0x295   :  { %v971_v22 = vpop.f32.mrf.mxu1  ;;  %v1173_v29 = vpack.c.bf16 %v1070_v21, %v1068_v18  ;;  %v5544_v21 = vld [vmem:[%s7035_s3 + $0x70] sm:$0xff] }
 0x296   :  { %v1080_v3 = vmul.f32 %v971_v22, %v746_v55 }
 0x29b   :  { %v1022_v31 = vpop.f32.mrf.mxu2 }
 0x29c   :  { %v1073_v24 = vpop.f32.mrf.mxu3 }
 0x29d   :  { %v973_v4 = vpop.f32.mrf.mxu1 }
 0x29e   :  { %v1087_v14 = vpack.c.bf16 %v973_v4, %v971_v22  ;;  %v1081_v17 = vmul.f32 %v973_v4, %v747_v8  ;;  %v5549_v22 = vld [vmem:[%s7035_s3 + $0x78] sm:$0xff] }
 0x2a0   :  { %3855 = vmatmul.msk.bf16.gmra.mxu0 %vm200_vm0, %v1087_v14 }
 0x2a3   :  { %v1024_v32 = vpop.f32.mrf.mxu2 }
 0x2a4   :  { %v1075_v26 = vpop.f32.mrf.mxu3  ;;  %v1089_v33 = vpack.c.bf16 %v1024_v32, %v1022_v31 }
 0x2a5   :  { %v1174_v27 = vpack.c.bf16 %v1075_v26, %v1073_v24 }
 0x2a7   :  { %1557 = vmatpush.bf16.msrb.mxu2 %v1174_v27 }
 0x2ab   :  { %1558 = vmatpush.bf16.msrb.mxu2 %v1173_v29 }
 0x2b0   :  { %3856 = vmatmul.msk.bf16.gmra.mxu0 %vm200_vm0, %v1088_v30 }
 0x2c0   :  { %3857 = vmatmul.msk.bf16.gmra.mxu0 %vm200_vm0, %v1089_v33 }
 0x30d   :  { %v1135_v36 = vpop.f32.mrf.mxu0 }
 0x30e   :  { %v1155_v38 = vmul.f32 %v1135_v36, %v752_v35  ;;  %v758_v36 = vld [vmem:[%s7034_s11 + $0x30] sm:$0xff] }
 0x310   :  { %v5467_v40 = vadd.f32 %v1155_v38, %v1078_v37  ;;  %v750_v37 = vld [vmem:[%s7033_s30 + $0x30] sm:$0xff]  ;;  %v751_v38 = vld [vmem:[%s7033_s30 + $0x38] sm:$0xff] }
 0x311   :  { %v1085_v55 = vmul.f32 %v1024_v32, %v751_v38 }
 0x312   :  { %v5499_v51 = vmul.f32 %v5467_v40, %v5478_v48  ;;  %v5507_v53 = vmul.f32 %v5467_v40, %v5488_v50 }
 0x315   :  { %v1137_v45 = vpop.f32.mrf.mxu0 }
 0x316   :  { %v1156_v47 = vmul.f32 %v1137_v45, %v753_v42  ;;  %v757_v45 = vld [vmem:[%s7034_s11 + $0x28] sm:$0xff] }
 0x318   :  { %v5495_v15 = vadd.f32 %v1156_v47, %v1079_v46  ;;  %v1084_v47 = vmul.f32 %v1022_v31, %v750_v37  ;;  %v5619_v37 = vld [vmem:[%s7035_s3 + $0x18] sm:$0xff] }
 0x31a   :  { %v5503_v52 = vmul.f32 %v5495_v15, %v5483_v49  ;;  %v5511_v54 = vmul.f32 %v5495_v15, %v5493_v6 }
 0x31c   :  { %v1195_v58 = vpack.c.bf16 %v5503_v52, %v5499_v51  ;;  %v1197_v60 = vpack.c.bf16 %v5511_v54, %v5507_v53  ;;  %v5679_v53 = vld [vmem:[%s7036_s6 + $0x8] sm:$0xff] }
 0x31d   :  { %v1140_v0 = vpop.f32.mrf.mxu0 }
 0x31e   :  { %v1157_v5 = vmul.f32 %v1140_v0, %v754_v57  ;;  %v749_v0 = vld [vmem:[%s7033_s30 + $0x28] sm:$0xff] }
 0x320   :  { %v5523_v7 = vadd.f32 %v1157_v5, %v1080_v3  ;;  %v756_v3 = vld [vmem:[%s7034_s11 + $0x20] sm:$0xff] }
 0x322   :  { %v5553_v4 = vmul.f32 %v5523_v7, %v5534_v19  ;;  %v5560_v26 = vmul.f32 %v5523_v7, %v5544_v21 }
 0x325   :  { %v1142_v11 = vpop.f32.mrf.mxu0 }
 0x326   :  { %v1158_v18 = vmul.f32 %v1142_v11, %v755_v9  ;;  %v748_v11 = vld [vmem:[%s7033_s30 + $0x20] sm:$0xff] }
 0x328   :  { %v1166_v24 = vadd.f32 %v1158_v18, %v1081_v17  ;;  %v1083_v17 = vmul.f32 %v5455_v28, %v749_v0  ;;  %v1082_v18 = vmul.f32 %v5452_v25, %v748_v11  ;;  %v5605_v28 = vld [vmem:[%s7035_s3] sm:$0xff] }
 0x32a   :  { %v5556_v14 = vmul.f32 %v1166_v24, %v5539_v20  ;;  %v5563_v27 = vmul.f32 %v1166_v24, %v5549_v22  ;;  %v1178_v38 = vmul.f32 %v1166_v24, %v5619_v37 }
 0x32c   :  { %v1196_v29 = vpack.c.bf16 %v5556_v14, %v5553_v4  ;;  %v1198_v30 = vpack.c.bf16 %v5563_v27, %v5560_v26 }
 0x32d   :  { %v1145_v33 = vpop.f32.mrf.mxu0 }
 0x32e   :  { %v1159_v31 = vmul.f32 %v1145_v33, %v756_v3  ;;  %v1175_v33 = vmul.f32 %v5467_v40, %v5605_v28  ;;  %v5686_v3 = vld [vmem:[%s7036_s6 + $0x10] sm:$0xff] }
 0x330   :  { %v1167_v26 = vadd.f32 %v1159_v31, %v1082_v18 }
 0x335   :  { %v1147_v34 = vpop.f32.mrf.mxu0 }
 0x336   :  { %v1160_v5 = vmul.f32 %v1147_v34, %v757_v45  ;;  %v5599_v34 = vld [vmem:[%s7035_s3 + $0x8] sm:$0xff] }
 0x337   :  { %v1176_v25 = vmul.f32 %v5495_v15, %v5599_v34 }
 0x338   :  { %v1168_v4 = vadd.f32 %v1160_v5, %v1083_v17  ;;  %v5693_v17 = vld [vmem:[%s7036_s6 + $0x18] sm:$0xff] }
 0x33a   :  { %v1171_v27 = vpack.c.bf16 %v1168_v4, %v1167_v26 }
 0x33d   :  { %v1150_v35 = vpop.f32.mrf.mxu0 }
 0x33e   :  { %v1161_v42 = vmul.f32 %v1150_v35, %v758_v36  ;;  %v1224_v35 = vsel %vm200_vm0, %v1171_v27, 0  ;;  %v1191_v36 = vpack.c.bf16 %v1176_v25, %v1175_v33  ;;  %v5713_v33 = vld [vmem:[%s7036_s6 + $0x28] sm:$0xff] }
 0x340   :  { %v1169_v8 = vadd.f32 %v1161_v42, %v1084_v47  ;;  %v5648_v47 = vld [vmem:[%s7035_s3 + $0x38] sm:$0xff] }
 0x345   :  { %v1152_v46 = vpop.f32.mrf.mxu0 }
 0x346   :  { %v1162_v57 = vmul.f32 %v1152_v46, %v759_v41 }
 0x348   :  { %v1170_v9 = vadd.f32 %v1162_v57, %v1085_v55  ;;  %v5653_v55 = vld [vmem:[%s7035_s3 + $0x30] sm:$0xff]  ;;  %v1182_v57 = vmul.f32 %v1166_v24, %v5648_v47 }
 0x34a   :  { %v1172_v32 = vpack.c.bf16 %v1170_v9, %v1169_v8 }
 0x34c   :  { %v1227_v14 = vsel %vm200_vm0, %v1172_v32, 0 }
 0x34d   :  { %1235 = vmatpush.bf16.xpose.msra.mxu1 %v1227_v14  ;;  %v5703_v14 = vld [vmem:[%s7036_s6 + $0x20] sm:$0xff] }
 0x355   :  { %1236 = vmatpush.bf16.xpose.msra.mxu1 %v1224_v35 }
 0x35c   :  { %3858 = vmatmul.msk.bf16.vlgmr.msra.gmra.mxu1 %vm200_vm0, %v1191_v36 }
 0x35d   :  { %2387 = vmatpush.bf16.msrb.mxu1 %v5419_v56  ;;  %v5624_v56 = vld [vmem:[%s7035_s3 + $0x10] sm:$0xff] }
 0x361   :  { %2388 = vmatpush.bf16.msrb.mxu1 %v5436_v12  ;;  %v1177_v12 = vmul.f32 %v5523_v7, %v5624_v56 }
 0x363   :  { %v1192_v41 = vpack.c.bf16 %v1178_v38, %v1177_v12 }
 0x365   :  { %2389 = vmatpush.bf16.msrb.mxu1 %v5442_v13  ;;  %v5633_v13 = vld [vmem:[%s7035_s3 + $0x28] sm:$0xff] }
 0x366   :  { %v1180_v42 = vmul.f32 %v5495_v15, %v5633_v13  ;;  %v1181_v15 = vmul.f32 %v5523_v7, %v5653_v55  ;;  %v5672_v7 = vld [vmem:[%s7036_s6] sm:$0xff] }
 0x368   :  { %v1194_v0 = vpack.c.bf16 %v1182_v57, %v1181_v15 }
 0x369   :  { %2390 = vmatpush.bf16.msrb.mxu1 %v5448_v16  ;;  %v5638_v16 = vld [vmem:[%s7035_s3 + $0x20] sm:$0xff] }
 0x36a   :  { %v1179_v45 = vmul.f32 %v5467_v40, %v5638_v16 }
 0x36c   :  { %3859 = vmatmul.msk.bf16.gmra.mxu1 %vm200_vm0, %v1192_v41  ;;  %v1193_v46 = vpack.c.bf16 %v1180_v42, %v1179_v45  ;;  %v5723_v42 = vld [vmem:[%s7036_s6 + $0x30] sm:$0xff] }
 0x37c   :  { %3860 = vmatmul.msk.bf16.gmra.mxu1 %vm200_vm0, %v1193_v46 }
 0x38c   :  { %3861 = vmatmul.msk.bf16.gmra.mxu1 %vm200_vm0, %v1194_v0  ;;  %v5733_v0 = vld [vmem:[%s7036_s6 + $0x38] sm:$0xff] }
 0x39c   :  { %3862 = vmatmul.msk.bf16.gmra.mxu1 %vm200_vm0, %v1195_v58 }
 0x3ac   :  { %3863 = vmatmul.msk.bf16.gmra.mxu1 %vm200_vm0, %v1196_v29 }
 0x3bc   :  { %3864 = vmatmul.msk.bf16.gmra.mxu1 %vm200_vm0, %v1197_v60 }
 0x3cc   :  { %3865 = vmatmul.msk.bf16.gmra.mxu1 %vm200_vm0, %v1198_v30 }
 0x3d9   :  { %v1238_v40 = vpop.f32.mrf.mxu1 }
 0x3da   :  { %v1278_v24 = vmul.f32 0.25, %v1238_v40 }
 0x3dc   :  { %v1294_v51 = vmul.f32 %v1278_v24, %v5672_v7 }
 0x3de   :  { %v1311_v52 = vsel %vm1310_vm7, %v1294_v51, -inf }
 0x3df   :  { %1312 = vmax.xlane.f32.xlu2 %v1311_v52 }
 0x3e1   :  { %v1240_v58 = vpop.f32.mrf.mxu1 }
 0x3e2   :  { %v1279_v54 = vmul.f32 0.25, %v1240_v58 }
 0x3e4   :  { %v1295_v60 = vmul.f32 %v1279_v54, %v5679_v53  ;;  %v5743_v54 = vld [vmem:[%s7036_s6 + $0x40] sm:$0xff] }
 0x3e6   :  { %v1314_v29 = vsel %vm1310_vm7, %v1295_v60, -inf }
 0x3e7   :  { %1315 = vmax.xlane.f32.xlu0 %v1314_v29 }
 0x3e9   :  { %v1243_v30 = vpop.f32.mrf.mxu1 }
 0x3ea   :  { %v1280_v5 = vmul.f32 0.25, %v1243_v30 }
 0x3ec   :  { %v1296_v8 = vmul.f32 %v1280_v5, %v5686_v3 }
 0x3ee   :  { %v1317_v9 = vsel %vm1310_vm7, %v1296_v8, -inf }
 0x3ef   :  { %1318 = vmax.xlane.f32.xlu1 %v1317_v9 }
 0x3f1   :  { %v1245_v11 = vpop.f32.mrf.mxu1 }
 0x3f2   :  { %v1281_v31 = vmul.f32 0.25, %v1245_v11 }
 0x3f4   :  { %v5696_v32 = vmul.f32 %v1281_v31, %v5693_v17 }
 0x3f6   :  { %v1320_v18 = vsel %vm1310_vm7, %v5696_v32, -inf }
 0x3f7   :  { %1321 = vmax.xlane.f32.xlu2 %v1320_v18 }
 0x3f9   :  { %v1248_v4 = vpop.f32.mrf.mxu1 }
 0x3fa   :  { %v1282_v26 = vmul.f32 0.25, %v1248_v4 }
 0x3fc   :  { %v5706_v27 = vmul.f32 %v1282_v26, %v5703_v14 }
 0x3fe   :  { %v1323_v35 = vsel %vm1310_vm7, %v5706_v27, -inf }
 0x3ff   :  { %1324 = vmax.xlane.f32.xlu0 %v1323_v35 }
 0x401   :  { %v1250_v25 = vpop.f32.mrf.mxu1 }
 0x402   :  { %v1283_v36 = vmul.f32 0.25, %v1250_v25 }
 0x404   :  { %v5716_v38 = vmul.f32 %v1283_v36, %v5713_v33 }
 0x406   :  { %v1326_v12 = vsel %vm1310_vm7, %v5716_v38, -inf }
 0x407   :  { %1327 = vmax.xlane.f32.xlu1 %v1326_v12 }
 0x409   :  { %v1253_v41 = vpop.f32.mrf.mxu1 }
 0x40a   :  { %v1284_v45 = vmul.f32 0.25, %v1253_v41 }
 0x40c   :  { %v5726_v46 = vmul.f32 %v1284_v45, %v5723_v42 }
 0x40e   :  { %v1329_v57 = vsel %vm1310_vm7, %v5726_v46, -inf }
 0x40f   :  { %1330 = vmax.xlane.f32.xlu2 %v1329_v57 }
 0x411   :  { %v1255_v15 = vpop.f32.mrf.mxu1 }
 0x412   :  { %v1285_v40 = vmul.f32 0.25, %v1255_v15 }
 0x414   :  { %v5736_v24 = vmul.f32 %v1285_v40, %v5733_v0 }
 0x416   :  { %v1332_v52 = vsel %vm1310_vm7, %v5736_v24, -inf }
 0x417   :  { %1333 = vmax.xlane.f32.xlu0 %v1332_v52 }
 0x419   :  { %v1258_v58 = vpop.f32.mrf.mxu1 }
 0x41a   :  { %v1286_v29 = vmul.f32 0.25, %v1258_v58 }
 0x41c   :  { %v5746_v30 = vmul.f32 %v1286_v29, %v5743_v54 }
 0x41e   :  { %v1335_v5 = vsel %vm1310_vm7, %v5746_v30, -inf }
 0x41f   :  { %1336 = vmax.xlane.f32.xlu0 %v1335_v5 }
 0x421   :  { %v1260_v9 = vpop.f32.mrf.mxu1 }
 0x422   :  { %v1287_v41 = vmul.f32 0.25, %v1260_v9 }
 0x429   :  { %v1263_v26 = vpop.f32.mrf.mxu1 }
 0x42a   :  { %v1288_v29 = vmul.f32 0.25, %v1263_v26 }
 0x431   :  { %v1265_v52 = vpop.f32.mrf.mxu1 }
 0x452   :  { %v1313_v11 = vpop.xlane.xlu2 %1312 }
 0x453   :  { %v1359_v31 = vsub.f32 %v1294_v51, %v1313_v11  ;;  %v5758_v51 = vld [vmem:[%s7036_s6 + $0x48] sm:$0xff] }
 0x455   :  { %v1375_v18 = vmul.f32 1.442695, %v1359_v31 }
 0x457   :  { %4413 = vpow2.f32 %v1375_v18 }
 0x45a   :  { %v1316_v4 = vpop.xlane.xlu0 %1315 }
 0x45b   :  { %v1360_v35 = vsub.f32 %v1295_v60, %v1316_v4  ;;  %v5761_v60 = vmul.f32 %v1287_v41, %v5758_v51 }
 0x45d   :  { %v4414_v25 = vpop.eup %4413  ;;  %v1377_v36 = vmul.f32 1.442695, %v1360_v35  ;;  %v1338_v9 = vsel %vm1310_vm7, %v5761_v60, -inf  ;;  %v1268_v35 = vpop.f32.mrf.mxu1 }
 0x45e   :  { %v5751_v12 = vmul.f32 %v4414_v25, %v5672_v7  ;;  %v1289_v25 = vmul.f32 0.25, %v1265_v52 }
 0x45f   :  { %4415 = vpow2.f32 %v1377_v36 }
 0x460   :  { %v1423_v45 = vsel %vm1310_vm7, %v5751_v12, 0.0 }
 0x461   :  { %1424 = vadd.xlane.f32.xlu1 %v1423_v45 }
 0x462   :  { %v1319_v57 = vpop.xlane.xlu1 %1318 }
 0x463   :  { %v1361_v15 = vsub.f32 %v1296_v8, %v1319_v57  ;;  %v5773_v8 = vld [vmem:[%s7036_s6 + $0x50] sm:$0xff] }
 0x465   :  { %v4416_v40 = vpop.eup %4415  ;;  %v1379_v7 = vmul.f32 1.442695, %v1361_v15 }
 0x466   :  { %v5764_v58 = vmul.f32 %v4416_v40, %v5679_v53  ;;  %v5777_v53 = vmul.f32 %v1288_v29, %v5773_v8 }
 0x467   :  { %4417 = vpow2.f32 %v1379_v7  ;;  %v1290_v7 = vmul.f32 0.25, %v1268_v35 }
 0x468   :  { %v1426_v5 = vsel %vm1310_vm7, %v5764_v58, 0.0  ;;  %v1341_v41 = vsel %vm1310_vm7, %v5777_v53, -inf }
 0x469   :  { %1427 = vadd.xlane.f32.xlu2 %v1426_v5  ;;  %1339 = vmax.xlane.f32.xlu1 %v1338_v9  ;;  %v1270_v9 = vpop.f32.mrf.mxu1 }
 0x46a   :  { %v1322_v11 = vpop.xlane.xlu2 %1321 }
 0x46b   :  { %v1362_v31 = vsub.f32 %v5696_v32, %v1322_v11  ;;  %v5789_v32 = vld [vmem:[%s7036_s6 + $0x58] sm:$0xff] }
 0x46c   :  { %v5793_v57 = vmul.f32 %v1289_v25, %v5789_v32  ;;  %v1291_v25 = vmul.f32 0.25, %v1270_v9 }
 0x46d   :  { %v4418_v18 = vpop.eup %4417  ;;  %v1381_v4 = vmul.f32 1.442695, %v1362_v31 }
 0x46e   :  { %v5780_v26 = vmul.f32 %v4418_v18, %v5686_v3  ;;  %v1344_v5 = vsel %vm1310_vm7, %v5793_v57, -inf }
 0x46f   :  { %4419 = vpow2.f32 %v1381_v4 }
 0x470   :  { %v1429_v36 = vsel %vm1310_vm7, %v5780_v26, 0.0 }
 0x471   :  { %1430 = vadd.xlane.f32.xlu2 %v1429_v36  ;;  %1342 = vmax.xlane.f32.xlu1 %v1341_v41 }
 0x472   :  { %v1325_v45 = vpop.xlane.xlu0 %1324 }
 0x473   :  { %v1363_v3 = vsub.f32 %v5706_v27, %v1325_v45  ;;  %v5805_v27 = vld [vmem:[%s7036_s6 + $0x60] sm:$0xff] }
 0x474   :  { %v5809_v31 = vmul.f32 %v1290_v7, %v5805_v27 }
 0x475   :  { %v4420_v15 = vpop.eup %4419  ;;  %v1383_v40 = vmul.f32 1.442695, %v1363_v3  ;;  %v1273_v3 = vpop.f32.mrf.mxu1 }
 0x476   :  { %v5796_v52 = vmul.f32 %v4420_v15, %v5693_v17  ;;  %v1347_v41 = vsel %vm1310_vm7, %v5809_v31, -inf }
 0x477   :  { %4421 = vpow2.f32 %v1383_v40 }
 0x478   :  { %v1432_v29 = vsel %vm1310_vm7, %v5796_v52, 0.0 }
 0x479   :  { %1433 = vadd.xlane.f32.xlu0 %v1432_v29  ;;  %1345 = vmax.xlane.f32.xlu2 %v1344_v5  ;;  %v1292_v5 = vmul.f32 0.25, %v1273_v3 }
 0x47a   :  { %v1328_v11 = vpop.xlane.xlu1 %1327 }
 0x47b   :  { %v1364_v17 = vsub.f32 %v5716_v38, %v1328_v11  ;;  %v5821_v38 = vld [vmem:[%s7036_s6 + $0x68] sm:$0xff] }
 0x47c   :  { %v5825_v15 = vmul.f32 %v1291_v25, %v5821_v38 }
 0x47d   :  { %v4422_v18 = vpop.eup %4421  ;;  %v1385_v4 = vmul.f32 1.442695, %v1364_v17  ;;  %v1275_v25 = vpop.f32.mrf.mxu1 }
 0x47e   :  { %v5812_v35 = vmul.f32 %v4422_v18, %v5703_v14  ;;  %v1350_v11 = vsel %vm1310_vm7, %v5825_v15, -inf }
 0x47f   :  { %4423 = vpow2.f32 %v1385_v4 }
 0x480   :  { %v1435_v36 = vsel %vm1310_vm7, %v5812_v35, 0.0 }
 0x481   :  { %1436 = vadd.xlane.f32.xlu0 %v1435_v36  ;;  %1348 = vmax.xlane.f32.xlu2 %v1347_v41 }
 0x482   :  { %v1331_v45 = vpop.xlane.xlu2 %1330 }
 0x483   :  { %v1365_v14 = vsub.f32 %v5726_v46, %v1331_v45  ;;  %v5837_v46 = vld [vmem:[%s7036_s6 + $0x70] sm:$0xff]  ;;  %v1293_v45 = vmul.f32 0.25, %v1275_v25 }
 0x485   :  { %v4424_v40 = vpop.eup %4423  ;;  %v1387_v7 = vmul.f32 1.442695, %v1365_v14 }
 0x486   :  { %v5828_v29 = vmul.f32 %v4424_v40, %v5713_v33  ;;  %v5841_v33 = vmul.f32 %v1292_v5, %v5837_v46 }
 0x487   :  { %4425 = vpow2.f32 %v1387_v7 }
 0x488   :  { %v1438_v9 = vsel %vm1310_vm7, %v5828_v29, 0.0  ;;  %v1353_v14 = vsel %vm1310_vm7, %v5841_v33, -inf }
 0x489   :  { %1439 = vadd.xlane.f32.xlu1 %v1438_v9  ;;  %1351 = vmax.xlane.f32.xlu0 %v1350_v11 }
 0x48a   :  { %v1334_v17 = vpop.xlane.xlu0 %1333 }
 0x48b   :  { %v1366_v18 = vsub.f32 %v5736_v24, %v1334_v17  ;;  %v5853_v24 = vld [vmem:[%s7036_s6 + $0x78] sm:$0xff] }
 0x48d   :  { %v4426_v4 = vpop.eup %4425  ;;  %v1389_v36 = vmul.f32 1.442695, %v1366_v18 }
 0x48e   :  { %v5844_v41 = vmul.f32 %v4426_v4, %v5723_v42  ;;  %v5857_v42 = vmul.f32 %v1293_v45, %v5853_v24 }
 0x48f   :  { %4427 = vpow2.f32 %v1389_v36 }
 0x490   :  { %v1441_v3 = vsel %vm1310_vm7, %v5844_v41, 0.0  ;;  %v1356_v18 = vsel %vm1310_vm7, %v5857_v42, -inf }
 0x491   :  { %1442 = vadd.xlane.f32.xlu1 %v1441_v3  ;;  %1354 = vmax.xlane.f32.xlu0 %v1353_v14 }
 0x492   :  { %v1337_v40 = vpop.xlane.xlu0 %1336 }
 0x493   :  { %v1367_v7 = vsub.f32 %v5746_v30, %v1337_v40 }
 0x495   :  { %v4428_v5 = vpop.eup %4427  ;;  %v1391_v9 = vmul.f32 1.442695, %v1367_v7 }
 0x496   :  { %v5860_v11 = vmul.f32 %v4428_v5, %v5733_v0 }
 0x497   :  { %4429 = vpow2.f32 %v1391_v9 }
 0x498   :  { %v1444_v17 = vsel %vm1310_vm7, %v5860_v11, 0.0 }
 0x499   :  { %1445 = vadd.xlane.f32.xlu2 %v1444_v17  ;;  %1357 = vmax.xlane.f32.xlu1 %v1356_v18 }
 0x49d   :  { %v4430_v4 = vpop.eup %4429 }
 0x49e   :  { %v5867_v30 = vmul.f32 %v4430_v4, %v5743_v54 }
 0x4a0   :  { %v1447_v25 = vsel %vm1310_vm7, %v5867_v30, 0.0 }
 0x4a1   :  { %1448 = vadd.xlane.f32.xlu2 %v1447_v25 }
 0x4d4   :  { %v1425_v36 = vpop.xlane.xlu1 %1424 }
 0x4d5   :  { %v1471_v0 = vadd.f32 1e-30, %v1425_v36 }
 0x4d7   :  { %4431 = vrcp.f32 %v1471_v0 }
 0x4dc   :  { %v1428_v45 = vpop.xlane.xlu2 %1427  ;;  %v1340_v3 = vpop.xlane.xlu1 %1339 }
 0x4dd   :  { %v1472_v14 = vadd.f32 1e-30, %v1428_v45  ;;  %v1368_v40 = vsub.f32 %v5761_v60, %v1340_v3  ;;  %v4432_v5 = vpop.eup %4431 }
 0x4de   :  { %v1503_v4 = vmul.f32 %v4432_v5, %v5751_v12 }
 0x4df   :  { %4433 = vrcp.f32 %v1472_v14  ;;  %v1393_v7 = vmul.f32 1.442695, %v1368_v40 }
 0x4e1   :  { %4435 = vpow2.f32 %v1393_v7 }
 0x4e4   :  { %v1431_v9 = vpop.xlane.xlu2 %1430  ;;  %v1343_v17 = vpop.xlane.xlu1 %1342 }
 0x4e5   :  { %v4434_v54 = vpop.eup %4433  ;;  %v1369_v18 = vsub.f32 %v5777_v53, %v1343_v17  ;;  %v1473_v60 = vadd.f32 1e-30, %v1431_v9 }
 0x4e6   :  { %v1504_v25 = vmul.f32 %v4434_v54, %v5764_v58 }
 0x4e7   :  { %v4436_v36 = vpop.eup %4435  ;;  %v1395_v10 = vmul.f32 1.442695, %v1369_v18 }
 0x4e8   :  { %v1519_v59 = vpack.c.bf16 %v1504_v25, %v1503_v4  ;;  %v5876_v0 = vmul.f32 %v4436_v36, %v5758_v51 }
 0x4e9   :  { %4437 = vpow2.f32 %v1395_v10 }
 0x4ea   :  { %3866 = vmatmul.msk.bf16.vlgmr.msrb.gmra.mxu2 %vm1310_vm7, %v1519_v59  ;;  %v1450_v45 = vsel %vm1310_vm7, %v5876_v0, 0.0  ;;  %4439 = vrcp.f32 %v1473_v60 }
 0x4eb   :  { %1451 = vadd.xlane.f32.xlu0 %v1450_v45 }
 0x4ec   :  { %v1434_v3 = vpop.xlane.xlu0 %1433  ;;  %v1346_v53 = vpop.xlane.xlu2 %1345 }
 0x4ed   :  { %v1474_v12 = vadd.f32 1e-30, %v1434_v3  ;;  %v1370_v58 = vsub.f32 %v5793_v57, %v1346_v53 }
 0x4ef   :  { %v4438_v14 = vpop.eup %4437  ;;  %4441 = vrcp.f32 %v1474_v12  ;;  %v1397_v40 = vmul.f32 1.442695, %v1370_v58 }
 0x4f0   :  { %v5883_v51 = vmul.f32 %v4438_v14, %v5773_v8  ;;  %v4440_v10 = vpop.eup %4439 }
 0x4f1   :  { %4443 = vpow2.f32 %v1397_v40  ;;  %v1505_v54 = vmul.f32 %v4440_v10, %v5780_v26 }
 0x4f2   :  { %v1453_v59 = vsel %vm1310_vm7, %v5883_v51, 0.0 }
 0x4f3   :  { %1454 = vadd.xlane.f32.xlu1 %v1453_v59 }
 0x4f4   :  { %v1437_v7 = vpop.xlane.xlu0 %1436  ;;  %v1349_v5 = vpop.xlane.xlu2 %1348 }
 0x4f5   :  { %v4442_v9 = vpop.eup %4441  ;;  %v1371_v17 = vsub.f32 %v5809_v31, %v1349_v5  ;;  %v1475_v36 = vadd.f32 1e-30, %v1437_v7 }
 0x4f6   :  { %v1506_v57 = vmul.f32 %v4442_v9, %v5796_v52 }
 0x4f7   :  { %v4444_v18 = vpop.eup %4443  ;;  %v1399_v4 = vmul.f32 1.442695, %v1371_v17 }
 0x4f8   :  { %v1520_v25 = vpack.c.bf16 %v1506_v57, %v1505_v54  ;;  %v5891_v8 = vmul.f32 %v4444_v18, %v5789_v32 }
 0x4f9   :  { %4445 = vpow2.f32 %v1399_v4 }
 0x4fa   :  { %3867 = vmatmul.msk.bf16.gmra.mxu2 %vm1310_vm7, %v1520_v25  ;;  %v1456_v60 = vsel %vm1310_vm7, %v5891_v8, 0.0  ;;  %4447 = vrcp.f32 %v1475_v36 }
 0x4fb   :  { %1457 = vadd.xlane.f32.xlu2 %v1456_v60 }
 0x4fc   :  { %v1440_v45 = vpop.xlane.xlu1 %1439  ;;  %v1352_v31 = vpop.xlane.xlu0 %1351 }
 0x4fd   :  { %v1476_v26 = vadd.f32 1e-30, %v1440_v45  ;;  %v1372_v52 = vsub.f32 %v5825_v15, %v1352_v31 }
 0x4ff   :  { %v4446_v3 = vpop.eup %4445  ;;  %4449 = vrcp.f32 %v1476_v26  ;;  %v1401_v53 = vmul.f32 1.442695, %v1372_v52 }
 0x500   :  { %v5898_v32 = vmul.f32 %v4446_v3, %v5805_v27  ;;  %v4448_v58 = vpop.eup %4447 }
 0x501   :  { %4451 = vpow2.f32 %v1401_v53  ;;  %v1507_v7 = vmul.f32 %v4448_v58, %v5812_v35 }
 0x502   :  { %v1459_v12 = vsel %vm1310_vm7, %v5898_v32, 0.0 }
 0x503   :  { %1460 = vadd.xlane.f32.xlu0 %v1459_v12 }
 0x504   :  { %v1443_v14 = vpop.xlane.xlu1 %1442  ;;  %v1355_v40 = vpop.xlane.xlu0 %1354 }
 0x505   :  { %v4450_v59 = vpop.eup %4449  ;;  %v1373_v10 = vsub.f32 %v5841_v33, %v1355_v40  ;;  %v1477_v54 = vadd.f32 1e-30, %v1443_v14 }
 0x506   :  { %v1508_v15 = vmul.f32 %v4450_v59, %v5828_v29 }
 0x507   :  { %v4452_v5 = vpop.eup %4451  ;;  %v1403_v9 = vmul.f32 1.442695, %v1373_v10 }
 0x508   :  { %v1521_v17 = vpack.c.bf16 %v1508_v15, %v1507_v7  ;;  %v1420_v27 = vmul.f32 %v4452_v5, %v5821_v38 }
 0x509   :  { %4453 = vpow2.f32 %v1403_v9 }
 0x50a   :  { %3868 = vmatmul.msk.bf16.gmra.mxu2 %vm1310_vm7, %v1521_v17  ;;  %v1462_v57 = vsel %vm1310_vm7, %v1420_v27, 0.0  ;;  %4455 = vrcp.f32 %v1477_v54 }
 0x50b   :  { %1463 = vadd.xlane.f32.xlu1 %v1462_v57 }
 0x50c   :  { %v1446_v18 = vpop.xlane.xlu2 %1445  ;;  %v1358_v4 = vpop.xlane.xlu1 %1357 }
 0x50d   :  { %v1478_v33 = vadd.f32 1e-30, %v1446_v18  ;;  %v1374_v35 = vsub.f32 %v5857_v42, %v1358_v4 }
 0x50f   :  { %v4454_v25 = vpop.eup %4453  ;;  %4457 = vrcp.f32 %v1478_v33  ;;  %v1405_v29 = vmul.f32 1.442695, %v1374_v35 }
 0x510   :  { %v1421_v36 = vmul.f32 %v4454_v25, %v5837_v46  ;;  %v4456_v60 = vpop.eup %4455 }
 0x511   :  { %4459 = vpow2.f32 %v1405_v29  ;;  %v1509_v31 = vmul.f32 %v4456_v60, %v5844_v41 }
 0x512   :  { %v1465_v38 = vsel %vm1310_vm7, %v1421_v36, 0.0 }
 0x513   :  { %1466 = vadd.xlane.f32.xlu2 %v1465_v38 }
 0x514   :  { %v1449_v46 = vpop.xlane.xlu2 %1448 }
 0x515   :  { %v4458_v45 = vpop.eup %4457  ;;  %v1479_v12 = vadd.f32 1e-30, %v1449_v46 }
 0x516   :  { %v1510_v26 = vmul.f32 %v4458_v45, %v5860_v11 }
 0x517   :  { %v4460_v52 = vpop.eup %4459  ;;  %4461 = vrcp.f32 %v1479_v12 }
 0x518   :  { %v1522_v3 = vpack.c.bf16 %v1510_v26, %v1509_v31  ;;  %v1422_v53 = vmul.f32 %v4460_v52, %v5853_v24 }
 0x51a   :  { %3869 = vmatmul.msk.bf16.gmra.mxu2 %vm1310_vm7, %v1522_v3  ;;  %v1468_v42 = vsel %vm1310_vm7, %v1422_v53, 0.0 }
 0x51b   :  { %1469 = vadd.xlane.f32.xlu0 %v1468_v42 }
 0x51d   :  { %v4462_v40 = vpop.eup %4461 }
 0x51e   :  { %v1511_v11 = vmul.f32 %v4462_v40, %v5867_v30 }
 0x55e   :  { %v1452_v58 = vpop.xlane.xlu0 %1451 }
 0x55f   :  { %v1480_v14 = vadd.f32 1e-30, %v1452_v58 }
 0x561   :  { %4463 = vrcp.f32 %v1480_v14 }
 0x566   :  { %v1455_v41 = vpop.xlane.xlu1 %1454 }
 0x567   :  { %v4464_v59 = vpop.eup %4463  ;;  %v1481_v24 = vadd.f32 1e-30, %v1455_v41 }
 0x568   :  { %v1512_v10 = vmul.f32 %v4464_v59, %v5876_v0 }
 0x569   :  { %4465 = vrcp.f32 %v1481_v24 }
 0x56a   :  { %v1523_v7 = vpack.c.bf16 %v1512_v10, %v1511_v11 }
 0x56c   :  { %3870 = vmatmul.msk.bf16.gmra.mxu2 %vm1310_vm7, %v1523_v7 }
 0x56d   :  { %v1560_v12 = vpop.f32.mrf.mxu2 }
 0x56e   :  { %v1458_v15 = vpop.xlane.xlu2 %1457 }
 0x56f   :  { %v1482_v5 = vadd.f32 1e-30, %v1458_v15  ;;  %v4466_v9 = vpop.eup %4465 }
 0x570   :  { %v1513_v57 = vmul.f32 %v4466_v9, %v5883_v51 }
 0x571   :  { %4467 = vrcp.f32 %v1482_v5 }
 0x575   :  { %v1562_v58 = vpop.f32.mrf.mxu2 }
 0x576   :  { %v1461_v54 = vpop.xlane.xlu0 %1460 }
 0x577   :  { %v4468_v17 = vpop.eup %4467  ;;  %v1483_v33 = vadd.f32 1e-30, %v1461_v54 }
 0x578   :  { %v1514_v18 = vmul.f32 %v4468_v17, %v5891_v8 }
 0x579   :  { %4469 = vrcp.f32 %v1483_v33 }
 0x57a   :  { %v1524_v4 = vpack.c.bf16 %v1514_v18, %v1513_v57 }
 0x57c   :  { %3871 = vmatmul.msk.bf16.gmra.mxu2 %vm1310_vm7, %v1524_v4  ;;  %v1601_v4 = vmul.f32 %v1562_v58, %v5599_v34 }
 0x57e   :  { %v1464_v30 = vpop.xlane.xlu1 %1463 }
 0x57f   :  { %v1484_v0 = vadd.f32 1e-30, %v1464_v30  ;;  %v4470_v35 = vpop.eup %4469 }
 0x580   :  { %v1515_v29 = vmul.f32 %v4470_v35, %v5898_v32  ;;  %v1565_v32 = vpop.f32.mrf.mxu2 }
 0x581   :  { %4471 = vrcp.f32 %v1484_v0 }
 0x586   :  { %v1467_v60 = vpop.xlane.xlu2 %1466 }
 0x587   :  { %v4472_v25 = vpop.eup %4471  ;;  %v1485_v31 = vadd.f32 1e-30, %v1467_v60 }
 0x588   :  { %v1516_v38 = vmul.f32 %v4472_v25, %v1420_v27  ;;  %v1567_v27 = vpop.f32.mrf.mxu2 }
 0x589   :  { %4473 = vrcp.f32 %v1485_v31 }
 0x58a   :  { %v1525_v45 = vpack.c.bf16 %v1516_v38, %v1515_v29 }
 0x58c   :  { %3872 = vmatmul.msk.bf16.gmra.mxu2 %vm1310_vm7, %v1525_v45 }
 0x58e   :  { %v1470_v51 = vpop.xlane.xlu0 %1469 }
 0x58f   :  { %v1486_v8 = vadd.f32 1e-30, %v1470_v51  ;;  %v4474_v26 = vpop.eup %4473 }
 0x590   :  { %v1517_v3 = vmul.f32 %v4474_v26, %v1421_v36  ;;  %v1570_v14 = vpop.f32.mrf.mxu2  ;;  %v1600_v36 = vmul.f32 %v1560_v12, %v5605_v28 }
 0x591   :  { %4475 = vrcp.f32 %v1486_v8  ;;  %v1604_v15 = vmul.f32 %v1570_v14, %v5638_v16 }
 0x593   :  { %v1616_v5 = vadd.f32 %v1604_v15, %v1600_v36  ;;  %v3900_v36 = vld [vmem:[%s6992_s18 + $0x30] sm:$0xf] }
 0x597   :  { %v4476_v52 = vpop.eup %4475 }
 0x598   :  { %v1518_v42 = vmul.f32 %v4476_v52, %v1422_v53  ;;  %v1572_v40 = vpop.f32.mrf.mxu2 }
 0x599   :  { %v1605_v57 = vmul.f32 %v1572_v40, %v5633_v13  ;;  %v1602_v13 = vmul.f32 %v1565_v32, %v5624_v56 }
 0x59a   :  { %v1526_v46 = vpack.c.bf16 %v1518_v42, %v1517_v3 }
 0x59b   :  { %v1617_v28 = vadd.f32 %v1605_v57, %v1601_v4  ;;  %v3884_v4 = vld [vmem:[%s6992_s18 + $0x10] sm:$0xf] }
 0x59c   :  { %3873 = vmatmul.msk.bf16.gmra.mxu2 %vm1310_vm7, %v1526_v46 }
 0x5a0   :  { %v1575_v59 = vpop.f32.mrf.mxu2 }
 0x5a1   :  { %v1606_v35 = vmul.f32 %v1575_v59, %v5653_v55  ;;  %v1603_v55 = vmul.f32 %v1567_v27, %v5619_v37 }
 0x5a3   :  { %v1618_v34 = vadd.f32 %v1606_v35, %v1602_v13 }
 0x5a8   :  { %v1577_v41 = vpop.f32.mrf.mxu2 }
 0x5a9   :  { %v1607_v45 = vmul.f32 %v1577_v41, %v5648_v47 }
 0x5ab   :  { %v1619_v56 = vadd.f32 %v1607_v45, %v1603_v55 }
 0x5ef   :  { %v1580_v11 = vpop.f32.mrf.mxu2 }
 0x5f0   :  { %v1608_v53 = vmul.f32 %v1580_v11, %v5478_v48 }
 0x5f2   :  { %v1620_v17 = vadd.f32 %v1616_v5, %v1608_v53  ;;  %v4309_v53 = vld [vmem:[%s6992_s18 + $0x34] sm:$0xf0] }
 0x5f3   :  { %v3901_v5 = vor.u32 %v4309_v53, %v3900_v36 }
 0x5f5   :  { %1800 = vmatpush.bf16.msrb.mxu3 %v3901_v5 }
 0x5f7   :  { %v1582_v10 = vpop.f32.mrf.mxu2 }
 0x5f8   :  { %v1609_v33 = vmul.f32 %v1582_v10, %v5483_v49 }
 0x5fa   :  { %v1621_v48 = vadd.f32 %v1617_v28, %v1609_v33  ;;  %v4305_v33 = vld [vmem:[%s6992_s18 + $0x14] sm:$0xf0] }
 0x5fb   :  { %v3885_v28 = vor.u32 %v4305_v33, %v3884_v4  ;;  %v4304_v4 = vld [vmem:[%s6992_s18 + $0x14] sm:$0xf]  ;;  %v3886_v33 = vld [vmem:[%s6992_s18 + $0x18] sm:$0xf0] }
 0x5ff   :  { %v1585_v7 = vpop.f32.mrf.mxu2 }
 0x600   :  { %v1610_v25 = vmul.f32 %v1585_v7, %v5534_v19 }
 0x602   :  { %v1622_v38 = vadd.f32 %v1618_v34, %v1610_v25 }
 0x607   :  { %v1587_v24 = vpop.f32.mrf.mxu2 }
 0x608   :  { %v1611_v31 = vmul.f32 %v1587_v24, %v5539_v20 }
 0x60a   :  { %v1623_v8 = vadd.f32 %v1619_v56, %v1611_v31 }
 0x60f   :  { %v1590_v9 = vpop.f32.mrf.mxu2 }
 0x610   :  { %v1612_v54 = vmul.f32 %v1590_v9, %v5488_v50  ;;  %v3892_v9 = vld [vmem:[%s6992_s18 + $0x20] sm:$0xf] }
 0x612   :  { %v5930_v18 = vadd.f32 %v1620_v17, %v1612_v54  ;;  %v4307_v17 = vld [vmem:[%s6992_s18 + $0x24] sm:$0xf0] }
 0x613   :  { %v3893_v54 = vor.u32 %v4307_v17, %v3892_v9 }
 0x614   :  { %v1629_v16 = vsel %vm200_vm0, %v5930_v18, 0.0 }
 0x615   :  { %1630 = vadd.xlane.f32.xlu1 %v1629_v16  ;;  %1801 = vmatpush.bf16.msrb.mxu3 %v3893_v54 }
 0x617   :  { %v1592_v30 = vpop.f32.mrf.mxu2 }
 0x618   :  { %v1613_v0 = vmul.f32 %v1592_v30, %v5493_v6 }
 0x619   :  { %1802 = vmatpush.bf16.msrb.mxu3 %v3885_v28 }
 0x61a   :  { %v5938_v50 = vadd.f32 %v1621_v48, %v1613_v0  ;;  %v3876_v48 = vld [vmem:[%s6992_s18] sm:$0xf]  ;;  %v4303_v0 = vld [vmem:[%s6992_s18 + $0x4] sm:$0xf0] }
 0x61b   :  { %v3877_v35 = vor.u32 %v4303_v0, %v3876_v48  ;;  %v3889_v0 = vor.u32 %v4304_v4, %v3886_v33  ;;  %v4324_v4 = vld [vmem:[%s6994_s20 + $0x70] sm:$0xff] }
 0x61c   :  { %v1632_v49 = vsel %vm200_vm0, %v5938_v50, 0.0 }
 0x61d   :  { %1633 = vadd.xlane.f32.xlu2 %v1632_v49  ;;  %1803 = vmatpush.bf16.msrb.mxu3 %v3877_v35 }
 0x61f   :  { %v1595_v29 = vpop.f32.mrf.mxu2 }
 0x620   :  { %v1614_v60 = vmul.f32 %v1595_v29, %v5544_v21 }
 0x622   :  { %v5946_v6 = vadd.f32 %v1622_v38, %v1614_v60  ;;  %v6014_v38 = vld [vmem:[%s6997_s23] sm:$0xff] }
 0x623   :  { %v300_v60 = vperm.slane %v6014_v38, 3 }
 0x624   :  { %v1635_v19 = vsel %vm200_vm0, %v5946_v6, 0.0 }
 0x625   :  { %1636 = vadd.xlane.f32.xlu0 %v1635_v19  ;;  %v6018_v19 = vadd.f32 %v5377_v61, %v300_v60 }
 0x627   :  { %v1597_v51 = vpop.f32.mrf.mxu2 }
 0x628   :  { %v1615_v26 = vmul.f32 %v1597_v51, %v5549_v22 }
 0x62a   :  { %v5953_v52 = vadd.f32 %v1623_v8, %v1615_v26  ;;  %v299_v26 = vperm.slane %v6014_v38, 2 }
 0x62c   :  { %v1638_v21 = vsel %vm200_vm0, %v5953_v52, 0.0 }
 0x62d   :  { %1639 = vadd.xlane.f32.xlu1 %v1638_v21 }
 0x688   :  { %v1631_v47 = vpop.xlane.xlu1 %1630 }
 0x689   :  { %v1641_v37 = vmul.f32 %v1631_v47, %v4977_v1 }
 0x68b   :  { %v5959_v20 = vsub.f32 %v5930_v18, %v1641_v37 }
 0x68d   :  { %v1649_v3 = vmul.f32 %v5959_v20, %v5959_v20 }
 0x68f   :  { %v1653_v42 = vsel %vm200_vm0, %v1649_v3, 0.0  ;;  %v723_v3 = vperm.slane %v6018_v19, 0 }
 0x690   :  { %1654 = vadd.xlane.f32.xlu2 %v1653_v42  ;;  %v1634_v46 = vpop.xlane.xlu2 %1633  ;;  %v6026_v42 = vld [vmem:[%s6991_s17] ss:$0 sm:$0xff] }
 0x691   :  { %v1642_v22 = vmul.f32 %v1634_v46, %v4977_v1 }
 0x693   :  { %v5966_v12 = vsub.f32 %v5938_v50, %v1642_v22  ;;  %v6029_v22 = vadd.f32 %v5409_v43, %v299_v26  ;;  %v4306_v43 = vld [vmem:[%s6992_s18 + $0x24] sm:$0xf] }
 0x695   :  { %v1650_v58 = vmul.f32 %v5966_v12, %v5966_v12  ;;  %v722_v53 = vperm.slane %v6029_v22, 0 }
 0x697   :  { %v1656_v32 = vsel %vm200_vm0, %v1650_v58, 0.0 }
 0x698   :  { %1657 = vadd.xlane.f32.xlu0 %v1656_v32  ;;  %v1637_v27 = vpop.xlane.xlu0 %1636 }
 0x699   :  { %v1643_v14 = vmul.f32 %v1637_v27, %v4977_v1 }
 0x69b   :  { %v5973_v40 = vsub.f32 %v5946_v6, %v1643_v14  ;;  %v4308_v14 = vld [vmem:[%s6992_s18 + $0x34] sm:$0xf] }
 0x69d   :  { %v1651_v59 = vmul.f32 %v5973_v40, %v5973_v40 }
 0x69f   :  { %v1659_v41 = vsel %vm200_vm0, %v1651_v59, 0.0  ;;  %v3902_v59 = vld [vmem:[%s6992_s18 + $0x38] sm:$0xf0] }
 0x6a0   :  { %1660 = vadd.xlane.f32.xlu1 %v1659_v41  ;;  %v1640_v11 = vpop.xlane.xlu1 %1639  ;;  %v1724_v41 = vadd.f32 1.0, %v723_v3 }
 0x6a1   :  { %v1644_v10 = vmul.f32 %v1640_v11, %v4977_v1 }
 0x6a3   :  { %v5980_v7 = vsub.f32 %v5953_v52, %v1644_v10 }
 0x6a5   :  { %v1652_v24 = vmul.f32 %v5980_v7, %v5980_v7 }
 0x6a7   :  { %v1662_v15 = vsel %vm200_vm0, %v1652_v24, 0.0  ;;  %v3905_v24 = vor.u32 %v4308_v14, %v3902_v59 }
 0x6a8   :  { %1663 = vadd.xlane.f32.xlu2 %v1662_v15 }
 0x6a9   :  { %1819 = vmatpush.bf16.msra.mxu3 %v3905_v24  ;;  %v4313_v24 = vld [vmem:[%s6994_s20 + $0x18] sm:$0xff] }
 0x703   :  { %v1655_v57 = vpop.xlane.xlu2 %1654 }
 0x704   :  { %v1665_v16 = vmul.f32 %v1655_v57, %v4977_v1 }
 0x706   :  { %v1669_v30 = vadd.f32 1e-05, %v1665_v16 }
 0x708   :  { %4477 = vrsqrt.f32 %v1669_v30  ;;  %vm1679_vm9 = vweird.f32 %v1669_v30 }
 0x70b   :  { %v1658_v13 = vpop.xlane.xlu0 %1657 }
 0x70c   :  { %v1666_v25 = vmul.f32 %v1658_v13, %v4977_v1  ;;  %v4302_v13 = vld [vmem:[%s6992_s18 + $0x4] sm:$0xf] }
 0x70e   :  { %v4478_v49 = vpop.eup %4477  ;;  %v1670_v34 = vadd.f32 1e-05, %v1666_v25  ;;  %v3878_v25 = vld [vmem:[%s6992_s18 + $0x8] sm:$0xf0] }
 0x70f   :  { %v1674_v29 = vmul.f32 %v4478_v49, %v1669_v30  ;;  %vm1680_vm8 = vweird.f32 %v4478_v49 }
 0x710   :  { %4479 = vrsqrt.f32 %v1670_v34  ;;  %vm1681_vm10 = vmor %vm1679_vm9, %vm1680_vm8  ;;  %vm1689_vm12 = vweird.f32 %v1670_v34 }
 0x711   :  { %v1675_v45 = vmul.f32 %v4478_v49, %v1674_v29 }
 0x713   :  { %v1676_v55 = vmul.f32 0.5, %v1675_v45  ;;  %v1661_v31 = vpop.xlane.xlu1 %1660  ;;  %v3881_v45 = vor.u32 %v4302_v13, %v3878_v25  ;;  %v4322_v25 = vld [vmem:[%s6994_s20 + $0x60] sm:$0xff] }
 0x714   :  { %v1667_v56 = vmul.f32 %v1661_v31, %v4977_v1  ;;  %v735_v31 = vperm.slane %v6018_v19, 1 }
 0x715   :  { %v1677_v51 = vsub.f32 1.5, %v1676_v55 }
 0x716   :  { %v4480_v8 = vpop.eup %4479  ;;  %v1671_v21 = vadd.f32 1e-05, %v1667_v56  ;;  %v1725_v3 = vadd.f32 1.0, %v735_v31  ;;  %v4320_v31 = vld [vmem:[%s6994_s20 + $0x50] sm:$0xff] }
 0x717   :  { %v1678_v47 = vmul.f32 %v4478_v49, %v1677_v51  ;;  %v1684_v37 = vmul.f32 %v4480_v8, %v1670_v34  ;;  %vm1690_vm11 = vweird.f32 %v4480_v8 }
 0x718   :  { %4481 = vrsqrt.f32 %v1671_v21  ;;  %vm1691_vm13 = vmor %vm1689_vm12, %vm1690_vm11  ;;  %vm1699_vm15 = vweird.f32 %v1671_v21 }
 0x719   :  { %v1682_v61 = vsel %vm1681_vm10, %v4478_v49, %v1678_v47  ;;  %v1685_v46 = vmul.f32 %v4480_v8, %v1684_v37 }
 0x71a   :  { %v1713_v58 = vmul.f32 %v1682_v61, %v5959_v20  ;;  %v3894_v20 = vld [vmem:[%s6992_s18 + $0x28] sm:$0xf0] }
 0x71b   :  { %v1686_v32 = vmul.f32 0.5, %v1685_v46  ;;  %v1664_v27 = vpop.xlane.xlu2 %1663  ;;  %v3897_v17 = vor.u32 %v4306_v43, %v3894_v20  ;;  %v4312_v43 = vld [vmem:[%s6994_s20 + $0x10] sm:$0xff]  ;;  %v4311_v20 = vld [vmem:[%s6994_s20 + $0x8] sm:$0xff] }
 0x71c   :  { %v1720_v11 = vmul.f32 %v6026_v42, %v1713_v58  ;;  %v1668_v10 = vmul.f32 %v1664_v27, %v4977_v1 }
 0x71d   :  { %v1687_v15 = vsub.f32 1.5, %v1686_v32  ;;  %1820 = vmatpush.bf16.msra.mxu3 %v3897_v17  ;;  %v4325_v17 = vld [vmem:[%s6994_s20 + $0x78] sm:$0xff] }
 0x71e   :  { %v4482_v36 = vpop.eup %4481  ;;  %v1726_v5 = vmul.f32 %v1724_v41, %v1720_v11  ;;  %v1672_v9 = vadd.f32 1e-05, %v1668_v10  ;;  %v4314_v10 = vld [vmem:[%s6994_s20 + $0x20] sm:$0xff] }
 0x71f   :  { %v1688_v54 = vmul.f32 %v4480_v8, %v1687_v15  ;;  %v1694_v57 = vmul.f32 %v4482_v36, %v1671_v21  ;;  %vm1700_vm14 = vweird.f32 %v4482_v36  ;;  %v734_v21 = vperm.slane %v6029_v22, 1  ;;  %v4317_v22 = vld [vmem:[%s6994_s20 + $0x38] sm:$0xff]  ;;  %v1744_v15 = vld [vmem:[%s6993_s19] sm:$0x3] }
 0x720   :  { %4483 = vrsqrt.f32 %v1672_v9  ;;  %v1730_v16 = vadd.f32 %v1726_v5, %v722_v53  ;;  %vm1701_vm1 = vmor %vm1699_vm15, %vm1700_vm14  ;;  %vm1709_vm3 = vweird.f32 %v1672_v9  ;;  %2042 = vmatpush.bf16.msrb.mxu0 %v4317_v22 }
 0x721   :  { %v1692_v28 = vsel %vm1691_vm13, %v4480_v8, %v1688_v54  ;;  %v1695_v30 = vmul.f32 %v4482_v36, %v1694_v57  ;;  %1821 = vmatpush.bf16.msra.mxu3 %v3889_v0 }
 0x722   :  { %v1714_v48 = vmul.f32 %v1692_v28, %v5966_v12 }
 0x723   :  { %v1696_v35 = vmul.f32 0.5, %v1695_v30 }
 0x724   :  { %v1721_v49 = vmul.f32 %v6026_v42, %v1714_v48  ;;  %v4323_v48 = vld [vmem:[%s6994_s20 + $0x68] sm:$0xff] }
 0x725   :  { %v1697_v34 = vsub.f32 1.5, %v1696_v35  ;;  %1822 = vmatpush.bf16.msra.mxu3 %v3881_v45  ;;  %v4321_v45 = vld [vmem:[%s6994_s20 + $0x58] sm:$0xff] }
 0x726   :  { %v4484_v29 = vpop.eup %4483  ;;  %v1727_v60 = vmul.f32 %v1724_v41, %v1721_v49 }
 0x727   :  { %v1698_v12 = vmul.f32 %v4482_v36, %v1697_v34  ;;  %v1704_v55 = vmul.f32 %v4484_v29, %v1672_v9  ;;  %vm1710_vm2 = vweird.f32 %v4484_v29 }
 0x728   :  { %v1731_v56 = vadd.f32 %v1727_v60, %v722_v53  ;;  %vm1711_vm4 = vmor %vm1709_vm3, %vm1710_vm2  ;;  %v1746_v53 = vperm.slane %v1744_v15, 0 }
 0x729   :  { %v1702_v51 = vsel %vm1701_vm1, %v4482_v36, %v1698_v12  ;;  %v1705_v8 = vmul.f32 %v4484_v29, %v1704_v55  ;;  %v4310_v36 = vld [vmem:[%s6994_s20] sm:$0xff] }
 0x72a   :  { %v1715_v26 = vmul.f32 %v1702_v51, %v5973_v40  ;;  %v1734_v47 = vpack.c.bf16 %v1731_v56, %v1730_v16 }
 0x72b   :  { %v1706_v37 = vmul.f32 0.5, %v1705_v8 }
 0x72c   :  { %3906 = vmatmul.msk.bf16.vlgmr.msrb.gmra.mxu3 %vm200_vm0, %v1734_v47  ;;  %v1722_v61 = vmul.f32 %v6026_v42, %v1715_v26 }
 0x72d   :  { %v1707_v46 = vsub.f32 1.5, %v1706_v37  ;;  %2061 = vmatpush.bf16.msrb.mxu3 %v4325_v17 }
 0x72e   :  { %v1728_v58 = vmul.f32 %v1725_v3, %v1722_v61 }
 0x72f   :  { %v1708_v19 = vmul.f32 %v4484_v29, %v1707_v46 }
 0x730   :  { %v1732_v32 = vadd.f32 %v1728_v58, %v734_v21 }
 0x731   :  { %v1712_v27 = vsel %vm1711_vm4, %v4484_v29, %v1708_v19  ;;  %2062 = vmatpush.bf16.msrb.mxu3 %v4324_v4 }
 0x732   :  { %v1716_v40 = vmul.f32 %v1712_v27, %v5980_v7  ;;  %v4316_v7 = vld [vmem:[%s6994_s20 + $0x30] sm:$0xff]  ;;  %v4318_v27 = vld [vmem:[%s6994_s20 + $0x40] sm:$0xff] }
 0x733   :  { %2043 = vmatpush.bf16.msrb.mxu0 %v4316_v7 }
 0x734   :  { %v1723_v14 = vmul.f32 %v6026_v42, %v1716_v40  ;;  %v4315_v42 = vld [vmem:[%s6994_s20 + $0x28] sm:$0xff]  ;;  %v1747_v40 = vperm.slane %v1744_v15, 1 }
 0x735   :  { %2063 = vmatpush.bf16.msrb.mxu3 %v4323_v48 }
 0x736   :  { %v1729_v59 = vmul.f32 %v1725_v3, %v1723_v14  ;;  %v4319_v3 = vld [vmem:[%s6994_s20 + $0x48] sm:$0xff] }
 0x737   :  { %2044 = vmatpush.bf16.msrb.mxu0 %v4315_v42 }
 0x738   :  { %v1733_v41 = vadd.f32 %v1729_v59, %v734_v21 }
 0x739   :  { %2064 = vmatpush.bf16.msrb.mxu3 %v4322_v25 }
 0x73a   :  { %v1735_v11 = vpack.c.bf16 %v1733_v41, %v1732_v32 }
 0x73b   :  { %2045 = vmatpush.bf16.msrb.mxu0 %v4314_v10 }
 0x73c   :  { %3907 = vmatmul.msk.bf16.gmra.mxu3 %vm200_vm0, %v1735_v11 }
 0x73d   :  { %2065 = vmatpush.bf16.msrb.mxu3 %v4321_v45 }
 0x73f   :  { %2046 = vmatpush.bf16.msrb.mxu0 %v4313_v24 }
 0x741   :  { %2066 = vmatpush.bf16.msrb.mxu3 %v4320_v31 }
 0x743   :  { %2047 = vmatpush.bf16.msrb.mxu0 %v4312_v43 }
 0x745   :  { %2067 = vmatpush.bf16.msrb.mxu3 %v4319_v3 }
 0x747   :  { %2048 = vmatpush.bf16.msrb.mxu0 %v4311_v20 }
 0x749   :  { %2068 = vmatpush.bf16.msrb.mxu3 %v4318_v27 }
 0x74b   :  { %2049 = vmatpush.bf16.msrb.mxu0 %v4310_v36 }
 0x74c   :  { %3908 = vmatmul.msk.bf16.vlgmr.msra.gmra.mxu3 %vm200_vm0, %v1734_v47 }
 0x75c   :  { %3909 = vmatmul.msk.bf16.gmra.mxu3 %vm200_vm0, %v1735_v11 }
 0x7af   :  { %v1805_v5 = vpop.f32.mrf.mxu3 }
 0x7b0   :  { %v1806_v9 = vadd.f32 %v1805_v5, %v1746_v53 }
 0x7b2   :  { %v1842_v54 = vmul.f32 0.044715, %v1806_v9  ;;  %v1834_v58 = vmul.f32 0.5, %v1806_v9 }
 0x7b4   :  { %v1850_v57 = vmul.f32 %v1842_v54, %v1806_v9 }
 0x7b6   :  { %v1858_v33 = vmul.f32 %v1850_v57, %v1806_v9 }
 0x7b7   :  { %v1807_v16 = vpop.f32.mrf.mxu3 }
 0x7b8   :  { %v1866_v28 = vadd.f32 %v1858_v33, %v1806_v9  ;;  %v1808_v30 = vadd.f32 %v1807_v16, %v1746_v53 }
 0x7ba   :  { %v1844_v0 = vmul.f32 0.044715, %v1808_v30  ;;  %v1874_v35 = vmul.f32 0.7978846, %v1866_v28  ;;  %v1836_v19 = vmul.f32 0.5, %v1808_v30 }
 0x7bc   :  { %v1852_v13 = vmul.f32 %v1844_v0, %v1808_v30  ;;  %4485 = vtanh.f32 %v1874_v35 }
 0x7be   :  { %v1860_v49 = vmul.f32 %v1852_v13, %v1808_v30 }
 0x7bf   :  { %v1810_v34 = vpop.f32.mrf.mxu3 }
 0x7c0   :  { %v1811_v29 = vadd.f32 %v1810_v34, %v1746_v53  ;;  %v1868_v60 = vadd.f32 %v1860_v49, %v1808_v30 }
 0x7c2   :  { %v1846_v12 = vmul.f32 0.044715, %v1811_v29  ;;  %v1876_v55 = vmul.f32 0.7978846, %v1868_v60  ;;  %v4486_v51 = vpop.eup %4485  ;;  %v1838_v33 = vmul.f32 0.5, %v1811_v29 }
 0x7c3   :  { %v1890_v61 = vadd.f32 1.0, %v4486_v51 }
 0x7c4   :  { %4487 = vtanh.f32 %v1876_v55  ;;  %v1854_v56 = vmul.f32 %v1846_v12, %v1811_v29 }
 0x7c5   :  { %v1898_v41 = vmul.f32 %v1890_v61, %v1834_v58 }
 0x7c6   :  { %v1862_v8 = vmul.f32 %v1854_v56, %v1811_v29 }
 0x7c7   :  { %v1812_v26 = vpop.f32.mrf.mxu3 }
 0x7c8   :  { %v1813_v47 = vadd.f32 %v1812_v26, %v1746_v53  ;;  %v1870_v37 = vadd.f32 %v1862_v8, %v1811_v29 }
 0x7ca   :  { %v4488_v46 = vpop.eup %4487  ;;  %v1848_v21 = vmul.f32 0.044715, %v1813_v47  ;;  %v1878_v59 = vmul.f32 0.7978846, %v1870_v37  ;;  %v1840_v16 = vmul.f32 0.5, %v1813_v47 }
 0x7cb   :  { %v1892_v32 = vadd.f32 1.0, %v4488_v46 }
 0x7cc   :  { %v1856_v14 = vmul.f32 %v1848_v21, %v1813_v47  ;;  %4489 = vtanh.f32 %v1878_v59 }
 0x7cd   :  { %v1900_v11 = vmul.f32 %v1892_v32, %v1836_v19 }
 0x7ce   :  { %v1864_v22 = vmul.f32 %v1856_v14, %v1813_v47 }
 0x7cf   :  { %v1824_v7 = vpop.f32.mrf.mxu3  ;;  %v1906_v42 = vpack.c.bf16 %v1900_v11, %v1898_v41 }
 0x7d0   :  { %v1825_v10 = vadd.f32 %v1824_v7, %v1747_v40  ;;  %v1872_v24 = vadd.f32 %v1864_v22, %v1813_v47 }
 0x7d1   :  { %2050 = vmatmul.bf16.vlgmr.msrb.gmra.mxu0 %v1906_v42 }
 0x7d2   :  { %v1843_v43 = vmul.f32 0.044715, %v1825_v10  ;;  %v1880_v20 = vmul.f32 0.7978846, %v1872_v24  ;;  %v4490_v53 = vpop.eup %4489  ;;  %v1835_v3 = vmul.f32 0.5, %v1825_v10 }
 0x7d3   :  { %v1894_v54 = vadd.f32 1.0, %v4490_v53  ;;  %v301_v53 = vperm.slane %v6014_v38, 4 }
 0x7d4   :  { %v1851_v36 = vmul.f32 %v1843_v43, %v1825_v10  ;;  %4491 = vtanh.f32 %v1880_v20 }
 0x7d5   :  { %v1902_v0 = vmul.f32 %v1894_v54, %v1838_v33 }
 0x7d6   :  { %v1859_v5 = vmul.f32 %v1851_v36, %v1825_v10 }
 0x7d7   :  { %v1826_v9 = vpop.f32.mrf.mxu3 }
 0x7d8   :  { %v1867_v15 = vadd.f32 %v1859_v5, %v1825_v10  ;;  %v1827_v17 = vadd.f32 %v1826_v9, %v1747_v40  ;;  %v4390_v5 = vld [vmem:[%s6995_s21] ss:$0 sm:$0xff]  ;;  %v626_v9 = vadd.f32 %v5379_v62, %v301_v53 }
 0x7da   :  { %v4492_v57 = vpop.eup %4491  ;;  %v1845_v4 = vmul.f32 0.044715, %v1827_v17  ;;  %v1875_v30 = vmul.f32 0.7978846, %v1867_v15  ;;  %v1837_v61 = vmul.f32 0.5, %v1827_v17 }
 0x7db   :  { %v1896_v28 = vadd.f32 1.0, %v4492_v57  ;;  %v724_v57 = vperm.slane %v626_v9, 0 }
 0x7dc   :  { %v1853_v48 = vmul.f32 %v1845_v4, %v1827_v17  ;;  %4493 = vtanh.f32 %v1875_v30 }
 0x7dd   :  { %v1904_v35 = vmul.f32 %v1896_v28, %v1840_v16 }
 0x7de   :  { %v1861_v13 = vmul.f32 %v1853_v48, %v1827_v17 }
 0x7df   :  { %v1829_v25 = vpop.f32.mrf.mxu3  ;;  %v1908_v49 = vpack.c.bf16 %v1904_v35, %v1902_v0 }
 0x7e0   :  { %v1830_v34 = vadd.f32 %v1829_v25, %v1747_v40  ;;  %v1869_v60 = vadd.f32 %v1861_v13, %v1827_v17 }
 0x7e1   :  { %2055 = vmatmul.bf16.gmra.mxu0 %v1908_v49 }
 0x7e2   :  { %v1847_v45 = vmul.f32 0.044715, %v1830_v34  ;;  %v1877_v12 = vmul.f32 0.7978846, %v1869_v60  ;;  %v4494_v31 = vpop.eup %4493  ;;  %v1839_v7 = vmul.f32 0.5, %v1830_v34  ;;  %v736_v60 = vperm.slane %v626_v9, 1 }
 0x7e3   :  { %v1891_v26 = vadd.f32 1.0, %v4494_v31  ;;  %v4331_v9 = vld [vmem:[%s6989_s15 + $0x28] sm:$0xff] }
 0x7e4   :  { %4495 = vtanh.f32 %v1877_v12  ;;  %v1855_v55 = vmul.f32 %v1847_v45, %v1830_v34 }
 0x7e5   :  { %v1899_v19 = vmul.f32 %v1891_v26, %v1835_v3 }
 0x7e6   :  { %v1863_v56 = vmul.f32 %v1855_v55, %v1830_v34 }
 0x7e7   :  { %v1831_v29 = vpop.f32.mrf.mxu3 }
 0x7e8   :  { %v1832_v51 = vadd.f32 %v1831_v29, %v1747_v40  ;;  %v1871_v8 = vadd.f32 %v1863_v56, %v1830_v34 }
 0x7ea   :  { %v4496_v47 = vpop.eup %4495  ;;  %v1849_v37 = vmul.f32 0.044715, %v1832_v51  ;;  %v1879_v58 = vmul.f32 0.7978846, %v1871_v8  ;;  %v1841_v42 = vmul.f32 0.5, %v1832_v51 }
 0x7eb   :  { %v1893_v46 = vadd.f32 1.0, %v4496_v47 }
 0x7ec   :  { %v1857_v21 = vmul.f32 %v1849_v37, %v1832_v51  ;;  %4497 = vtanh.f32 %v1879_v58 }
 0x7ed   :  { %v1901_v32 = vmul.f32 %v1893_v46, %v1837_v61 }
 0x7ee   :  { %v1865_v27 = vmul.f32 %v1857_v21, %v1832_v51 }
 0x7ef   :  { %v1907_v14 = vpack.c.bf16 %v1901_v32, %v1899_v19 }
 0x7f0   :  { %v1873_v59 = vadd.f32 %v1865_v27, %v1832_v51 }
 0x7f1   :  { %2069 = vmatmul.bf16.vlgmr.msrb.gmra.mxu3 %v1907_v14 }
 0x7f2   :  { %v1881_v41 = vmul.f32 0.7978846, %v1873_v59  ;;  %v4498_v11 = vpop.eup %4497 }
 0x7f3   :  { %v1895_v40 = vadd.f32 1.0, %v4498_v11 }
 0x7f4   :  { %4499 = vtanh.f32 %v1881_v41 }
 0x7f5   :  { %v1903_v10 = vmul.f32 %v1895_v40, %v1839_v7 }
 0x7fa   :  { %v4500_v22 = vpop.eup %4499 }
 0x7fb   :  { %v1897_v24 = vadd.f32 1.0, %v4500_v22 }
 0x7fd   :  { %v1905_v43 = vmul.f32 %v1897_v24, %v1841_v42  ;;  %v4329_v24 = vld [vmem:[%s6988_s14 + $0x38] sm:$0xff] }
 0x7fe   :  { %2240 = vmatpush.bf16.msra.mxu0 %v4329_v24 }
 0x7ff   :  { %v1909_v20 = vpack.c.bf16 %v1905_v43, %v1903_v10  ;;  %v4333_v10 = vld [vmem:[%s6989_s15 + $0x38] sm:$0xff]  ;;  %v4328_v43 = vld [vmem:[%s6988_s14 + $0x30] sm:$0xff] }
 0x800   :  { %2292 = vmatpush.bf16.msra.mxu3 %v4333_v10  ;;  %v4334_v10 = vld [vmem:[%s6990_s16 + $0x20] sm:$0xff] }
 0x801   :  { %2074 = vmatmul.bf16.gmra.mxu3 %v1909_v20  ;;  %v4332_v20 = vld [vmem:[%s6989_s15 + $0x30] sm:$0xff] }
 0x802   :  { %2241 = vmatpush.bf16.msra.mxu0 %v4328_v43 }
 0x804   :  { %2293 = vmatpush.bf16.msra.mxu3 %v4332_v20 }
 0x808   :  { %2294 = vmatpush.bf16.msra.mxu3 %v4331_v9 }
 0x84e   :  { %v2051_v36 = vpop.f32.mrf.mxu0 }
 0x84f   :  { %v2052_v15 = vadd.f32 %v4390_v5, %v2051_v36 }
 0x856   :  { %v2053_v17 = vpop.f32.mrf.mxu0 }
 0x857   :  { %v2054_v28 = vadd.f32 %v4390_v5, %v2053_v17  ;;  %v4326_v17 = vld [vmem:[%s6988_s14 + $0x20] sm:$0xff] }
 0x85e   :  { %v2056_v35 = vpop.f32.mrf.mxu0 }
 0x85f   :  { %v2057_v49 = vadd.f32 %v4390_v5, %v2056_v35 }
 0x866   :  { %v2058_v55 = vpop.f32.mrf.mxu0 }
 0x867   :  { %v2059_v31 = vadd.f32 %v4390_v5, %v2058_v55  ;;  %v4327_v5 = vld [vmem:[%s6988_s14 + $0x28] sm:$0xff] }
 0x868   :  { %2242 = vmatpush.bf16.msra.mxu0 %v4327_v5 }
 0x86c   :  { %2243 = vmatpush.bf16.msra.mxu0 %v4326_v17 }
 0x874   :  { %v2070_v54 = vpop.f32.mrf.mxu3 }
 0x875   :  { %v2071_v4 = vadd.f32 %v2070_v54, %v2052_v15  ;;  %v4330_v54 = vld [vmem:[%s6989_s15 + $0x20] sm:$0xff] }
 0x876   :  { %2295 = vmatpush.bf16.msra.mxu3 %v4330_v54 }
 0x877   :  { %v2080_v33 = vmul.f32 %v2071_v4, %v724_v57 }
 0x879   :  { %v2084_v16 = vadd.f32 %v2080_v33, %v5930_v18 }
 0x87b   :  { %v2090_v30 = vsel %vm200_vm0, %v2084_v16, 0.0 }
 0x87c   :  { %v2072_v48 = vpop.f32.mrf.mxu3  ;;  %2091 = vadd.xlane.f32.xlu0 %v2090_v30  ;;  %v303_v30 = vperm.slane %v6014_v38, 6 }
 0x87d   :  { %v2073_v0 = vadd.f32 %v2072_v48, %v2054_v28 }
 0x87f   :  { %v2081_v13 = vmul.f32 %v2073_v0, %v724_v57 }
 0x881   :  { %v2085_v25 = vadd.f32 %v2081_v13, %v5938_v50  ;;  %v6187_v13 = vadd.f32 %v5427_v63, %v303_v30 }
 0x883   :  { %v2093_v62 = vsel %vm200_vm0, %v2085_v25, 0.0  ;;  %v726_v55 = vperm.slane %v6187_v13, 0  ;;  %v738_v20 = vperm.slane %v6187_v13, 1 }
 0x884   :  { %v2075_v34 = vpop.f32.mrf.mxu3  ;;  %2094 = vadd.xlane.f32.xlu1 %v2093_v62 }
 0x885   :  { %v2076_v45 = vadd.f32 %v2075_v34, %v2057_v49  ;;  %v302_v34 = vperm.slane %v6014_v38, 5  ;;  %v2186_v54 = vadd.f32 1.0, %v738_v20  ;;  %v6301_v20 = vld [vmem:[%s7035_s3 + $0x28] sm:$0xff] }
 0x887   :  { %v2082_v12 = vmul.f32 %v2076_v45, %v736_v60 }
 0x889   :  { %v2086_v18 = vadd.f32 %v2082_v12, %v5946_v6 }
 0x88b   :  { %v2096_v56 = vsel %vm200_vm0, %v2086_v18, 0.0 }
 0x88c   :  { %v2077_v29 = vpop.f32.mrf.mxu3  ;;  %2097 = vadd.xlane.f32.xlu2 %v2096_v56  ;;  %v6198_v56 = vadd.f32 %v5411_v44, %v302_v34 }
 0x88d   :  { %v2078_v51 = vadd.f32 %v2077_v29, %v2059_v31 }
 0x88f   :  { %v2083_v8 = vmul.f32 %v2078_v51, %v736_v60 }
 0x891   :  { %v2087_v50 = vadd.f32 %v2083_v8, %v5953_v52  ;;  %v2185_v8 = vadd.f32 1.0, %v726_v55 }
 0x893   :  { %v2099_v26 = vsel %vm200_vm0, %v2087_v50, 0.0 }
 0x894   :  { %2100 = vadd.xlane.f32.xlu0 %v2099_v26 }
 0x8ef   :  { %v2092_v47 = vpop.xlane.xlu0 %2091 }
 0x8f0   :  { %v2102_v37 = vmul.f32 %v2092_v47, %v4977_v1  ;;  %v4337_v47 = vld [vmem:[%s6990_s16 + $0x38] sm:$0xff] }
 0x8f1   :  { %2344 = vmatpush.bf16.msrb.mxu0 %v4337_v47 }
 0x8f2   :  { %v6136_v3 = vsub.f32 %v2084_v16, %v2102_v37 }
 0x8f4   :  { %v2110_v6 = vmul.f32 %v6136_v3, %v6136_v3 }
 0x8f6   :  { %v2114_v61 = vsel %vm200_vm0, %v2110_v6, 0.0 }
 0x8f7   :  { %v2095_v46 = vpop.xlane.xlu1 %2094  ;;  %2115 = vadd.xlane.f32.xlu1 %v2114_v61  ;;  %v725_v61 = vperm.slane %v6198_v56, 0 }
 0x8f8   :  { %v2103_v21 = vmul.f32 %v2095_v46, %v4977_v1 }
 0x8fa   :  { %v6142_v58 = vsub.f32 %v2085_v25, %v2103_v21 }
 0x8fc   :  { %v2111_v52 = vmul.f32 %v6142_v58, %v6142_v58 }
 0x8fe   :  { %v2117_v19 = vsel %vm200_vm0, %v2111_v52, 0.0 }
 0x8ff   :  { %2118 = vadd.xlane.f32.xlu2 %v2117_v19  ;;  %v2098_v32 = vpop.xlane.xlu2 %2097 }
 0x900   :  { %v2104_v27 = vmul.f32 %v2098_v32, %v4977_v1 }
 0x902   :  { %v6148_v14 = vsub.f32 %v2086_v18, %v2104_v27  ;;  %v6195_v18 = vld [vmem:[%s6987_s13 + $0x1] ss:$0 sm:$0xff]  ;;  %s3563_s13 = sshll.u32 %s4685_s4, 4  ;;  %s3564_s13 = int_to_ptr.vmem [resolvable:$true] %s3563_s13 }
 0x904   :  { %v2112_v59 = vmul.f32 %v6148_v14, %v6148_v14 }
 0x906   :  { %v2120_v41 = vsel %vm200_vm0, %v2112_v59, 0.0 }
 0x907   :  { %v2101_v11 = vpop.xlane.xlu0 %2100  ;;  %2121 = vadd.xlane.f32.xlu0 %v2120_v41  ;;  %v4335_v41 = vld [vmem:[%s6990_s16 + $0x28] sm:$0xff] }
 0x908   :  { %v2105_v40 = vmul.f32 %v2101_v11, %v4977_v1 }
 0x90a   :  { %v6154_v22 = vsub.f32 %v2087_v50, %v2105_v40 }
 0x90c   :  { %v2113_v7 = vmul.f32 %v6154_v22, %v6154_v22 }
 0x90e   :  { %v2123_v42 = vsel %vm200_vm0, %v2113_v7, 0.0 }
 0x90f   :  { %2124 = vadd.xlane.f32.xlu1 %v2123_v42 }
 0x96a   :  { %v2116_v36 = vpop.xlane.xlu1 %2115 }
 0x96b   :  { %v2126_v53 = vmul.f32 %v2116_v36, %v4977_v1 }
 0x96d   :  { %v2130_v15 = vadd.f32 1e-05, %v2126_v53 }
 0x96f   :  { %4501 = vrsqrt.f32 %v2130_v15  ;;  %vm2140_vm6 = vweird.f32 %v2130_v15 }
 0x972   :  { %v2119_v57 = vpop.xlane.xlu2 %2118 }
 0x973   :  { %v2127_v4 = vmul.f32 %v2119_v57, %v4977_v1 }
 0x975   :  { %v4502_v33 = vpop.eup %4501  ;;  %v2131_v16 = vadd.f32 1e-05, %v2127_v4 }
 0x976   :  { %v2135_v28 = vmul.f32 %v4502_v33, %v2130_v15  ;;  %vm2141_vm5 = vweird.f32 %v4502_v33 }
 0x977   :  { %4503 = vrsqrt.f32 %v2131_v16  ;;  %vm2142_vm8 = vmor %vm2140_vm6, %vm2141_vm5  ;;  %vm2150_vm10 = vweird.f32 %v2131_v16 }
 0x978   :  { %v2136_v48 = vmul.f32 %v4502_v33, %v2135_v28 }
 0x97a   :  { %v2137_v0 = vmul.f32 0.5, %v2136_v48  ;;  %v2122_v35 = vpop.xlane.xlu0 %2121 }
 0x97b   :  { %v2128_v25 = vmul.f32 %v2122_v35, %v4977_v1 }
 0x97c   :  { %v2138_v49 = vsub.f32 1.5, %v2137_v0 }
 0x97d   :  { %v4504_v62 = vpop.eup %4503  ;;  %v2132_v60 = vadd.f32 1e-05, %v2128_v25 }
 0x97e   :  { %v2139_v45 = vmul.f32 %v4502_v33, %v2138_v49  ;;  %v2145_v12 = vmul.f32 %v4504_v62, %v2131_v16  ;;  %vm2151_vm9 = vweird.f32 %v4504_v62 }
 0x97f   :  { %4505 = vrsqrt.f32 %v2132_v60  ;;  %vm2152_vm11 = vmor %vm2150_vm10, %vm2151_vm9  ;;  %vm2160_vm13 = vweird.f32 %v2132_v60 }
 0x980   :  { %v2143_v63 = vsel %vm2142_vm8, %v4502_v33, %v2139_v45  ;;  %v2146_v31 = vmul.f32 %v4504_v62, %v2145_v12  ;;  %v737_v33 = vperm.slane %v6198_v56, 1 }
 0x981   :  { %v2174_v38 = vmul.f32 %v2143_v63, %v6136_v3  ;;  %v4336_v3 = vld [vmem:[%s6990_s16 + $0x30] sm:$0xff] }
 0x982   :  { %v2147_v29 = vmul.f32 0.5, %v2146_v31  ;;  %v2125_v51 = vpop.xlane.xlu1 %2124  ;;  %2345 = vmatpush.bf16.msrb.mxu0 %v4336_v3 }
 0x983   :  { %v2181_v50 = vmul.f32 %v6195_v18, %v2174_v38  ;;  %v2129_v26 = vmul.f32 %v2125_v51, %v4977_v1 }
 0x984   :  { %v2148_v37 = vsub.f32 1.5, %v2147_v29 }
 0x985   :  { %v4506_v6 = vpop.eup %4505  ;;  %v2187_v44 = vmul.f32 %v2185_v8, %v2181_v50  ;;  %v2133_v46 = vadd.f32 1e-05, %v2129_v26 }
 0x986   :  { %v2149_v21 = vmul.f32 %v4504_v62, %v2148_v37  ;;  %v2155_v52 = vmul.f32 %v4506_v6, %v2132_v60  ;;  %vm2161_vm12 = vweird.f32 %v4506_v6  ;;  %2346 = vmatpush.bf16.msrb.mxu0 %v4335_v41  ;;  %v4606_v37 = vld [vmem:[%s7033_s30] sm:$0xff] }
 0x987   :  { %4507 = vrsqrt.f32 %v2133_v46  ;;  %v2191_v19 = vadd.f32 %v2187_v44, %v725_v61  ;;  %vm2162_vm14 = vmor %vm2160_vm13, %vm2161_vm12  ;;  %vm2170_vm1 = vweird.f32 %v2133_v46 }
 0x988   :  { %v2153_v32 = vsel %vm2152_vm11, %v4504_v62, %v2149_v21  ;;  %v2156_v27 = vmul.f32 %v4506_v6, %v2155_v52  ;;  %v4608_v21 = vld [vmem:[%s7033_s30 + $0x8] sm:$0xff] }
 0x989   :  { %v2175_v59 = vmul.f32 %v2153_v32, %v6142_v58 }
 0x98a   :  { %v2157_v11 = vmul.f32 0.5, %v2156_v27  ;;  %2347 = vmatpush.bf16.msrb.mxu0 %v4334_v10 }
 0x98b   :  { %v2182_v40 = vmul.f32 %v6195_v18, %v2175_v59  ;;  %v6261_v59 = vld [vmem:[%s7035_s3] sm:$0xff] }
 0x98c   :  { %v2158_v7 = vsub.f32 1.5, %v2157_v11  ;;  %v6269_v11 = vld [vmem:[%s7035_s3 + $0x20] sm:$0xff] }
 0x98d   :  { %v4508_v42 = vpop.eup %4507  ;;  %v2188_v24 = vmul.f32 %v2185_v8, %v2182_v40 }
 0x98e   :  { %v2159_v43 = vmul.f32 %v4506_v6, %v2158_v7  ;;  %v2165_v58 = vmul.f32 %v4508_v42, %v2133_v46  ;;  %vm2171_vm15 = vweird.f32 %v4508_v42  ;;  %v6277_v7 = vld [vmem:[%s7035_s3 + $0x40] sm:$0xff] }
 0x98f   :  { %v2192_v36 = vadd.f32 %v2188_v24, %v725_v61  ;;  %vm2172_vm2 = vmor %vm2170_vm1, %vm2171_vm15  ;;  %v4607_v61 = vld [vmem:[%s7034_s11] sm:$0xff] }
 0x990   :  { %v2163_v53 = vsel %vm2162_vm14, %v4506_v6, %v2159_v43  ;;  %v2166_v5 = vmul.f32 %v4508_v42, %v2165_v58  ;;  %v6285_v24 = vld [vmem:[%s7035_s3 + $0x60] sm:$0xff]  ;;  %v6293_v43 = vld [vmem:[%s7035_s3 + $0x8] sm:$0xff] }
 0x991   :  { %v2176_v9 = vmul.f32 %v2163_v53, %v6148_v14  ;;  %v2195_v15 = vpack.c.bf16 %v2192_v36, %v2191_v19  ;;  %v4609_v19 = vld [vmem:[%s7034_s11 + $0x8] sm:$0xff] }
 0x992   :  { %v2167_v17 = vmul.f32 0.5, %v2166_v5  ;;  %v6309_v53 = vld [vmem:[%s7035_s3 + $0x48] sm:$0xff] }
 0x993   :  { %3999 = vmatmul.msk.bf16.vlgmr.msra.gmra.mxu0 %vm200_vm0, %v2195_v15  ;;  %4025 = vmatmul.msk.bf16.vlgmr.msra.gmra.mxu3 %vm200_vm0, %v2195_v15  ;;  %v2183_v57 = vmul.f32 %v6195_v18, %v2176_v9  ;;  %v6317_v9 = vld [vmem:[%s7035_s3 + $0x68] sm:$0xff] }
 0x994   :  { %v2168_v4 = vsub.f32 1.5, %v2167_v17 }
 0x995   :  { %v2189_v16 = vmul.f32 %v2186_v54, %v2183_v57 }
 0x996   :  { %v2169_v28 = vmul.f32 %v4508_v42, %v2168_v4 }
 0x997   :  { %v2193_v30 = vadd.f32 %v2189_v16, %v737_v33  ;;  %v4618_v16 = vld [vmem:[%s7033_s30 + $0x10] sm:$0xff] }
 0x998   :  { %v2173_v14 = vsel %vm2172_vm2, %v4508_v42, %v2169_v28 }
 0x999   :  { %v2177_v48 = vmul.f32 %v2173_v14, %v6154_v22 }
 0x99b   :  { %v2184_v0 = vmul.f32 %v6195_v18, %v2177_v48 }
 0x99d   :  { %v2190_v35 = vmul.f32 %v2186_v54, %v2184_v0 }
 0x99f   :  { %v2194_v13 = vadd.f32 %v2190_v35, %v737_v33  ;;  %v4620_v35 = vld [vmem:[%s7033_s30 + $0x18] sm:$0xff] }
 0x9a1   :  { %v2196_v25 = vpack.c.bf16 %v2194_v13, %v2193_v30  ;;  %v4619_v30 = vld [vmem:[%s7034_s11 + $0x10] sm:$0xff] }
 0x9a3   :  { %4000 = vmatmul.msk.bf16.gmra.mxu0 %vm200_vm0, %v2196_v25  ;;  %4026 = vmatmul.msk.bf16.gmra.mxu3 %vm200_vm0, %v2196_v25 }
 0x9b3   :  { %4051 = vmatmul.msk.bf16.vlgmr.msrb.gmra.mxu0 %vm200_vm0, %v2195_v15 }
 0x9c3   :  { %4052 = vmatmul.msk.bf16.gmra.mxu0 %vm200_vm0, %v2196_v25  ;;  %v4621_v25 = vld [vmem:[%s7034_s11 + $0x18] sm:$0xff] }
 0xa10   :  { %v2245_v49 = vpop.f32.mrf.mxu0 }
 0xa11   :  { %v2359_v6 = vmul.f32 %v4606_v37, %v2245_v49 }
 0xa16   :  { %v6231_v22 = vpop.f32.mrf.mxu3 }
 0xa18   :  { %v2247_v62 = vpop.f32.mrf.mxu0 }
 0xa19   :  { %v2367_v34 = vpack.c.bf16 %v2247_v62, %v2245_v49  ;;  %v2360_v52 = vmul.f32 %v4608_v21, %v2247_v62 }
 0xa1b   :  { %4053 = vmatmul.msk.bf16.vlgmr.msrb.gmra.mxu1 %vm200_vm0, %v2367_v34  ;;  %v6345_v34 = vld [vmem:[%s7035_s3 + $0x10] sm:$0xff] }
 0xa1e   :  { %v6234_v18 = vpop.f32.mrf.mxu3 }
 0xa1f   :  { %v2369_v31 = vpack.c.bf16 %v6234_v18, %v6231_v22 }
 0xa20   :  { %v2250_v60 = vpop.f32.mrf.mxu0 }
 0xa21   :  { %v2361_v28 = vmul.f32 %v4618_v16, %v2250_v60 }
 0xa26   :  { %v6239_v56 = vpop.f32.mrf.mxu3 }
 0xa28   :  { %v2252_v45 = vpop.f32.mrf.mxu0 }
 0xa29   :  { %v2368_v12 = vpack.c.bf16 %v2252_v45, %v2250_v60  ;;  %v2362_v13 = vmul.f32 %v4620_v35, %v2252_v45 }
 0xa2b   :  { %4054 = vmatmul.msk.bf16.gmra.mxu1 %vm200_vm0, %v2368_v12  ;;  %v6351_v12 = vld [vmem:[%s7035_s3 + $0x30] sm:$0xff] }
 0xa2e   :  { %v6241_v29 = vpop.f32.mrf.mxu3 }
 0xa2f   :  { %v2370_v8 = vpack.c.bf16 %v6241_v29, %v6239_v56 }
 0xa30   :  { %v2349_v55 = vpop.f32.mrf.mxu0 }
 0xa38   :  { %v2351_v63 = vpop.f32.mrf.mxu0 }
 0xa39   :  { %v2430_v26 = vpack.c.bf16 %v2351_v63, %v2349_v55  ;;  %v6357_v55 = vld [vmem:[%s7035_s3 + $0x50] sm:$0xff] }
 0xa3b   :  { %4055 = vmatmul.msk.bf16.gmra.mxu1 %vm200_vm0, %v2369_v31  ;;  %v6363_v31 = vld [vmem:[%s7035_s3 + $0x70] sm:$0xff] }
 0xa40   :  { %v2354_v38 = vpop.f32.mrf.mxu0 }
 0xa48   :  { %v2356_v51 = vpop.f32.mrf.mxu0 }
 0xa49   :  { %v2431_v50 = vpack.c.bf16 %v2356_v51, %v2354_v38  ;;  %v6369_v51 = vld [vmem:[%s7035_s3 + $0x18] sm:$0xff] }
 0xa4b   :  { %4056 = vmatmul.msk.bf16.gmra.mxu1 %vm200_vm0, %v2370_v8  ;;  %2813 = vmatpush.bf16.msrb.mxu3 %v2431_v50  ;;  %v6375_v50 = vld [vmem:[%s7035_s3 + $0x38] sm:$0xff] }
 0xa4f   :  { %2814 = vmatpush.bf16.msrb.mxu3 %v2430_v26 }
 0xa98   :  { %v2392_v47 = vpop.f32.mrf.mxu1 }
 0xa99   :  { %v2412_v44 = vmul.f32 %v4607_v61, %v2392_v47  ;;  %v6381_v47 = vld [vmem:[%s7035_s3 + $0x58] sm:$0xff] }
 0xa9b   :  { %v2420_v46 = vadd.f32 %v2412_v44, %v2359_v6  ;;  %v6387_v6 = vld [vmem:[%s7035_s3 + $0x78] sm:$0xff]  ;;  %s4686_s3 = smov 64  }
 0xa9d   :  { %v6264_v41 = vmul.f32 %v6261_v59, %v2420_v46  ;;  %v6272_v40 = vmul.f32 %v6269_v11, %v2420_v46  ;;  %v6280_v42 = vmul.f32 %v6277_v7, %v2420_v46  ;;  %v6288_v10 = vmul.f32 %v6285_v24, %v2420_v46 }
 0xaa0   :  { %v2394_v3 = vpop.f32.mrf.mxu1 }
 0xaa1   :  { %v2413_v32 = vmul.f32 %v4609_v19, %v2394_v3  ;;  %v4630_v19 = vld [vmem:[%s7034_s11 + $0x20] sm:$0xff] }
 0xaa3   :  { %v2421_v27 = vadd.f32 %v2413_v32, %v2360_v52 }
 0xaa5   :  { %v6296_v58 = vmul.f32 %v6293_v43, %v2421_v27  ;;  %v6304_v36 = vmul.f32 %v6301_v20, %v2421_v27  ;;  %v6312_v5 = vmul.f32 %v6309_v53, %v2421_v27  ;;  %v6320_v15 = vmul.f32 %v6317_v9, %v2421_v27 }
 0xaa7   :  { %v2448_v17 = vpack.c.bf16 %v6296_v58, %v6264_v41  ;;  %v2450_v54 = vpack.c.bf16 %v6304_v36, %v6272_v40  ;;  %v2452_v57 = vpack.c.bf16 %v6312_v5, %v6280_v42  ;;  %v2454_v4 = vpack.c.bf16 %v6320_v15, %v6288_v10  ;;  %v4638_v41 = vld [vmem:[%s7036_s6] sm:$0xff]  ;;  %v6447_v10 = vld [vmem:[%s7036_s6 + $0x8] sm:$0xff] }
 0xaa8   :  { %v2397_v33 = vpop.f32.mrf.mxu1 }
 0xaa9   :  { %v2414_v14 = vmul.f32 %v4619_v30, %v2397_v33  ;;  %v4631_v33 = vld [vmem:[%s7033_s30 + $0x20] sm:$0xff] }
 0xaaa   :  { %v2363_v16 = vmul.f32 %v4631_v33, %v6231_v22 }
 0xaab   :  { %v2422_v48 = vadd.f32 %v2414_v14, %v2361_v28  ;;  %v4632_v28 = vld [vmem:[%s7033_s30 + $0x28] sm:$0xff] }
 0xaac   :  { %v2364_v30 = vmul.f32 %v4632_v28, %v6234_v18  ;;  %v4633_v14 = vld [vmem:[%s7034_s11 + $0x28] sm:$0xff]  ;;  %v6471_v28 = vld [vmem:[%s7036_s6 + $0x20] sm:$0xff] }
 0xaad   :  { %v2434_v60 = vmul.f32 %v6345_v34, %v2422_v48  ;;  %v2438_v45 = vmul.f32 %v6351_v12, %v2422_v48  ;;  %v2442_v63 = vmul.f32 %v6357_v55, %v2422_v48  ;;  %v2446_v38 = vmul.f32 %v6363_v31, %v2422_v48 }
 0xab0   :  { %v2399_v0 = vpop.f32.mrf.mxu1 }
 0xab1   :  { %v2415_v49 = vmul.f32 %v4621_v25, %v2399_v0 }
 0xab3   :  { %v2423_v62 = vadd.f32 %v2415_v49, %v2362_v13  ;;  %v4634_v49 = vld [vmem:[%s7034_s11 + $0x30] sm:$0xff] }
 0xab5   :  { %v2435_v8 = vmul.f32 %v6369_v51, %v2423_v62  ;;  %v2439_v26 = vmul.f32 %v6375_v50, %v2423_v62  ;;  %v2443_v37 = vmul.f32 %v6381_v47, %v2423_v62  ;;  %v2447_v61 = vmul.f32 %v6387_v6, %v2423_v62 }
 0xab7   :  { %v2449_v44 = vpack.c.bf16 %v2435_v8, %v2434_v60  ;;  %v2451_v46 = vpack.c.bf16 %v2439_v26, %v2438_v45  ;;  %v2453_v3 = vpack.c.bf16 %v2443_v37, %v2442_v63  ;;  %v2455_v21 = vpack.c.bf16 %v2447_v61, %v2446_v38  ;;  %v4635_v60 = vld [vmem:[%s7033_s30 + $0x30] sm:$0xff]  ;;  %v4636_v45 = vld [vmem:[%s7033_s30 + $0x38] sm:$0xff] }
 0xab8   :  { %v2402_v52 = vpop.f32.mrf.mxu1  ;;  %v2365_v18 = vmul.f32 %v4635_v60, %v6239_v56  ;;  %v2366_v63 = vmul.f32 %v4636_v45, %v6241_v29  ;;  %v4637_v38 = vld [vmem:[%s7034_s11 + $0x38] sm:$0xff] }
 0xab9   :  { %v2416_v32 = vmul.f32 %v4630_v19, %v2402_v52 }
 0xabb   :  { %v2424_v0 = vadd.f32 %v2416_v32, %v2363_v16 }
 0xac0   :  { %v2404_v27 = vpop.f32.mrf.mxu1 }
 0xac1   :  { %v2417_v48 = vmul.f32 %v4633_v14, %v2404_v27 }
 0xac3   :  { %v2425_v35 = vadd.f32 %v2417_v48, %v2364_v30 }
 0xac5   :  { %v2428_v13 = vpack.c.bf16 %v2425_v35, %v2424_v0  ;;  %v6481_v35 = vld [vmem:[%s7036_s6 + $0x28] sm:$0xff] }
 0xac7   :  { %v2481_v19 = vsel %vm200_vm0, %v2428_v13, 0 }
 0xac8   :  { %v2407_v25 = vpop.f32.mrf.mxu1 }
 0xac9   :  { %v2418_v22 = vmul.f32 %v4634_v49, %v2407_v25 }
 0xacb   :  { %v2426_v26 = vadd.f32 %v2418_v22, %v2365_v18 }
 0xad0   :  { %v2409_v62 = vpop.f32.mrf.mxu1 }
 0xad1   :  { %v2419_v8 = vmul.f32 %v4637_v38, %v2409_v62  ;;  %v6491_v62 = vld [vmem:[%s7036_s6 + $0x30] sm:$0xff]  ;;  %v6501_v38 = vld [vmem:[%s7036_s6 + $0x38] sm:$0xff] }
 0xad3   :  { %v2427_v37 = vadd.f32 %v2419_v8, %v2366_v63 }
 0xad5   :  { %v2429_v61 = vpack.c.bf16 %v2427_v37, %v2426_v26 }
 0xad7   :  { %v2484_v52 = vsel %vm200_vm0, %v2429_v61, 0 }
 0xad8   :  { %2492 = vmatpush.bf16.xpose.msra.mxu2 %v2484_v52  ;;  %v6511_v52 = vld [vmem:[%s7036_s6 + $0x40] sm:$0xff] }
 0xae0   :  { %2493 = vmatpush.bf16.xpose.msra.mxu2 %v2481_v19 }
 0xae7   :  { %4057 = vmatmul.msk.bf16.vlgmr.msra.gmra.mxu2 %vm200_vm0, %v2448_v17 }
 0xaf7   :  { %4058 = vmatmul.msk.bf16.gmra.mxu2 %vm200_vm0, %v2449_v44 }
 0xb07   :  { %4059 = vmatmul.msk.bf16.gmra.mxu2 %vm200_vm0, %v2450_v54 }
 0xb17   :  { %4060 = vmatmul.msk.bf16.gmra.mxu2 %vm200_vm0, %v2451_v46 }
 0xb27   :  { %4061 = vmatmul.msk.bf16.gmra.mxu2 %vm200_vm0, %v2452_v57  ;;  %v6454_v57 = vld [vmem:[%s7036_s6 + $0x10] sm:$0xff] }
 0xb37   :  { %4062 = vmatmul.msk.bf16.gmra.mxu2 %vm200_vm0, %v2453_v3 }
 0xb47   :  { %4063 = vmatmul.msk.bf16.gmra.mxu2 %vm200_vm0, %v2454_v4 }
 0xb57   :  { %4064 = vmatmul.msk.bf16.gmra.mxu2 %vm200_vm0, %v2455_v21  ;;  %v6461_v21 = vld [vmem:[%s7036_s6 + $0x18] sm:$0xff] }
 0xb6a   :  { %v2495_v56 = vpop.f32.mrf.mxu2 }
 0xb6b   :  { %v2535_v29 = vmul.f32 0.25, %v2495_v56 }
 0xb6d   :  { %v2551_v40 = vmul.f32 %v4638_v41, %v2535_v29 }
 0xb6f   :  { %v2567_v42 = vsel %vm1310_vm7, %v2551_v40, -inf }
 0xb70   :  { %2568 = vmax.xlane.f32.xlu2 %v2567_v42 }
 0xb72   :  { %v2497_v58 = vpop.f32.mrf.mxu2 }
 0xb73   :  { %v2536_v36 = vmul.f32 0.25, %v2497_v58 }
 0xb75   :  { %v2552_v5 = vmul.f32 %v6447_v10, %v2536_v36 }
 0xb77   :  { %v2570_v15 = vsel %vm1310_vm7, %v2552_v5, -inf }
 0xb78   :  { %2571 = vmax.xlane.f32.xlu0 %v2570_v15 }
 0xb7a   :  { %v2500_v17 = vpop.f32.mrf.mxu2 }
 0xb7b   :  { %v2537_v54 = vmul.f32 0.25, %v2500_v17 }
 0xb7d   :  { %v2553_v4 = vmul.f32 %v6454_v57, %v2537_v54 }
 0xb7f   :  { %v2573_v44 = vsel %vm1310_vm7, %v2553_v4, -inf }
 0xb80   :  { %2574 = vmax.xlane.f32.xlu1 %v2573_v44 }
 0xb82   :  { %v2502_v46 = vpop.f32.mrf.mxu2 }
 0xb83   :  { %v2538_v3 = vmul.f32 0.25, %v2502_v46 }
 0xb85   :  { %v6464_v32 = vmul.f32 %v6461_v21, %v2538_v3 }
 0xb87   :  { %v2576_v27 = vsel %vm1310_vm7, %v6464_v32, -inf }
 0xb88   :  { %2577 = vmax.xlane.f32.xlu2 %v2576_v27 }
 0xb8a   :  { %v2505_v33 = vpop.f32.mrf.mxu2 }
 0xb8b   :  { %v2539_v16 = vmul.f32 0.25, %v2505_v33 }
 0xb8d   :  { %v6474_v30 = vmul.f32 %v6471_v28, %v2539_v16 }
 0xb8f   :  { %v2579_v14 = vsel %vm1310_vm7, %v6474_v30, -inf }
 0xb90   :  { %2580 = vmax.xlane.f32.xlu0 %v2579_v14 }
 0xb92   :  { %v2507_v48 = vpop.f32.mrf.mxu2 }
 0xb93   :  { %v2540_v0 = vmul.f32 0.25, %v2507_v48 }
 0xb95   :  { %v6484_v13 = vmul.f32 %v6481_v35, %v2540_v0 }
 0xb97   :  { %v2582_v25 = vsel %vm1310_vm7, %v6484_v13, -inf }
 0xb98   :  { %2583 = vmax.xlane.f32.xlu1 %v2582_v25 }
 0xb9a   :  { %v2510_v49 = vpop.f32.mrf.mxu2 }
 0xb9b   :  { %v2541_v22 = vmul.f32 0.25, %v2510_v49 }
 0xb9d   :  { %v6494_v60 = vmul.f32 %v6491_v62, %v2541_v22 }
 0xb9f   :  { %v2585_v18 = vsel %vm1310_vm7, %v6494_v60, -inf }
 0xba0   :  { %2586 = vmax.xlane.f32.xlu2 %v2585_v18 }
 0xba2   :  { %v2512_v45 = vpop.f32.mrf.mxu2 }
 0xba3   :  { %v2542_v63 = vmul.f32 0.25, %v2512_v45 }
 0xba5   :  { %v6504_v8 = vmul.f32 %v6501_v38, %v2542_v63  ;;  %v6541_v63 = vld [vmem:[%s7036_s6 + $0x50] sm:$0xff] }
 0xba7   :  { %v2588_v26 = vsel %vm1310_vm7, %v6504_v8, -inf }
 0xba8   :  { %2589 = vmax.xlane.f32.xlu0 %v2588_v26 }
 0xbaa   :  { %v2515_v37 = vpop.f32.mrf.mxu2 }
 0xbab   :  { %v2543_v61 = vmul.f32 0.25, %v2515_v37 }
 0xbad   :  { %v6514_v19 = vmul.f32 %v6511_v52, %v2543_v61 }
 0xbaf   :  { %v2591_v56 = vsel %vm1310_vm7, %v6514_v19, -inf }
 0xbb0   :  { %2592 = vmax.xlane.f32.xlu0 %v2591_v56 }
 0xbb2   :  { %v2517_v29 = vpop.f32.mrf.mxu2 }
 0xbb3   :  { %v2544_v27 = vmul.f32 0.25, %v2517_v29 }
 0xbba   :  { %v2520_v17 = vpop.f32.mrf.mxu2 }
 0xbbb   :  { %v2545_v49 = vmul.f32 0.25, %v2520_v17 }
 0xbc2   :  { %v2522_v0 = vpop.f32.mrf.mxu2 }
 0xbc3   :  { %v2546_v29 = vmul.f32 0.25, %v2522_v0 }
 0xbca   :  { %v2525_v56 = vpop.f32.mrf.mxu2 }
 0xbe3   :  { %v2569_v42 = vpop.xlane.xlu2 %2568 }
 0xbe4   :  { %v2615_v58 = vsub.f32 %v2551_v40, %v2569_v42  ;;  %v6525_v40 = vld [vmem:[%s7036_s6 + $0x48] sm:$0xff] }
 0xbe5   :  { %v6528_v48 = vmul.f32 %v6525_v40, %v2544_v27 }
 0xbe6   :  { %v2631_v36 = vmul.f32 1.442695, %v2615_v58 }
 0xbe8   :  { %4509 = vpow2.f32 %v2631_v36 }
 0xbeb   :  { %v2572_v15 = vpop.xlane.xlu0 %2571 }
 0xbec   :  { %v2616_v54 = vsub.f32 %v2552_v5, %v2572_v15  ;;  %v6557_v15 = vld [vmem:[%s7036_s6 + $0x58] sm:$0xff] }
 0xbee   :  { %v4510_v44 = vpop.eup %4509  ;;  %v2633_v46 = vmul.f32 1.442695, %v2616_v54 }
 0xbef   :  { %v6518_v3 = vmul.f32 %v4638_v41, %v4510_v44 }
 0xbf0   :  { %4511 = vpow2.f32 %v2633_v46  ;;  %v2547_v46 = vmul.f32 0.25, %v2525_v56 }
 0xbf1   :  { %v2679_v33 = vsel %vm1310_vm7, %v6518_v3, 0.0 }
 0xbf2   :  { %2680 = vadd.xlane.f32.xlu1 %v2679_v33  ;;  %v2527_v33 = vpop.f32.mrf.mxu2 }
 0xbf3   :  { %v2575_v16 = vpop.xlane.xlu1 %2574 }
 0xbf4   :  { %v2617_v14 = vsub.f32 %v2553_v4, %v2575_v16  ;;  %v2594_v4 = vsel %vm1310_vm7, %v6528_v48, -inf }
 0xbf6   :  { %v4512_v5 = vpop.eup %4511  ;;  %v2635_v41 = vmul.f32 1.442695, %v2617_v14 }
 0xbf7   :  { %v6531_v25 = vmul.f32 %v6447_v10, %v4512_v5  ;;  %v6544_v10 = vmul.f32 %v6541_v63, %v2545_v49  ;;  %v6573_v5 = vld [vmem:[%s7036_s6 + $0x60] sm:$0xff] }
 0xbf8   :  { %4513 = vpow2.f32 %v2635_v41 }
 0xbf9   :  { %v2682_v22 = vsel %vm1310_vm7, %v6531_v25, 0.0 }
 0xbfa   :  { %2683 = vadd.xlane.f32.xlu2 %v2682_v22  ;;  %2595 = vmax.xlane.f32.xlu1 %v2594_v4  ;;  %v2548_v22 = vmul.f32 0.25, %v2527_v33 }
 0xbfb   :  { %v2578_v18 = vpop.xlane.xlu2 %2577 }
 0xbfc   :  { %v2618_v45 = vsub.f32 %v6464_v32, %v2578_v18  ;;  %v2597_v32 = vsel %vm1310_vm7, %v6544_v10, -inf }
 0xbfe   :  { %v4514_v26 = vpop.eup %4513  ;;  %v2637_v37 = vmul.f32 1.442695, %v2618_v45  ;;  %v2530_v45 = vpop.f32.mrf.mxu2 }
 0xbff   :  { %v6547_v61 = vmul.f32 %v6454_v57, %v4514_v26  ;;  %v6560_v57 = vmul.f32 %v6557_v15, %v2546_v29 }
 0xc00   :  { %4515 = vpow2.f32 %v2637_v37  ;;  %v6589_v37 = vld [vmem:[%s7036_s6 + $0x68] sm:$0xff] }
 0xc01   :  { %v2685_v42 = vsel %vm1310_vm7, %v6547_v61, 0.0 }
 0xc02   :  { %2686 = vadd.xlane.f32.xlu2 %v2685_v42  ;;  %2598 = vmax.xlane.f32.xlu1 %v2597_v32  ;;  %v2549_v32 = vmul.f32 0.25, %v2530_v45 }
 0xc03   :  { %v2581_v58 = vpop.xlane.xlu0 %2580 }
 0xc04   :  { %v2619_v36 = vsub.f32 %v6474_v30, %v2581_v58  ;;  %v2600_v30 = vsel %vm1310_vm7, %v6560_v57, -inf }
 0xc06   :  { %v4516_v17 = vpop.eup %4515  ;;  %v2639_v54 = vmul.f32 1.442695, %v2619_v36 }
 0xc07   :  { %v6563_v44 = vmul.f32 %v6461_v21, %v4516_v17  ;;  %v6576_v21 = vmul.f32 %v6573_v5, %v2547_v46 }
 0xc08   :  { %4517 = vpow2.f32 %v2639_v54  ;;  %v6605_v54 = vld [vmem:[%s7036_s6 + $0x70] sm:$0xff] }
 0xc09   :  { %v2688_v27 = vsel %vm1310_vm7, %v6563_v44, 0.0 }
 0xc0a   :  { %2689 = vadd.xlane.f32.xlu0 %v2688_v27  ;;  %2601 = vmax.xlane.f32.xlu2 %v2600_v30  ;;  %v2532_v27 = vpop.f32.mrf.mxu2 }
 0xc0b   :  { %v2584_v16 = vpop.xlane.xlu1 %2583 }
 0xc0c   :  { %v2620_v14 = vsub.f32 %v6484_v13, %v2584_v16  ;;  %v2603_v13 = vsel %vm1310_vm7, %v6576_v21, -inf  ;;  %v2550_v16 = vmul.f32 0.25, %v2532_v27 }
 0xc0e   :  { %v4518_v0 = vpop.eup %4517  ;;  %v2641_v41 = vmul.f32 1.442695, %v2620_v14 }
 0xc0f   :  { %v6579_v49 = vmul.f32 %v6471_v28, %v4518_v0  ;;  %v6592_v28 = vmul.f32 %v6589_v37, %v2548_v22  ;;  %v6621_v22 = vld [vmem:[%s7036_s6 + $0x78] sm:$0xff] }
 0xc10   :  { %4519 = vpow2.f32 %v2641_v41 }
 0xc11   :  { %v2691_v4 = vsel %vm1310_vm7, %v6579_v49, 0.0 }
 0xc12   :  { %2692 = vadd.xlane.f32.xlu0 %v2691_v4  ;;  %2604 = vmax.xlane.f32.xlu2 %v2603_v13 }
 0xc13   :  { %v2587_v18 = vpop.xlane.xlu2 %2586 }
 0xc14   :  { %v2621_v26 = vsub.f32 %v6494_v60, %v2587_v18  ;;  %v2606_v60 = vsel %vm1310_vm7, %v6592_v28, -inf }
 0xc16   :  { %v4520_v56 = vpop.eup %4519  ;;  %v2643_v29 = vmul.f32 1.442695, %v2621_v26 }
 0xc17   :  { %v6595_v42 = vmul.f32 %v6481_v35, %v4520_v56  ;;  %v6608_v35 = vmul.f32 %v6605_v54, %v2549_v32 }
 0xc18   :  { %4521 = vpow2.f32 %v2643_v29 }
 0xc19   :  { %v2694_v58 = vsel %vm1310_vm7, %v6595_v42, 0.0 }
 0xc1a   :  { %2695 = vadd.xlane.f32.xlu1 %v2694_v58  ;;  %2607 = vmax.xlane.f32.xlu0 %v2606_v60 }
 0xc1b   :  { %v2590_v36 = vpop.xlane.xlu0 %2589 }
 0xc1c   :  { %v2622_v17 = vsub.f32 %v6504_v8, %v2590_v36  ;;  %v2609_v8 = vsel %vm1310_vm7, %v6608_v35, -inf }
 0xc1e   :  { %v4522_v46 = vpop.eup %4521  ;;  %v2645_v30 = vmul.f32 1.442695, %v2622_v17 }
 0xc1f   :  { %v6611_v33 = vmul.f32 %v6491_v62, %v4522_v46  ;;  %v6624_v62 = vmul.f32 %v6621_v22, %v2550_v16 }
 0xc20   :  { %4523 = vpow2.f32 %v2645_v30 }
 0xc21   :  { %v2697_v14 = vsel %vm1310_vm7, %v6611_v33, 0.0 }
 0xc22   :  { %2698 = vadd.xlane.f32.xlu1 %v2697_v14  ;;  %2610 = vmax.xlane.f32.xlu0 %v2609_v8 }
 0xc23   :  { %v2593_v0 = vpop.xlane.xlu0 %2592 }
 0xc24   :  { %v2623_v41 = vsub.f32 %v6514_v19, %v2593_v0  ;;  %v2612_v19 = vsel %vm1310_vm7, %v6624_v62, -inf }
 0xc26   :  { %v4524_v4 = vpop.eup %4523  ;;  %v2647_v13 = vmul.f32 1.442695, %v2623_v41 }
 0xc27   :  { %v6627_v18 = vmul.f32 %v6501_v38, %v4524_v4 }
 0xc28   :  { %4525 = vpow2.f32 %v2647_v13 }
 0xc29   :  { %v2700_v45 = vsel %vm1310_vm7, %v6627_v18, 0.0 }
 0xc2a   :  { %2701 = vadd.xlane.f32.xlu2 %v2700_v45  ;;  %2613 = vmax.xlane.f32.xlu1 %v2612_v19 }
 0xc2e   :  { %v4526_v26 = vpop.eup %4525 }
 0xc2f   :  { %v6634_v56 = vmul.f32 %v6511_v52, %v4526_v26 }
 0xc31   :  { %v2703_v29 = vsel %vm1310_vm7, %v6634_v56, 0.0 }
 0xc32   :  { %2704 = vadd.xlane.f32.xlu2 %v2703_v29 }
 0xc65   :  { %v2681_v32 = vpop.xlane.xlu1 %2680 }
 0xc66   :  { %v2727_v38 = vadd.f32 1e-30, %v2681_v32 }
 0xc68   :  { %4527 = vrcp.f32 %v2727_v38 }
 0xc6d   :  { %v2684_v58 = vpop.xlane.xlu2 %2683  ;;  %v2596_v60 = vpop.xlane.xlu1 %2595 }
 0xc6e   :  { %v2728_v36 = vadd.f32 1e-30, %v2684_v58  ;;  %v2624_v17 = vsub.f32 %v6528_v48, %v2596_v60  ;;  %v4528_v27 = vpop.eup %4527 }
 0xc6f   :  { %v2759_v8 = vmul.f32 %v4528_v27, %v6518_v3 }
 0xc70   :  { %4529 = vrcp.f32 %v2728_v36  ;;  %v2649_v46 = vmul.f32 1.442695, %v2624_v17 }
 0xc72   :  { %4531 = vpow2.f32 %v2649_v46 }
 0xc75   :  { %v2687_v30 = vpop.xlane.xlu2 %2686  ;;  %v2599_v16 = vpop.xlane.xlu1 %2598 }
 0xc76   :  { %v4530_v52 = vpop.eup %4529  ;;  %v2625_v14 = vsub.f32 %v6544_v10, %v2599_v16  ;;  %v2729_v48 = vadd.f32 1e-30, %v2687_v30 }
 0xc77   :  { %v2760_v0 = vmul.f32 %v4530_v52, %v6531_v25 }
 0xc78   :  { %v4532_v41 = vpop.eup %4531  ;;  %v2651_v4 = vmul.f32 1.442695, %v2625_v14 }
 0xc79   :  { %v2775_v13 = vpack.c.bf16 %v2760_v0, %v2759_v8  ;;  %v6643_v45 = vmul.f32 %v6525_v40, %v4532_v41 }
 0xc7a   :  { %4533 = vpow2.f32 %v2651_v4 }
 0xc7b   :  { %4065 = vmatmul.msk.bf16.vlgmr.msrb.gmra.mxu3 %vm1310_vm7, %v2775_v13  ;;  %v2706_v19 = vsel %vm1310_vm7, %v6643_v45, 0.0  ;;  %4535 = vrcp.f32 %v2729_v48 }
 0xc7c   :  { %2707 = vadd.xlane.f32.xlu0 %v2706_v19 }
 0xc7d   :  { %v2690_v26 = vpop.xlane.xlu0 %2689  ;;  %v2602_v10 = vpop.xlane.xlu2 %2601 }
 0xc7e   :  { %v2730_v3 = vadd.f32 1e-30, %v2690_v26  ;;  %v2626_v25 = vsub.f32 %v6560_v57, %v2602_v10 }
 0xc80   :  { %v4534_v29 = vpop.eup %4533  ;;  %4537 = vrcp.f32 %v2730_v3  ;;  %v2653_v32 = vmul.f32 1.442695, %v2626_v25 }
 0xc81   :  { %v6650_v40 = vmul.f32 %v6541_v63, %v4534_v29  ;;  %v4536_v58 = vpop.eup %4535 }
 0xc82   :  { %4539 = vpow2.f32 %v2653_v32  ;;  %v2761_v27 = vmul.f32 %v4536_v58, %v6547_v61 }
 0xc83   :  { %v2709_v38 = vsel %vm1310_vm7, %v6650_v40, 0.0 }
 0xc84   :  { %2710 = vadd.xlane.f32.xlu1 %v2709_v38 }
 0xc85   :  { %v2693_v60 = vpop.xlane.xlu0 %2692  ;;  %v2605_v36 = vpop.xlane.xlu2 %2604 }
 0xc86   :  { %v4538_v17 = vpop.eup %4537  ;;  %v2627_v46 = vsub.f32 %v6576_v21, %v2605_v36  ;;  %v2731_v14 = vadd.f32 1e-30, %v2693_v60 }
 0xc87   :  { %v2762_v57 = vmul.f32 %v4538_v17, %v6563_v44 }
 0xc88   :  { %v4540_v30 = vpop.eup %4539  ;;  %v2655_v16 = vmul.f32 1.442695, %v2627_v46 }
 0xc89   :  { %v2776_v52 = vpack.c.bf16 %v2762_v57, %v2761_v27  ;;  %v6658_v63 = vmul.f32 %v6557_v15, %v4540_v30 }
 0xc8a   :  { %4541 = vpow2.f32 %v2655_v16 }
 0xc8b   :  { %4066 = vmatmul.msk.bf16.gmra.mxu3 %vm1310_vm7, %v2776_v52  ;;  %v2712_v8 = vsel %vm1310_vm7, %v6658_v63, 0.0  ;;  %4543 = vrcp.f32 %v2731_v14 }
 0xc8c   :  { %2713 = vadd.xlane.f32.xlu2 %v2712_v8 }
 0xc8d   :  { %v2696_v0 = vpop.xlane.xlu1 %2695  ;;  %v2608_v21 = vpop.xlane.xlu0 %2607 }
 0xc8e   :  { %v2732_v61 = vadd.f32 1e-30, %v2696_v0  ;;  %v2628_v44 = vsub.f32 %v6592_v28, %v2608_v21 }
 0xc90   :  { %v4542_v41 = vpop.eup %4541  ;;  %4545 = vrcp.f32 %v2732_v61  ;;  %v2657_v4 = vmul.f32 1.442695, %v2628_v44 }
 0xc91   :  { %v6665_v15 = vmul.f32 %v6573_v5, %v4542_v41  ;;  %v4544_v48 = vpop.eup %4543 }
 0xc92   :  { %4547 = vpow2.f32 %v2657_v4  ;;  %v2763_v25 = vmul.f32 %v4544_v48, %v6579_v49 }
 0xc93   :  { %v2715_v13 = vsel %vm1310_vm7, %v6665_v15, 0.0 }
 0xc94   :  { %2716 = vadd.xlane.f32.xlu0 %v2715_v13 }
 0xc95   :  { %v2699_v19 = vpop.xlane.xlu1 %2698  ;;  %v2611_v26 = vpop.xlane.xlu0 %2610 }
 0xc96   :  { %v4546_v10 = vpop.eup %4545  ;;  %v2629_v3 = vsub.f32 %v6608_v35, %v2611_v26  ;;  %v2733_v58 = vadd.f32 1e-30, %v2699_v19 }
 0xc97   :  { %v2764_v28 = vmul.f32 %v4546_v10, %v6595_v42 }
 0xc98   :  { %v4548_v29 = vpop.eup %4547  ;;  %v2659_v32 = vmul.f32 1.442695, %v2629_v3 }
 0xc99   :  { %v2777_v38 = vpack.c.bf16 %v2764_v28, %v2763_v25  ;;  %v2676_v5 = vmul.f32 %v6589_v37, %v4548_v29 }
 0xc9a   :  { %4549 = vpow2.f32 %v2659_v32 }
 0xc9b   :  { %4067 = vmatmul.msk.bf16.gmra.mxu3 %vm1310_vm7, %v2777_v38  ;;  %v2718_v60 = vsel %vm1310_vm7, %v2676_v5, 0.0  ;;  %4551 = vrcp.f32 %v2733_v58 }
 0xc9c   :  { %2719 = vadd.xlane.f32.xlu1 %v2718_v60 }
 0xc9d   :  { %v2702_v36 = vpop.xlane.xlu2 %2701  ;;  %v2614_v17 = vpop.xlane.xlu1 %2613 }
 0xc9e   :  { %v2734_v35 = vadd.f32 1e-30, %v2702_v36  ;;  %v2630_v49 = vsub.f32 %v6624_v62, %v2614_v17 }
 0xca0   :  { %v4550_v46 = vpop.eup %4549  ;;  %4553 = vrcp.f32 %v2734_v35  ;;  %v2661_v42 = vmul.f32 1.442695, %v2630_v49 }
 0xca1   :  { %v2677_v27 = vmul.f32 %v6605_v54, %v4550_v46  ;;  %v4552_v57 = vpop.eup %4551 }
 0xca2   :  { %4555 = vpow2.f32 %v2661_v42  ;;  %v2765_v16 = vmul.f32 %v4552_v57, %v6611_v33 }
 0xca3   :  { %v2721_v37 = vsel %vm1310_vm7, %v2677_v27, 0.0 }
 0xca4   :  { %2722 = vadd.xlane.f32.xlu2 %v2721_v37 }
 0xca5   :  { %v2705_v54 = vpop.xlane.xlu2 %2704 }
 0xca6   :  { %v4554_v30 = vpop.eup %4553  ;;  %v2735_v21 = vadd.f32 1e-30, %v2705_v54 }
 0xca7   :  { %v2766_v52 = vmul.f32 %v4554_v30, %v6627_v18 }
 0xca8   :  { %v4556_v14 = vpop.eup %4555  ;;  %4557 = vrcp.f32 %v2735_v21 }
 0xca9   :  { %v2778_v8 = vpack.c.bf16 %v2766_v52, %v2765_v16  ;;  %v2678_v0 = vmul.f32 %v6621_v22, %v4556_v14 }
 0xcab   :  { %4068 = vmatmul.msk.bf16.gmra.mxu3 %vm1310_vm7, %v2778_v8  ;;  %v2724_v62 = vsel %vm1310_vm7, %v2678_v0, 0.0 }
 0xcac   :  { %2725 = vadd.xlane.f32.xlu0 %v2724_v62 }
 0xcae   :  { %v4558_v41 = vpop.eup %4557 }
 0xcaf   :  { %v2767_v33 = vmul.f32 %v4558_v41, %v6634_v56 }
 0xcef   :  { %v2708_v61 = vpop.xlane.xlu0 %2707 }
 0xcf0   :  { %v2736_v44 = vadd.f32 1e-30, %v2708_v61 }
 0xcf2   :  { %4559 = vrcp.f32 %v2736_v44 }
 0xcf7   :  { %v2711_v13 = vpop.xlane.xlu1 %2710 }
 0xcf8   :  { %v4560_v4 = vpop.eup %4559  ;;  %v2737_v22 = vadd.f32 1e-30, %v2711_v13 }
 0xcf9   :  { %v2768_v18 = vmul.f32 %v4560_v4, %v6643_v45 }
 0xcfa   :  { %4561 = vrcp.f32 %v2737_v22 }
 0xcfb   :  { %v2779_v48 = vpack.c.bf16 %v2768_v18, %v2767_v33 }
 0xcfd   :  { %4069 = vmatmul.msk.bf16.gmra.mxu3 %vm1310_vm7, %v2779_v48 }
 0xcfe   :  { %v2816_v52 = vpop.f32.mrf.mxu3 }
 0xcff   :  { %v2714_v19 = vpop.xlane.xlu2 %2713 }
 0xd00   :  { %v2738_v26 = vadd.f32 1e-30, %v2714_v19  ;;  %v4562_v10 = vpop.eup %4561 }
 0xd01   :  { %v2769_v25 = vmul.f32 %v4562_v10, %v6650_v40 }
 0xd02   :  { %4563 = vrcp.f32 %v2738_v26 }
 0xd06   :  { %v2818_v14 = vpop.f32.mrf.mxu3 }
 0xd07   :  { %v2717_v29 = vpop.xlane.xlu0 %2716  ;;  %v2857_v10 = vmul.f32 %v6293_v43, %v2818_v14 }
 0xd08   :  { %v4564_v3 = vpop.eup %4563  ;;  %v2739_v56 = vadd.f32 1e-30, %v2717_v29 }
 0xd09   :  { %v2770_v28 = vmul.f32 %v4564_v3, %v6658_v63 }
 0xd0a   :  { %4565 = vrcp.f32 %v2739_v56 }
 0xd0b   :  { %v2780_v32 = vpack.c.bf16 %v2770_v28, %v2769_v25 }
 0xd0d   :  { %4070 = vmatmul.msk.bf16.gmra.mxu3 %vm1310_vm7, %v2780_v32 }
 0xd0f   :  { %v2720_v45 = vpop.xlane.xlu1 %2719 }
 0xd10   :  { %v2740_v38 = vadd.f32 1e-30, %v2720_v45  ;;  %v4566_v58 = vpop.eup %4565 }
 0xd11   :  { %v2771_v36 = vmul.f32 %v4566_v58, %v6665_v15  ;;  %v2821_v15 = vpop.f32.mrf.mxu3 }
 0xd12   :  { %4567 = vrcp.f32 %v2740_v38 }
 0xd17   :  { %v2723_v35 = vpop.xlane.xlu2 %2722 }
 0xd18   :  { %v4568_v60 = vpop.eup %4567  ;;  %v2741_v46 = vadd.f32 1e-30, %v2723_v35 }
 0xd19   :  { %v2772_v17 = vmul.f32 %v4568_v60, %v2676_v5  ;;  %v2823_v5 = vpop.f32.mrf.mxu3 }
 0xd1a   :  { %4569 = vrcp.f32 %v2741_v46 }
 0xd1b   :  { %v2781_v49 = vpack.c.bf16 %v2772_v17, %v2771_v36 }
 0xd1d   :  { %4071 = vmatmul.msk.bf16.gmra.mxu3 %vm1310_vm7, %v2781_v49 }
 0xd1f   :  { %v2726_v40 = vpop.xlane.xlu0 %2725 }
 0xd20   :  { %v2742_v63 = vadd.f32 1e-30, %v2726_v40  ;;  %v4570_v42 = vpop.eup %4569 }
 0xd21   :  { %v2773_v57 = vmul.f32 %v4570_v42, %v2677_v27  ;;  %v2826_v8 = vpop.f32.mrf.mxu3  ;;  %v2856_v27 = vmul.f32 %v6261_v59, %v2816_v52 }
 0xd22   :  { %4571 = vrcp.f32 %v2742_v63  ;;  %v2860_v33 = vmul.f32 %v6269_v11, %v2826_v8 }
 0xd24   :  { %v2872_v18 = vadd.f32 %v2860_v33, %v2856_v27  ;;  %v4343_v33 = vld [vmem:[%s6992_s18 + $0x64] sm:$0xf0] }
 0xd28   :  { %v4572_v37 = vpop.eup %4571 }
 0xd29   :  { %v2774_v30 = vmul.f32 %v4572_v37, %v2678_v0  ;;  %v2828_v62 = vpop.f32.mrf.mxu3 }
 0xd2a   :  { %v2861_v19 = vmul.f32 %v6301_v20, %v2828_v62  ;;  %v2858_v20 = vmul.f32 %v6345_v34, %v2821_v15 }
 0xd2b   :  { %v2782_v16 = vpack.c.bf16 %v2774_v30, %v2773_v57 }
 0xd2c   :  { %v2873_v59 = vadd.f32 %v2861_v19, %v2857_v10  ;;  %v4085_v10 = vld [vmem:[%s6992_s18 + $0x40] sm:$0xf] }
 0xd2d   :  { %4072 = vmatmul.msk.bf16.gmra.mxu3 %vm1310_vm7, %v2782_v16 }
 0xd31   :  { %v2831_v54 = vpop.f32.mrf.mxu3 }
 0xd32   :  { %v2862_v29 = vmul.f32 %v6351_v12, %v2831_v54  ;;  %v2859_v12 = vmul.f32 %v6369_v51, %v2823_v5 }
 0xd39   :  { %v2833_v21 = vpop.f32.mrf.mxu3 }
 0xd3a   :  { %v2863_v58 = vmul.f32 %v6375_v50, %v2833_v21 }
 0xd80   :  { %v2836_v61 = vpop.f32.mrf.mxu3 }
 0xd81   :  { %v2864_v0 = vmul.f32 %v6277_v7, %v2836_v61  ;;  %v4109_v61 = vld [vmem:[%s6992_s18 + $0x70] sm:$0xf] }
 0xd83   :  { %v2876_v48 = vadd.f32 %v2872_v18, %v2864_v0  ;;  %v4093_v18 = vld [vmem:[%s6992_s18 + $0x50] sm:$0xf] }
 0xd88   :  { %v2838_v44 = vpop.f32.mrf.mxu3 }
 0xd89   :  { %v2865_v3 = vmul.f32 %v6309_v53, %v2838_v44  ;;  %v2874_v53 = vadd.f32 %v2862_v29, %v2858_v20  ;;  %v4345_v44 = vld [vmem:[%s6992_s18 + $0x74] sm:$0xf0]  ;;  %v4654_v20 = vld [vmem:[%s6997_s23 + $0x8] sm:$0xf] }
 0xd8b   :  { %v2877_v7 = vadd.f32 %v2873_v59, %v2865_v3  ;;  %v4339_v3 = vld [vmem:[%s6992_s18 + $0x44] sm:$0xf0] }
 0xd90   :  { %v2841_v41 = vpop.f32.mrf.mxu3 }
 0xd91   :  { %v2866_v32 = vmul.f32 %v6357_v55, %v2841_v41  ;;  %v2875_v55 = vadd.f32 %v2863_v58, %v2859_v12  ;;  %v4110_v41 = vor.u32 %v4345_v44, %v4109_v61 }
 0xd93   :  { %v2878_v45 = vadd.f32 %v2874_v53, %v2866_v32  ;;  %3059 = vmatpush.bf16.msra.mxu0 %v4110_v41  ;;  %v305_v32 = vperm.slane %v4654_v20, 0 }
 0xd98   :  { %v2843_v4 = vpop.f32.mrf.mxu3 }
 0xd99   :  { %v2867_v60 = vmul.f32 %v6381_v47, %v2843_v4  ;;  %v4101_v4 = vld [vmem:[%s6992_s18 + $0x60] sm:$0xf] }
 0xd9a   :  { %v4102_v27 = vor.u32 %v4343_v33, %v4101_v4  ;;  %v4340_v4 = vld [vmem:[%s6992_s18 + $0x54] sm:$0xf]  ;;  %v4095_v33 = vld [vmem:[%s6992_s18 + $0x58] sm:$0xf0] }
 0xd9b   :  { %v2879_v17 = vadd.f32 %v2875_v55, %v2867_v60  ;;  %v4655_v60 = vld [vmem:[%s6997_s23] sm:$0xff] }
 0xd9c   :  { %3060 = vmatpush.bf16.msra.mxu0 %v4102_v27 }
 0xda0   :  { %v2846_v13 = vpop.f32.mrf.mxu3 }
 0xda1   :  { %v2868_v22 = vmul.f32 %v6285_v24, %v2846_v13  ;;  %v4341_v13 = vld [vmem:[%s6992_s18 + $0x54] sm:$0xf0] }
 0xda3   :  { %v6697_v26 = vadd.f32 %v2876_v48, %v2868_v22  ;;  %v4094_v22 = vor.u32 %v4341_v13, %v4093_v18 }
 0xda5   :  { %v2886_v11 = vsel %vm200_vm0, %v6697_v26, 0.0  ;;  %3061 = vmatpush.bf16.msra.mxu0 %v4094_v22 }
 0xda6   :  { %2887 = vadd.xlane.f32.xlu1 %v2886_v11  ;;  %v4086_v11 = vor.u32 %v4339_v3, %v4085_v10  ;;  %v4087_v10 = vld [vmem:[%s6992_s18 + $0x48] sm:$0xf0] }
 0xda8   :  { %v2848_v25 = vpop.f32.mrf.mxu3 }
 0xda9   :  { %v2869_v28 = vmul.f32 %v6317_v9, %v2848_v25  ;;  %3062 = vmatpush.bf16.msra.mxu0 %v4086_v11 }
 0xdab   :  { %v6705_v24 = vadd.f32 %v2877_v7, %v2869_v28 }
 0xdad   :  { %v2889_v43 = vsel %vm200_vm0, %v6705_v24, 0.0 }
 0xdae   :  { %2890 = vadd.xlane.f32.xlu2 %v2889_v43 }
 0xdb0   :  { %v2851_v56 = vpop.f32.mrf.mxu3 }
 0xdb1   :  { %v2870_v38 = vmul.f32 %v6363_v31, %v2851_v56 }
 0xdb3   :  { %v6713_v9 = vadd.f32 %v2878_v45, %v2870_v38  ;;  %v6782_v45 = vadd.f32 %v5402_v23, %v305_v32  ;;  %v6792_v23 = vld [vmem:[%s6991_s17 + $0x1] ss:$0 sm:$0xff] }
 0xdb5   :  { %v2892_v34 = vsel %vm200_vm0, %v6713_v9, 0.0 }
 0xdb6   :  { %2893 = vadd.xlane.f32.xlu0 %v2892_v34  ;;  %v304_v34 = vperm.slane %v4655_v60, 7 }
 0xdb8   :  { %v2853_v36 = vpop.f32.mrf.mxu3 }
 0xdb9   :  { %v2871_v35 = vmul.f32 %v6387_v6, %v2853_v36 }
 0xdbb   :  { %v6720_v49 = vadd.f32 %v2879_v17, %v2871_v35  ;;  %v728_v35 = vperm.slane %v6782_v45, 0 }
 0xdbd   :  { %v2895_v31 = vsel %vm200_vm0, %v6720_v49, 0.0 }
 0xdbe   :  { %2896 = vadd.xlane.f32.xlu1 %v2895_v31 }
 0xe19   :  { %v2888_v50 = vpop.xlane.xlu1 %2887 }
 0xe1a   :  { %v2898_v51 = vmul.f32 %v2888_v50, %v4977_v1 }
 0xe1c   :  { %v6726_v47 = vsub.f32 %v6697_v26, %v2898_v51  ;;  %v6795_v51 = vadd.f32 %v5400_v39, %v304_v34  ;;  %v4342_v39 = vld [vmem:[%s6992_s18 + $0x64] sm:$0xf] }
 0xe1e   :  { %v2906_v46 = vmul.f32 %v6726_v47, %v6726_v47  ;;  %v739_v34 = vperm.slane %v6795_v51, 1 }
 0xe20   :  { %v2910_v40 = vsel %vm200_vm0, %v2906_v46, 0.0 }
 0xe21   :  { %2911 = vadd.xlane.f32.xlu2 %v2910_v40  ;;  %v2891_v63 = vpop.xlane.xlu2 %2890 }
 0xe22   :  { %v2899_v6 = vmul.f32 %v2891_v63, %v4977_v1 }
 0xe24   :  { %v6733_v42 = vsub.f32 %v6705_v24, %v2899_v6  ;;  %v4344_v6 = vld [vmem:[%s6992_s18 + $0x74] sm:$0xf] }
 0xe26   :  { %v2907_v37 = vmul.f32 %v6733_v42, %v6733_v42 }
 0xe28   :  { %v2913_v57 = vsel %vm200_vm0, %v2907_v37, 0.0  ;;  %v4111_v37 = vld [vmem:[%s6992_s18 + $0x78] sm:$0xf0] }
 0xe29   :  { %2914 = vadd.xlane.f32.xlu0 %v2913_v57  ;;  %v2894_v30 = vpop.xlane.xlu0 %2893  ;;  %v2981_v57 = vadd.f32 1.0, %v728_v35 }
 0xe2a   :  { %v2900_v16 = vmul.f32 %v2894_v30, %v4977_v1 }
 0xe2c   :  { %v6740_v52 = vsub.f32 %v6713_v9, %v2900_v16 }
 0xe2e   :  { %v2908_v14 = vmul.f32 %v6740_v52, %v6740_v52 }
 0xe30   :  { %v2916_v15 = vsel %vm200_vm0, %v2908_v14, 0.0  ;;  %v4114_v14 = vor.u32 %v4344_v6, %v4111_v37  ;;  %v4348_v6 = vld [vmem:[%s6994_s20 + $0x90] sm:$0xff]  ;;  %v4082_v37 = vld [vmem:[%s6993_s19 + $0x2] sm:$0x3] }
 0xe31   :  { %2917 = vadd.xlane.f32.xlu1 %v2916_v15  ;;  %v2897_v5 = vpop.xlane.xlu1 %2896 }
 0xe32   :  { %v2901_v8 = vmul.f32 %v2897_v5, %v4977_v1  ;;  %3078 = vmatpush.bf16.msrb.mxu0 %v4114_v14 }
 0xe34   :  { %v6747_v62 = vsub.f32 %v6720_v49, %v2901_v8  ;;  %v727_v8 = vperm.slane %v6795_v51, 0  ;;  %v4353_v51 = vld [vmem:[%s6994_s20 + $0xb8] sm:$0xff] }
 0xe35   :  { %3303 = vmatpush.bf16.msra.mxu1 %v4353_v51 }
 0xe36   :  { %v2909_v54 = vmul.f32 %v6747_v62, %v6747_v62 }
 0xe38   :  { %v2919_v21 = vsel %vm200_vm0, %v2909_v54, 0.0 }
 0xe39   :  { %2920 = vadd.xlane.f32.xlu2 %v2919_v21 }
 0xe94   :  { %v2912_v0 = vpop.xlane.xlu2 %2911 }
 0xe95   :  { %v2922_v48 = vmul.f32 %v2912_v0, %v4977_v1 }
 0xe97   :  { %v2926_v19 = vadd.f32 1e-05, %v2922_v48  ;;  %v4098_v48 = vor.u32 %v4340_v4, %v4095_v33 }
 0xe99   :  { %4573 = vrsqrt.f32 %v2926_v19  ;;  %vm2936_vm3 = vweird.f32 %v2926_v19 }
 0xe9c   :  { %v2915_v59 = vpop.xlane.xlu0 %2914 }
 0xe9d   :  { %v2923_v25 = vmul.f32 %v2915_v59, %v4977_v1 }
 0xe9f   :  { %v4574_v7 = vpop.eup %4573  ;;  %v2927_v28 = vadd.f32 1e-05, %v2923_v25 }
 0xea0   :  { %v2931_v29 = vmul.f32 %v4574_v7, %v2926_v19  ;;  %vm2937_vm7 = vweird.f32 %v4574_v7  ;;  %v4338_v19 = vld [vmem:[%s6992_s18 + $0x44] sm:$0xf] }
 0xea1   :  { %4575 = vrsqrt.f32 %v2927_v28  ;;  %vm2938_vm4 = vmor %vm2936_vm3, %vm2937_vm7  ;;  %vm2946_vm6 = vweird.f32 %v2927_v28 }
 0xea2   :  { %v2932_v43 = vmul.f32 %v4574_v7, %v2931_v29  ;;  %v740_v29 = vperm.slane %v6782_v45, 1 }
 0xea4   :  { %v2933_v53 = vmul.f32 0.5, %v2932_v43  ;;  %v2918_v56 = vpop.xlane.xlu1 %2917 }
 0xea5   :  { %v2924_v38 = vmul.f32 %v2918_v56, %v4977_v1 }
 0xea6   :  { %v2934_v58 = vsub.f32 1.5, %v2933_v53 }
 0xea7   :  { %v4576_v12 = vpop.eup %4575  ;;  %v2928_v55 = vadd.f32 1e-05, %v2924_v38 }
 0xea8   :  { %v2935_v36 = vmul.f32 %v4574_v7, %v2934_v58  ;;  %v2941_v17 = vmul.f32 %v4576_v12, %v2927_v28  ;;  %vm2947_vm5 = vweird.f32 %v4576_v12  ;;  %v2982_v58 = vadd.f32 1.0, %v740_v29 }
 0xea9   :  { %4577 = vrsqrt.f32 %v2928_v55  ;;  %vm2948_vm8 = vmor %vm2946_vm6, %vm2947_vm5  ;;  %vm2956_vm10 = vweird.f32 %v2928_v55 }
 0xeaa   :  { %v2939_v31 = vsel %vm2938_vm4, %v4574_v7, %v2935_v36  ;;  %v2942_v50 = vmul.f32 %v4576_v12, %v2941_v17  ;;  %v4090_v7 = vor.u32 %v4338_v19, %v4087_v10  ;;  %v4357_v19 = vld [vmem:[%s6994_s20 + $0xd8] sm:$0xff] }
 0xeab   :  { %v2970_v46 = vmul.f32 %v2939_v31, %v6726_v47  ;;  %v4103_v47 = vld [vmem:[%s6992_s18 + $0x68] sm:$0xf0] }
 0xeac   :  { %v2943_v40 = vmul.f32 0.5, %v2942_v50  ;;  %v2921_v63 = vpop.xlane.xlu2 %2920  ;;  %v4106_v61 = vor.u32 %v4342_v39, %v4103_v47  ;;  %v4361_v47 = vld [vmem:[%s6994_s20 + $0xf8] sm:$0xff] }
 0xead   :  { %v2977_v30 = vmul.f32 %v6792_v23, %v2970_v46  ;;  %v2925_v16 = vmul.f32 %v2921_v63, %v4977_v1  ;;  %v4349_v63 = vld [vmem:[%s6994_s20 + $0x98] sm:$0xff] }
 0xeae   :  { %v2944_v15 = vsub.f32 1.5, %v2943_v40  ;;  %3079 = vmatpush.bf16.msrb.mxu0 %v4106_v61  ;;  %v4350_v40 = vld [vmem:[%s6994_s20 + $0xa0] sm:$0xff] }
 0xeaf   :  { %v4578_v5 = vpop.eup %4577  ;;  %v2983_v54 = vmul.f32 %v2981_v57, %v2977_v30  ;;  %v2929_v21 = vadd.f32 1e-05, %v2925_v16  ;;  %v3005_v30 = vperm.slane %v4082_v37, 0  ;;  %v4346_v16 = vld [vmem:[%s6994_s20 + $0x80] sm:$0xff] }
 0xeb0   :  { %v2945_v44 = vmul.f32 %v4576_v12, %v2944_v15  ;;  %v2951_v41 = vmul.f32 %v4578_v5, %v2928_v55  ;;  %vm2957_vm9 = vweird.f32 %v4578_v5 }
 0xeb1   :  { %v2987_v27 = vadd.f32 %v2983_v54, %v727_v8  ;;  %4579 = vrsqrt.f32 %v2929_v21  ;;  %vm2958_vm11 = vmor %vm2956_vm10, %vm2957_vm9  ;;  %vm2966_vm13 = vweird.f32 %v2929_v21 }
 0xeb2   :  { %v2949_v0 = vsel %vm2948_vm8, %v4576_v12, %v2945_v44  ;;  %v2952_v18 = vmul.f32 %v4578_v5, %v2951_v41  ;;  %3080 = vmatpush.bf16.msrb.mxu0 %v4098_v48  ;;  %v4359_v41 = vld [vmem:[%s6994_s20 + $0xe8] sm:$0xff] }
 0xeb3   :  { %v2971_v13 = vmul.f32 %v2949_v0, %v6733_v42  ;;  %v4358_v0 = vld [vmem:[%s6994_s20 + $0xe0] sm:$0xff] }
 0xeb4   :  { %v2953_v22 = vmul.f32 0.5, %v2952_v18 }
 0xeb5   :  { %v2978_v3 = vmul.f32 %v6792_v23, %v2971_v13 }
 0xeb6   :  { %v2954_v11 = vsub.f32 1.5, %v2953_v22  ;;  %3081 = vmatpush.bf16.msrb.mxu0 %v4090_v7 }
 0xeb7   :  { %v4580_v59 = vpop.eup %4579  ;;  %v2984_v25 = vmul.f32 %v2981_v57, %v2978_v3  ;;  %v4347_v57 = vld [vmem:[%s6994_s20 + $0x88] sm:$0xff] }
 0xeb8   :  { %v2955_v42 = vmul.f32 %v4578_v5, %v2954_v11  ;;  %v2961_v28 = vmul.f32 %v4580_v59, %v2929_v21  ;;  %vm2967_vm12 = vweird.f32 %v4580_v59 }
 0xeb9   :  { %v2988_v20 = vadd.f32 %v2984_v25, %v727_v8  ;;  %vm2968_vm14 = vmor %vm2966_vm13, %vm2967_vm12  ;;  %v4360_v8 = vld [vmem:[%s6994_s20 + $0xf0] sm:$0xff] }
 0xeba   :  { %v2959_v32 = vsel %vm2958_vm11, %v4578_v5, %v2955_v42  ;;  %v2962_v43 = vmul.f32 %v4580_v59, %v2961_v28 }
 0xebb   :  { %v2972_v53 = vmul.f32 %v2959_v32, %v6740_v52  ;;  %v2991_v56 = vpack.c.bf16 %v2988_v20, %v2987_v27  ;;  %v4355_v32 = vld [vmem:[%s6994_s20 + $0xc8] sm:$0xff] }
 0xebc   :  { %v2963_v38 = vmul.f32 0.5, %v2962_v43 }
 0xebd   :  { %v2979_v12 = vmul.f32 %v6792_v23, %v2972_v53  ;;  %4115 = vmatmul.msk.bf16.vlgmr.msra.gmra.mxu0 %vm200_vm0, %v2991_v56 }
 0xebe   :  { %v2964_v60 = vsub.f32 1.5, %v2963_v38  ;;  %3322 = vmatpush.bf16.msra.mxu0 %v4361_v47 }
 0xebf   :  { %v2985_v55 = vmul.f32 %v2982_v58, %v2979_v12 }
 0xec0   :  { %v2965_v45 = vmul.f32 %v4580_v59, %v2964_v60  ;;  %v3006_v60 = vperm.slane %v4082_v37, 1 }
 0xec1   :  { %v2989_v36 = vadd.f32 %v2985_v55, %v739_v34  ;;  %v4354_v55 = vld [vmem:[%s6994_s20 + $0xc0] sm:$0xff] }
 0xec2   :  { %v2969_v17 = vsel %vm2968_vm14, %v4580_v59, %v2965_v45  ;;  %3323 = vmatpush.bf16.msra.mxu0 %v4360_v8  ;;  %v4356_v59 = vld [vmem:[%s6994_s20 + $0xd0] sm:$0xff] }
 0xec3   :  { %v2973_v52 = vmul.f32 %v2969_v17, %v6747_v62  ;;  %v4352_v62 = vld [vmem:[%s6994_s20 + $0xb0] sm:$0xff] }
 0xec4   :  { %3304 = vmatpush.bf16.msra.mxu1 %v4352_v62 }
 0xec5   :  { %v2980_v35 = vmul.f32 %v6792_v23, %v2973_v52  ;;  %v4351_v23 = vld [vmem:[%s6994_s20 + $0xa8] sm:$0xff]  ;;  %s4687_s20 = smov 4  }
 0xec6   :  { %3324 = vmatpush.bf16.msra.mxu0 %v4359_v41 }
 0xec7   :  { %v2986_v31 = vmul.f32 %v2982_v58, %v2980_v35 }
 0xec8   :  { %3305 = vmatpush.bf16.msra.mxu1 %v4351_v23 }
 0xec9   :  { %v2990_v50 = vadd.f32 %v2986_v31, %v739_v34 }
 0xeca   :  { %3325 = vmatpush.bf16.msra.mxu0 %v4358_v0 }
 0xecb   :  { %v2992_v46 = vpack.c.bf16 %v2990_v50, %v2989_v36 }
 0xecc   :  { %3306 = vmatpush.bf16.msra.mxu1 %v4350_v40 }
 0xecd   :  { %4116 = vmatmul.msk.bf16.gmra.mxu0 %vm200_vm0, %v2992_v46 }
 0xece   :  { %3326 = vmatpush.bf16.msra.mxu0 %v4357_v19 }
 0xed0   :  { %3307 = vmatpush.bf16.msra.mxu1 %v4349_v63 }
 0xed2   :  { %3327 = vmatpush.bf16.msra.mxu0 %v4356_v59 }
 0xed4   :  { %3308 = vmatpush.bf16.msra.mxu1 %v4348_v6 }
 0xed6   :  { %3328 = vmatpush.bf16.msra.mxu0 %v4355_v32 }
 0xed8   :  { %3309 = vmatpush.bf16.msra.mxu1 %v4347_v57 }
 0xeda   :  { %3329 = vmatpush.bf16.msra.mxu0 %v4354_v55 }
 0xedc   :  { %3310 = vmatpush.bf16.msra.mxu1 %v4346_v16 }
 0xedd   :  { %4117 = vmatmul.msk.bf16.vlgmr.msrb.gmra.mxu0 %vm200_vm0, %v2991_v56 }
 0xeed   :  { %4118 = vmatmul.msk.bf16.gmra.mxu0 %vm200_vm0, %v2992_v46 }
 0xf3a   :  { %v3064_v14 = vpop.f32.mrf.mxu0 }
 0xf3b   :  { %v3065_v39 = vadd.f32 %v3064_v14, %v3005_v30 }
 0xf3d   :  { %v3101_v15 = vmul.f32 0.044715, %v3065_v39  ;;  %v3093_v56 = vmul.f32 0.5, %v3065_v39 }
 0xf3f   :  { %v3109_v5 = vmul.f32 %v3101_v15, %v3065_v39 }
 0xf41   :  { %v3117_v54 = vmul.f32 %v3109_v5, %v3065_v39 }
 0xf42   :  { %v3066_v21 = vpop.f32.mrf.mxu0 }
 0xf43   :  { %v3125_v61 = vadd.f32 %v3117_v54, %v3065_v39  ;;  %v3067_v44 = vadd.f32 %v3066_v21, %v3005_v30 }
 0xf45   :  { %v3103_v4 = vmul.f32 0.044715, %v3067_v44  ;;  %v3133_v33 = vmul.f32 0.7978846, %v3125_v61  ;;  %v3095_v38 = vmul.f32 0.5, %v3067_v44 }
 0xf47   :  { %v3111_v27 = vmul.f32 %v3103_v4, %v3067_v44  ;;  %4581 = vtanh.f32 %v3133_v33 }
 0xf49   :  { %v3119_v18 = vmul.f32 %v3111_v27, %v3067_v44 }
 0xf4a   :  { %v3069_v13 = vpop.f32.mrf.mxu0 }
 0xf4b   :  { %v3127_v48 = vadd.f32 %v3119_v18, %v3067_v44  ;;  %v3070_v22 = vadd.f32 %v3069_v13, %v3005_v30 }
 0xf4d   :  { %v3135_v10 = vmul.f32 0.7978846, %v3127_v48  ;;  %v3105_v3 = vmul.f32 0.044715, %v3070_v22  ;;  %v4582_v25 = vpop.eup %4581  ;;  %v3097_v14 = vmul.f32 0.5, %v3070_v22 }
 0xf4e   :  { %v3149_v20 = vadd.f32 1.0, %v4582_v25 }
 0xf4f   :  { %4583 = vtanh.f32 %v3135_v10  ;;  %v3113_v11 = vmul.f32 %v3105_v3, %v3070_v22 }
 0xf50   :  { %v3157_v45 = vmul.f32 %v3149_v20, %v3093_v56 }
 0xf51   :  { %v3121_v7 = vmul.f32 %v3113_v11, %v3070_v22 }
 0xf52   :  { %v3071_v42 = vpop.f32.mrf.mxu0 }
 0xf53   :  { %v3072_v28 = vadd.f32 %v3071_v42, %v3005_v30  ;;  %v3129_v29 = vadd.f32 %v3121_v7, %v3070_v22 }
 0xf55   :  { %v4584_v43 = vpop.eup %4583  ;;  %v3107_v53 = vmul.f32 0.044715, %v3072_v28  ;;  %v3137_v34 = vmul.f32 0.7978846, %v3129_v29  ;;  %v3099_v39 = vmul.f32 0.5, %v3072_v28 }
 0xf56   :  { %v3151_v58 = vadd.f32 1.0, %v4584_v43 }
 0xf57   :  { %v3115_v12 = vmul.f32 %v3107_v53, %v3072_v28  ;;  %4585 = vtanh.f32 %v3137_v34 }
 0xf58   :  { %v3159_v36 = vmul.f32 %v3151_v58, %v3095_v38 }
 0xf59   :  { %v3123_v17 = vmul.f32 %v3115_v12, %v3072_v28 }
 0xf5a   :  { %v3083_v52 = vpop.f32.mrf.mxu0  ;;  %v3165_v35 = vpack.c.bf16 %v3159_v36, %v3157_v45 }
 0xf5b   :  { %v3084_v31 = vadd.f32 %v3083_v52, %v3006_v60  ;;  %v3131_v50 = vadd.f32 %v3123_v17, %v3072_v28 }
 0xf5c   :  { %3311 = vmatmul.bf16.vlgmr.msra.gmra.mxu1 %v3165_v35  ;;  %v4393_v35 = vld [vmem:[%s6995_s21 + $0x1] ss:$0 sm:$0xff] }
 0xf5d   :  { %v3102_v46 = vmul.f32 0.044715, %v3084_v31  ;;  %v3139_v51 = vmul.f32 0.7978846, %v3131_v50  ;;  %v4586_v23 = vpop.eup %4585  ;;  %v3094_v59 = vmul.f32 0.5, %v3084_v31 }
 0xf5e   :  { %v3153_v57 = vadd.f32 1.0, %v4586_v23 }
 0xf5f   :  { %v3110_v62 = vmul.f32 %v3102_v46, %v3084_v31  ;;  %4587 = vtanh.f32 %v3139_v51  ;;  %v729_v51 = vperm.slane %v5429_v2, 0 }
 0xf60   :  { %v3161_v8 = vmul.f32 %v3153_v57, %v3097_v14 }
 0xf61   :  { %v3118_v40 = vmul.f32 %v3110_v62, %v3084_v31 }
 0xf62   :  { %v3085_v63 = vpop.f32.mrf.mxu0 }
 0xf63   :  { %v3126_v6 = vadd.f32 %v3118_v40, %v3084_v31  ;;  %v3086_v37 = vadd.f32 %v3085_v63, %v3006_v60 }
 0xf65   :  { %v4588_v30 = vpop.eup %4587  ;;  %v3104_v16 = vmul.f32 0.044715, %v3086_v37  ;;  %v3134_v15 = vmul.f32 0.7978846, %v3126_v6  ;;  %v3096_v25 = vmul.f32 0.5, %v3086_v37 }
 0xf66   :  { %v3155_v47 = vadd.f32 1.0, %v4588_v30 }
 0xf67   :  { %v3112_v5 = vmul.f32 %v3104_v16, %v3086_v37  ;;  %4589 = vtanh.f32 %v3134_v15 }
 0xf68   :  { %v3163_v54 = vmul.f32 %v3155_v47, %v3099_v39 }
 0xf69   :  { %v3120_v21 = vmul.f32 %v3112_v5, %v3086_v37  ;;  %v741_v5 = vperm.slane %v5429_v2, 1 }
 0xf6a   :  { %v3088_v61 = vpop.f32.mrf.mxu0  ;;  %v3167_v44 = vpack.c.bf16 %v3163_v54, %v3161_v8 }
 0xf6b   :  { %v3128_v41 = vadd.f32 %v3120_v21, %v3086_v37  ;;  %v3089_v4 = vadd.f32 %v3088_v61, %v3006_v60 }
 0xf6c   :  { %3316 = vmatmul.bf16.gmra.mxu1 %v3167_v44 }
 0xf6d   :  { %v3136_v33 = vmul.f32 0.7978846, %v3128_v41  ;;  %v3106_v27 = vmul.f32 0.044715, %v3089_v4  ;;  %v4590_v18 = vpop.eup %4589 }
 0xf6e   :  { %v3150_v10 = vadd.f32 1.0, %v4590_v18 }
 0xf6f   :  { %4591 = vtanh.f32 %v3136_v33  ;;  %v3114_v0 = vmul.f32 %v3106_v27, %v3089_v4 }
 0xf70   :  { %v3158_v29 = vmul.f32 %v3150_v10, %v3094_v59 }
 0xf71   :  { %v3122_v13 = vmul.f32 %v3114_v0, %v3089_v4 }
 0xf72   :  { %v3090_v48 = vpop.f32.mrf.mxu0 }
 0xf73   :  { %v3091_v22 = vadd.f32 %v3090_v48, %v3006_v60  ;;  %v3130_v19 = vadd.f32 %v3122_v13, %v3089_v4  ;;  %v3098_v60 = vmul.f32 0.5, %v3089_v4 }
 0xf75   :  { %v4592_v3 = vpop.eup %4591  ;;  %v3108_v11 = vmul.f32 0.044715, %v3091_v22  ;;  %v3138_v28 = vmul.f32 0.7978846, %v3130_v19  ;;  %v3100_v34 = vmul.f32 0.5, %v3091_v22 }
 0xf76   :  { %v3152_v7 = vadd.f32 1.0, %v4592_v3 }
 0xf77   :  { %v3116_v42 = vmul.f32 %v3108_v11, %v3091_v22  ;;  %4593 = vtanh.f32 %v3138_v28 }
 0xf78   :  { %v3160_v20 = vmul.f32 %v3152_v7, %v3096_v25 }
 0xf79   :  { %v3124_v32 = vmul.f32 %v3116_v42, %v3091_v22 }
 0xf7a   :  { %v3166_v43 = vpack.c.bf16 %v3160_v20, %v3158_v29 }
 0xf7b   :  { %v3132_v53 = vadd.f32 %v3124_v32, %v3091_v22 }
 0xf7c   :  { %3330 = vmatmul.bf16.vlgmr.msra.gmra.mxu0 %v3166_v43  ;;  %v4365_v43 = vld [vmem:[%s6999_s25 + $0x18] sm:$0xff] }
 0xf7d   :  { %v3140_v56 = vmul.f32 0.7978846, %v3132_v53  ;;  %v4594_v38 = vpop.eup %4593  ;;  %3502 = vmatpush.bf16.msrb.mxu1 %v4365_v43  ;;  %v4364_v53 = vld [vmem:[%s6999_s25 + $0x10] sm:$0xff] }
 0xf7e   :  { %v3154_v58 = vadd.f32 1.0, %v4594_v38 }
 0xf7f   :  { %4595 = vtanh.f32 %v3140_v56 }
 0xf80   :  { %v3162_v45 = vmul.f32 %v3154_v58, %v3098_v60  ;;  %v4363_v58 = vld [vmem:[%s6999_s25 + $0x8] sm:$0xff]  ;;  %v4362_v60 = vld [vmem:[%s6999_s25] sm:$0xff] }
 0xf81   :  { %3503 = vmatpush.bf16.msrb.mxu1 %v4364_v53 }
 0xf85   :  { %v4596_v12 = vpop.eup %4595  ;;  %3504 = vmatpush.bf16.msrb.mxu1 %v4363_v58 }
 0xf86   :  { %v3156_v55 = vadd.f32 1.0, %v4596_v12 }
 0xf88   :  { %v3164_v36 = vmul.f32 %v3156_v55, %v3100_v34 }
 0xf89   :  { %3505 = vmatpush.bf16.msrb.mxu1 %v4362_v60 }
 0xf8a   :  { %v3168_v17 = vpack.c.bf16 %v3164_v36, %v3162_v45 }
 0xf8c   :  { %3335 = vmatmul.bf16.gmra.mxu0 %v3168_v17 }
 0xfd9   :  { %v3312_v52 = vpop.f32.mrf.mxu1 }
 0xfda   :  { %v3313_v31 = vadd.f32 %v4393_v35, %v3312_v52 }
 0xfe1   :  { %v3314_v50 = vpop.f32.mrf.mxu1 }
 0xfe2   :  { %v3315_v63 = vadd.f32 %v4393_v35, %v3314_v50 }
 0xfe9   :  { %v3317_v30 = vpop.f32.mrf.mxu1 }
 0xfea   :  { %v3318_v39 = vadd.f32 %v4393_v35, %v3317_v30 }
 0xff9   :  { %v3331_v46 = vpop.f32.mrf.mxu0 }
 0xffa   :  { %v3332_v62 = vadd.f32 %v3331_v46, %v3313_v31 }
 0xffc   :  { %v3341_v23 = vmul.f32 %v3332_v62, %v729_v51 }
 0xffe   :  { %v3345_v40 = vadd.f32 %v3341_v23, %v6697_v26  ;;  %v3319_v26 = vpop.f32.mrf.mxu1 }
 0xfff   :  { %v3320_v61 = vadd.f32 %v4393_v35, %v3319_v26 }
0x1000   :  { %v3350_v6 = vsel %vm200_vm0, %v3345_v40, 0.0 }
0x1001   :  { %v3333_v37 = vpop.f32.mrf.mxu0  ;;  %3351 = vadd.xlane.f32.xlu0 %v3350_v6 }
0x1002   :  { %v3334_v57 = vadd.f32 %v3333_v37, %v3315_v63  ;;  %v7037_v63 = vld [vmem:[#allocation5_spill] sm:$0xff]  ;;  %v6940_v37 = vld [vmem:[%s6998_s24] ss:$0 sm:$0xff] }
0x1003   :  { %v731_v6 = vperm.slane %v7037_v63, 0 }
0x1004   :  { %v3342_v16 = vmul.f32 %v3334_v57, %v729_v51 }
0x1006   :  { %v3346_v14 = vadd.f32 %v3342_v16, %v6705_v24 }
0x1008   :  { %v3353_v47 = vsel %vm200_vm0, %v3346_v14, 0.0 }
0x1009   :  { %v3336_v15 = vpop.f32.mrf.mxu0  ;;  %3354 = vadd.xlane.f32.xlu1 %v3353_v47  ;;  %v3445_v47 = vadd.f32 1.0, %v731_v6 }
0x100a   :  { %v3337_v8 = vadd.f32 %v3336_v15, %v3318_v39 }
0x100c   :  { %v3343_v54 = vmul.f32 %v3337_v8, %v741_v5  ;;  %v3520_v8 = vld [vmem:[%s7038_s8 + $0x8] sm:$0xff] }
0x100e   :  { %v3347_v21 = vadd.f32 %v3343_v54, %v6713_v9  ;;  %v3521_v54 = vld [vmem:[%s7038_s8 + $0x10] sm:$0xff] }
0x1010   :  { %v3356_v44 = vsel %vm200_vm0, %v3347_v21, 0.0 }
0x1011   :  { %v3338_v41 = vpop.f32.mrf.mxu0  ;;  %3357 = vadd.xlane.f32.xlu2 %v3356_v44 }
0x1012   :  { %v3339_v4 = vadd.f32 %v3338_v41, %v3320_v61  ;;  %v3519_v61 = vld [vmem:[%s7038_s8] sm:$0xff] }
0x1013   :  { %v7039_v41 = vld [vmem:[#allocation6_spill] sm:$0xff] }
0x1014   :  { %v3344_v33 = vmul.f32 %v3339_v4, %v741_v5  ;;  %v742_v58 = vperm.slane %v7039_v41, 1 }
0x1016   :  { %v3348_v24 = vadd.f32 %v3344_v33, %v6720_v49 }
0x1018   :  { %v3359_v27 = vsel %vm200_vm0, %v3348_v24, 0.0 }
0x1019   :  { %3360 = vadd.xlane.f32.xlu0 %v3359_v27 }
0x1074   :  { %v3352_v0 = vpop.xlane.xlu0 %3351 }
0x1075   :  { %v3362_v2 = vmul.f32 %v3352_v0, %v4977_v1 }
0x1077   :  { %v3366_v18 = vsub.f32 %v3345_v40, %v3362_v2 }
0x1079   :  { %v3370_v13 = vmul.f32 %v3366_v18, %v3366_v18 }
0x107b   :  { %v3374_v48 = vsel %vm200_vm0, %v3370_v13, 0.0 }
0x107c   :  { %v3355_v9 = vpop.xlane.xlu1 %3354  ;;  %3375 = vadd.xlane.f32.xlu1 %v3374_v48 }
0x107d   :  { %v3363_v22 = vmul.f32 %v3355_v9, %v4977_v1 }
0x107f   :  { %v6904_v19 = vsub.f32 %v3346_v14, %v3363_v22 }
0x1081   :  { %v3371_v10 = vmul.f32 %v6904_v19, %v6904_v19 }
0x1083   :  { %v3377_v49 = vsel %vm200_vm0, %v3371_v10, 0.0  ;;  %v3522_v10 = vld [vmem:[%s7038_s8 + $0x18] sm:$0xff] }
0x1084   :  { %3378 = vadd.xlane.f32.xlu2 %v3377_v49  ;;  %v3358_v3 = vpop.xlane.xlu2 %3357 }
0x1085   :  { %v3364_v11 = vmul.f32 %v3358_v3, %v4977_v1 }
0x1087   :  { %v6910_v59 = vsub.f32 %v3347_v21, %v3364_v11  ;;  %v4683_v21 = vmov 0  }
0x1088   :  { %4384 = vset.pattern.permute.xlu0 %v4683_v21  ;;  %4385 = vset.pattern.permute.xlu1 %v4683_v21 }
0x1089   :  { %v3372_v25 = vmul.f32 %v6910_v59, %v6910_v59  ;;  %4383 = vset.pattern.permute.xlu2 %v4683_v21 }
0x108b   :  { %v3380_v7 = vsel %vm200_vm0, %v3372_v25, 0.0 }
0x108c   :  { %v3361_v42 = vpop.xlane.xlu0 %3360  ;;  %3381 = vadd.xlane.f32.xlu0 %v3380_v7  ;;  %v743_v7 = vperm.slane %v7037_v63, 1 }
0x108d   :  { %v3365_v28 = vmul.f32 %v3361_v42, %v4977_v1 }
0x108e   :  { %v3446_v53 = vadd.f32 1.0, %v743_v7 }
0x108f   :  { %v6916_v29 = vsub.f32 %v3348_v24, %v3365_v28 }
0x1091   :  { %v3373_v20 = vmul.f32 %v6916_v29, %v6916_v29 }
0x1093   :  { %v3383_v32 = vsel %vm200_vm0, %v3373_v20, 0.0 }
0x1094   :  { %3384 = vadd.xlane.f32.xlu1 %v3383_v32 }
0x109c   :  { %3524 = vperm.xlu2 %4383, %v3519_v61  }
0x10a0   :  { %3527 = vperm.xlu0 %4384, %v3520_v8  }
0x10a4   :  { %3533 = vperm.xlu2 %4383, %v3522_v10  }
0x10ad   :  { %3530 = vperm.xlu1 %4385, %v3521_v54  }
0x10ef   :  { %v3376_v56 = vpop.xlane.xlu1 %3375 }
0x10f0   :  { %v3386_v38 = vmul.f32 %v3376_v56, %v4977_v1 }
0x10f2   :  { %v3390_v12 = vadd.f32 1e-05, %v3386_v38 }
0x10f4   :  { %4597 = vrsqrt.f32 %v3390_v12  ;;  %vm3400_vm1 = vweird.f32 %v3390_v12 }
0x10f7   :  { %v3379_v34 = vpop.xlane.xlu2 %3378 }
0x10f8   :  { %v3387_v55 = vmul.f32 %v3379_v34, %v4977_v1 }
0x10fa   :  { %v4598_v45 = vpop.eup %4597  ;;  %v3391_v36 = vadd.f32 1e-05, %v3387_v55 }
0x10fb   :  { %v3395_v17 = vmul.f32 %v4598_v45, %v3390_v12  ;;  %vm3401_vm15 = vweird.f32 %v4598_v45 }
0x10fc   :  { %4599 = vrsqrt.f32 %v3391_v36  ;;  %vm3402_vm2 = vmor %vm3400_vm1, %vm3401_vm15  ;;  %vm3410_vm3 = vweird.f32 %v3391_v36 }
0x10fd   :  { %v3396_v52 = vmul.f32 %v4598_v45, %v3395_v17 }
0x10ff   :  { %v3397_v35 = vmul.f32 0.5, %v3396_v52  ;;  %v3382_v31 = vpop.xlane.xlu0 %3381 }
0x1100   :  { %v3388_v50 = vmul.f32 %v3382_v31, %v4977_v1  ;;  %v3455_v31 = vld [vmem:[%s7040_s12] sm:$0x3] }
0x1101   :  { %v3398_v46 = vsub.f32 1.5, %v3397_v35  ;;  %v3517_v35 = vlaneseq }
0x1102   :  { %v4600_v51 = vpop.eup %4599  ;;  %v3392_v62 = vadd.f32 1e-05, %v3388_v50 }
0x1103   :  { %v3399_v23 = vmul.f32 %v4598_v45, %v3398_v46  ;;  %v3405_v40 = vmul.f32 %v4600_v51, %v3391_v36  ;;  %vm3411_vm7 = vweird.f32 %v4600_v51  ;;  %v3518_v46 = vand.u32 127, %v3517_v35 }
0x1104   :  { %4601 = vrsqrt.f32 %v3392_v62  ;;  %vm3412_vm4 = vmor %vm3410_vm3, %vm3411_vm7  ;;  %vm3420_vm6 = vweird.f32 %v3392_v62 }
0x1105   :  { %v3403_v57 = vsel %vm3402_vm2, %v4598_v45, %v3399_v23  ;;  %v3406_v30 = vmul.f32 %v4600_v51, %v3405_v40  ;;  %v3456_v23 = vperm.slane %v3455_v31, 0  ;;  %v4684_v40 = vmov 0.0  }
0x1106   :  { %v3434_v16 = vmul.f32 %v3403_v57, %v3366_v18 }
0x1107   :  { %v3407_v14 = vmul.f32 0.5, %v3406_v30  ;;  %v3385_v39 = vpop.xlane.xlu1 %3384 }
0x1108   :  { %v3441_v15 = vmul.f32 %v6940_v37, %v3434_v16  ;;  %v3389_v5 = vmul.f32 %v3385_v39, %v4977_v1  ;;  %v730_v1 = vperm.slane %v7039_v41, 0 }
0x1109   :  { %v3408_v26 = vsub.f32 1.5, %v3407_v14 }
0x110a   :  { %v4602_v44 = vpop.eup %4601  ;;  %v3447_v4 = vmul.f32 %v3445_v47, %v3441_v15  ;;  %v3393_v33 = vadd.f32 1e-05, %v3389_v5  ;;  %v3457_v15 = vperm.slane %v3455_v31, 1 }
0x110b   :  { %v3409_v24 = vmul.f32 %v4600_v51, %v3408_v26  ;;  %v3415_v27 = vmul.f32 %v4602_v44, %v3392_v62  ;;  %vm3421_vm5 = vweird.f32 %v4602_v44 }
0x110c   :  { %v3451_v0 = vadd.f32 %v3447_v4, %v730_v1  ;;  %4603 = vrsqrt.f32 %v3393_v33  ;;  %vm3422_vm8 = vmor %vm3420_vm6, %vm3421_vm5  ;;  %vm3430_vm10 = vweird.f32 %v3393_v33 }
0x110d   :  { %v3413_v2 = vsel %vm3412_vm4, %v4600_v51, %v3409_v24  ;;  %v3416_v18 = vmul.f32 %v4602_v44, %v3415_v27  ;;  %v3525_v51 = vpop.permute.xlu2 %3524 }
0x110e   :  { %v3435_v13 = vmul.f32 %v3413_v2, %v6904_v19  ;;  %vm3535_vm12 = vcmp.ne.s32.totalorder %v3518_v46, %v3525_v51 }
0x110f   :  { %v3417_v48 = vmul.f32 0.5, %v3416_v18  ;;  %v4234_v63 = vsel %vm3535_vm12, 1.0, %v4684_v40 }
0x1110   :  { %v3442_v9 = vmul.f32 %v6940_v37, %v3435_v13 }
0x1111   :  { %v3418_v22 = vsub.f32 1.5, %v3417_v48 }
0x1112   :  { %v4604_v49 = vpop.eup %4603  ;;  %v3448_v3 = vmul.f32 %v3445_v47, %v3442_v9  ;;  %v3528_v62 = vpop.permute.xlu0 %3527 }
0x1113   :  { %v3419_v11 = vmul.f32 %v4602_v44, %v3418_v22  ;;  %v3425_v25 = vmul.f32 %v4604_v49, %v3393_v33  ;;  %vm3431_vm9 = vweird.f32 %v4604_v49  ;;  %vm3536_vm13 = vcmp.ne.s32.totalorder %v3518_v46, %v3528_v62 }
0x1114   :  { %v3452_v42 = vadd.f32 %v3448_v3, %v730_v1  ;;  %vm3432_vm11 = vmor %vm3430_vm10, %vm3431_vm9  ;;  %v4235_v6 = vsel %vm3536_vm13, 1.0, %v4684_v40 }
0x1115   :  { %v3423_v19 = vsel %vm3422_vm8, %v4602_v44, %v3419_v11  ;;  %v3426_v28 = vmul.f32 %v4604_v49, %v3425_v25  ;;  %v3534_v5 = vpop.permute.xlu2 %3533 }
0x1116   :  { %v3436_v20 = vmul.f32 %v3423_v19, %v6910_v59  ;;  %v3458_v32 = vpack.c.bf16 %v3452_v42, %v3451_v0  ;;  %vm3538_vm14 = vcmp.ne.s32.totalorder %v3518_v46, %v3534_v5 }
0x1117   :  { %v3427_v43 = vmul.f32 0.5, %v3426_v28  ;;  %v4237_v61 = vsel %vm3538_vm14, 1.0, %v4684_v40 }
0x1118   :  { %v3443_v56 = vmul.f32 %v6940_v37, %v3436_v20  ;;  %4232 = vmatmul.msk.bf16.vlgmr.msrb.gmra.mxu1 %vm200_vm0, %v3458_v32 }
0x1119   :  { %v3428_v38 = vsub.f32 1.5, %v3427_v43 }
0x111a   :  { %v3449_v12 = vmul.f32 %v3446_v53, %v3443_v56 }
0x111b   :  { %v3429_v60 = vmul.f32 %v4604_v49, %v3428_v38 }
0x111c   :  { %v3453_v34 = vadd.f32 %v3449_v12, %v742_v58 }
0x111d   :  { %v3433_v55 = vsel %vm3432_vm11, %v4604_v49, %v3429_v60 }
0x111e   :  { %v3437_v45 = vmul.f32 %v3433_v55, %v6916_v29 }
0x111f   :  { %v3531_v47 = vpop.permute.xlu1 %3530 }
0x1120   :  { %v3444_v59 = vmul.f32 %v6940_v37, %v3437_v45 }
0x1122   :  { %v3450_v36 = vmul.f32 %v3446_v53, %v3444_v59 }
0x1124   :  { %v3454_v17 = vadd.f32 %v3450_v36, %v742_v58 }
0x1126   :  { %v3459_v52 = vpack.c.bf16 %v3454_v17, %v3453_v34 }
0x1128   :  { %4233 = vmatmul.msk.bf16.gmra.mxu1 %vm200_vm0, %v3459_v52  ;;  %vm3537_vm0 = vcmp.ne.s32.totalorder %v3518_v46, %v3531_v47 }
0x1129   :  { %v4236_v54 = vsel %vm3537_vm0, 1.0, %v4684_v40 }
0x1195   :  { %v3507_v50 = vpop.f32.mrf.mxu1 }
0x1196   :  { %v3508_v29 = vadd.f32 %v3507_v50, %v3456_v23 }
0x1198   :  { %v3547_v30 = vmul.f32 %v4234_v63, %v3508_v29 }
0x119d   :  { %v3509_v37 = vpop.f32.mrf.mxu1 }
0x119e   :  { %v3510_v57 = vadd.f32 %v3509_v37, %v3456_v23 }
0x11a0   :  { %v3548_v16 = vmul.f32 %v4235_v6, %v3510_v57 }
0x11a2   :  { %v4369_v14 = vpack.c.bf16 %v3548_v16, %v3547_v30 }
0x11a4   :  { %4370 = vst [vmem:[#allocation2] sm:$0xff] %v4369_v14  }
0x11a5   :  { %v3512_v39 = vpop.f32.mrf.mxu1 }
0x11a6   :  { %v3513_v8 = vadd.f32 %v3512_v39, %v3457_v15 }
0x11a8   :  { %v3549_v44 = vmul.f32 %v4236_v54, %v3513_v8 }
0x11ad   :  { %v3514_v26 = vpop.f32.mrf.mxu1 }
0x11ae   :  { %v3515_v21 = vadd.f32 %v3514_v26, %v3457_v15 }
0x11b0   :  { %v3550_v41 = vmul.f32 %v4237_v61, %v3515_v21 }
0x11b2   :  { %v4374_v1 = vpack.c.bf16 %v3550_v41, %v3549_v44 }
0x11b4   :  { %4376 = vst [vmem:[#allocation2 + $0x8] sm:$0xff] %v4374_v1  }
0x11b5   :  { %3571 = dma.vmem_to_hbm [thread:$0]  %s3564_s13, 256, %s3566_s2, [#allocation3], %s4686_s3, %s4686_s3, %s4687_s20  }
0x11b6   :  { %4680 = dma.done.wait [#allocation3], 256  }
0x11b7   :  { %4681 = vsyncadd [#allocation3], 4294967040 }
0x11b8   :  { %3576 = vsyncpa [#allocation3], 1 }

</bundles_post_ra>
